<compile_context>
chip_gen: v5e
topology: v5e:2x2
jax: 0.10.0
libtpu: 0.0.40
codegen_flags: <defaults>
</compile_context>

<pallas_src>
import jax
import jax.numpy as jnp
from jax.experimental import pallas as pl
from jax.experimental.pallas import tpu as pltpu

EPS = 1e-5
LANE = 128


def _round_up(n, m):
    return ((n + m - 1) // m) * m


def _vmem_limit_bytes():
    """~15% headroom below physical VMEM; capped, with a safe fallback."""
    try:
        cap = pltpu.get_tpu_info().vmem_capacity_bytes
        return max(min(int(cap * 0.85), 112 * 1024 * 1024), 32 * 1024 * 1024)
    except Exception:
        return 64 * 1024 * 1024


def _const_spec(shape, index_map):
    """BlockSpec for operands whose block index never changes (weights, bias,
    BN affine): single-buffer them to halve their VMEM footprint."""
    try:
        return pl.BlockSpec(shape, index_map, pipeline_mode=pl.Buffered(1))
    except TypeError:  # older jax without pipeline_mode
        return pl.BlockSpec(shape, index_map)


# ---------------------------------------------------------------------------
# In-kernel helpers
# ---------------------------------------------------------------------------
def _conv3x3(src, pad_ref, w_ref):
    """3x3 'same' conv of src (Hp, Wp, Cin) -> f32 (Hp*Wp, Cout).

    MXU operands are bf16 (pad scratch + weights); accumulation is f32.
    9 shifted-view matmuls, no im2col concatenate copies.
    """
    Hp, Wp, Cin = src.shape
    Cout = w_ref.shape[-1]
    dt = pad_ref.dtype

    # Re-zero only the 1-wide border ring (unconditional: megacore-safe, tiny).
    pad_ref[pl.ds(0, 1), :, :] = jnp.zeros((1, Wp + 2, Cin), dt)
    pad_ref[pl.ds(Hp + 1, 1), :, :] = jnp.zeros((1, Wp + 2, Cin), dt)
    pad_ref[:, pl.ds(0, 1), :] = jnp.zeros((Hp + 2, 1, Cin), dt)
    pad_ref[:, pl.ds(Wp + 1, 1), :] = jnp.zeros((Hp + 2, 1, Cin), dt)
    # Interior is fully overwritten every step.
    pad_ref[pl.ds(1, Hp), pl.ds(1, Wp), :] = src.astype(dt)

    acc = jnp.zeros((Hp * Wp, Cout), jnp.float32)
    for ky in range(3):
        for kx in range(3):
            tap = pad_ref[pl.ds(ky, Hp), pl.ds(kx, Wp), :].reshape(Hp * Wp, Cin)
            acc = acc + jnp.dot(tap, w_ref[ky * 3 + kx],
                                preferred_element_type=jnp.float32)
    return acc


def _store_stats(st_ref, acc):
    """Per-batch partial BN stats (row 0 = sum, row 1 = sum of squares), f32."""
    s = jnp.sum(acc, axis=0, keepdims=True)
    sq = jnp.sum(acc * acc, axis=0, keepdims=True)
    st_ref[0] = jnp.concatenate([s, sq], axis=0)


# ---------------------------------------------------------------------------
# Kernels
# ---------------------------------------------------------------------------
def _pool_conv1_kernel(x_ref, w_ref, b_ref, h_ref, st_ref, pad_ref):
    # x_ref: (1, Hp, 2, Wp, 2*Ci) f32 — H split into (Hp,2), W-pairs merged
    # into the lane dim, so the 2x2 max-pool is plane max + lane-half max.
    Ci = w_ref.shape[1]
    Hp, Wp = x_ref.shape[1], x_ref.shape[3]
    x = x_ref[0]
    rows = jnp.maximum(x[:, 0], x[:, 1])                       # pool H pairs
    pooled = jnp.maximum(rows[..., :Ci], rows[..., Ci:])       # pool W pairs
    acc = _conv3x3(pooled, pad_ref, w_ref)                     # f32 (Hp*Wp, Cm)
    _store_stats(st_ref, acc)                                  # pre-bias stats
    h_ref[0] = (acc + b_ref[...]).reshape(Hp, Wp, -1).astype(h_ref.dtype)


def _bn_relu_conv2_kernel(h_ref, a_ref, c_ref, w_ref, b_ref,
                          o_ref, st_ref, pad_ref):
    Hp, Wp = h_ref.shape[1], h_ref.shape[2]
    y = jnp.maximum(h_ref[0].astype(jnp.float32) * a_ref[...] + c_ref[...], 0.0)
    acc = _conv3x3(y, pad_ref, w_ref)
    _store_stats(st_ref, acc)
    o_ref[0] = (acc + b_ref[...]).reshape(Hp, Wp, -1).astype(o_ref.dtype)


def _bn_relu_kernel(h_ref, a_ref, c_ref, o_ref):
    y = h_ref[0].astype(jnp.float32) * a_ref[...] + c_ref[...]
    o_ref[0] = jnp.maximum(y, 0.0).astype(o_ref.dtype)


# ---------------------------------------------------------------------------
# Glue
# ---------------------------------------------------------------------------
def _bn_affine(stats, bias, gamma, beta, n):
    """Fold training-mode BN into per-channel scale/shift.

    stats are of the *pre-bias* conv output; the bias is re-added to the mean
    here (variance is shift-invariant), which avoids the worst of the
    E[x^2]-E[x]^2 cancellation.
    """
    s = jnp.sum(stats[:, 0, :], axis=0)
    sq = jnp.sum(stats[:, 1, :], axis=0)
    mu0 = s / n
    var = jnp.maximum(sq / n - mu0 * mu0, 0.0)
    mu = mu0 + bias
    a = gamma * jax.lax.rsqrt(var + EPS)
    c = beta - mu * a
    C = a.shape[0]
    return a.reshape(1, 1, C), c.reshape(1, 1, C)


def down_forward(x_nchw, params):
    """Pallas implementation of Down.forward for NCHW input."""
    w1, b1, g1, be1, w2, b2, g2, be2 = params
    B, Cin, H, W = x_nchw.shape
    assert H % 2 == 0 and W % 2 == 0
    Hp, Wp = H // 2, W // 2
    Cmid, Cout = w1.shape[-1], w2.shape[-1]
    Ci_p = _round_up(Cin, LANE)
    Cm_p = _round_up(Cmid, LANE)
    Co_p = _round_up(Cout, LANE)
    f32, bf16 = jnp.float32, jnp.bfloat16

    # NCHW -> NHWC + lane-pad channels (one wrapper copy). The pool taps are
    # exposed via *free* row-major reshapes (no 6-D transpose round trip).
    x = jnp.transpose(x_nchw, (0, 2, 3, 1)).astype(f32)
    x = jnp.pad(x, ((0, 0), (0, 0), (0, 0), (0, Ci_p - Cin)))
    x = x.reshape(B, Hp, 2, Wp, 2 * Ci_p)

    # HWIO conv weights -> (9, Cin_pad, Cout_pad) bf16 tap-major slabs.
    w1p = jnp.pad(w1.astype(f32),
                  ((0, 0), (0, 0), (0, Ci_p - Cin), (0, Cm_p - Cmid))
                  ).reshape(9, Ci_p, Cm_p).astype(bf16)
    w2p = jnp.pad(w2.astype(f32),
                  ((0, 0), (0, 0), (0, Cm_p - Cmid), (0, Co_p - Cout))
                  ).reshape(9, Cm_p, Co_p).astype(bf16)
    b1v = jnp.pad(b1.astype(f32), (0, Cm_p - Cmid))
    b2v = jnp.pad(b2.astype(f32), (0, Co_p - Cout))
    g1p = jnp.pad(g1.astype(f32), (0, Cm_p - Cmid))
    be1p = jnp.pad(be1.astype(f32), (0, Cm_p - Cmid))
    g2p = jnp.pad(g2.astype(f32), (0, Co_p - Cout))
    be2p = jnp.pad(be2.astype(f32), (0, Co_p - Cout))

    cparams = pltpu.CompilerParams(
        dimension_semantics=("parallel",),
        vmem_limit_bytes=_vmem_limit_bytes())

    # ---- pass 1: maxpool(2x2) + conv1 (+ BN1 partial stats) ----
    h1, st1 = pl.pallas_call(
        _pool_conv1_kernel,
        out_shape=(jax.ShapeDtypeStruct((B, Hp, Wp, Cm_p), bf16),
                   jax.ShapeDtypeStruct((B, 2, Cm_p), f32)),
        grid=(B,),
        in_specs=[pl.BlockSpec((1, Hp, 2, Wp, 2 * Ci_p),
                               lambda b: (b, 0, 0, 0, 0)),
                  _const_spec((9, Ci_p, Cm_p), lambda b: (0, 0, 0)),
                  _const_spec((1, Cm_p), lambda b: (0, 0))],
        out_specs=(pl.BlockSpec((1, Hp, Wp, Cm_p), lambda b: (b, 0, 0, 0)),
                   pl.BlockSpec((1, 2, Cm_p), lambda b: (b, 0, 0))),
        scratch_shapes=[pltpu.VMEM((Hp + 2, Wp + 2, Ci_p), bf16)],
        compiler_params=cparams,
    )(x, w1p, b1v.reshape(1, Cm_p))

    a1, c1 = _bn_affine(st1, b1v, g1p, be1p, B * Hp * Wp)

    # ---- pass 2: BN1 apply + ReLU + conv2 (+ BN2 partial stats) ----
    h2, st2 = pl.pallas_call(
        _bn_relu_conv2_kernel,
        out_shape=(jax.ShapeDtypeStruct((B, Hp, Wp, Co_p), bf16),
                   jax.ShapeDtypeStruct((B, 2, Co_p), f32)),
        grid=(B,),
        in_specs=[pl.BlockSpec((1, Hp, Wp, Cm_p), lambda b: (b, 0, 0, 0)),
                  _const_spec((1, 1, Cm_p), lambda b: (0, 0, 0)),
                  _const_spec((1, 1, Cm_p), lambda b: (0, 0, 0)),
                  _const_spec((9, Cm_p, Co_p), lambda b: (0, 0, 0)),
                  _const_spec((1, Co_p), lambda b: (0, 0))],
        out_specs=(pl.BlockSpec((1, Hp, Wp, Co_p), lambda b: (b, 0, 0, 0)),
                   pl.BlockSpec((1, 2, Co_p), lambda b: (b, 0, 0))),
        scratch_shapes=[pltpu.VMEM((Hp + 2, Wp + 2, Cm_p), bf16)],
        compiler_params=cparams,
    )(h1, a1, c1, w2p, b2v.reshape(1, Co_p))

    a2, c2 = _bn_affine(st2, b2v, g2p, be2p, B * Hp * Wp)

    # ---- pass 3: BN2 apply + ReLU (written in place over h2) ----
    out = pl.pallas_call(
        _bn_relu_kernel,
        out_shape=jax.ShapeDtypeStruct((B, Hp, Wp, Co_p), bf16),
        grid=(B,),
        in_specs=[pl.BlockSpec((1, Hp, Wp, Co_p), lambda b: (b, 0, 0, 0)),
                  _const_spec((1, 1, Co_p), lambda b: (0, 0, 0)),
                  _const_spec((1, 1, Co_p), lambda b: (0, 0, 0))],
        out_specs=pl.BlockSpec((1, Hp, Wp, Co_p), lambda b: (b, 0, 0, 0)),
        input_output_aliases={0: 0},
        compiler_params=cparams,
    )(h2, a2, c2)

    # Unpad channels, back to NCHW (done once at the module edge).
    return jnp.transpose(out[..., :Cout].astype(f32), (0, 3, 1, 2))


# ---------------------------------------------------------------------------
# Pure-JAX f32 reference (PyTorch training-mode semantics) for verification
# ---------------------------------------------------------------------------
def ref_forward(x_nchw, params):
    w1, b1, g1, be1, w2, b2, g2, be2 = params
    x = jnp.transpose(x_nchw, (0, 2, 3, 1)).astype(jnp.float32)          # NHWC
    B, H, W, Cin = x.shape
    Hp, Wp = H // 2, W // 2
    p = jnp.max(x.reshape(B, Hp, 2, Wp, 2, Cin), axis=(2, 4))            # pool

    def conv3x3(h, w, b):
        Hh, Ww = h.shape[1], h.shape[2]
        hp = jnp.pad(h, ((0, 0), (1, 1), (1, 1), (0, 0)))
        acc = jnp.zeros(h.shape[:3] + (w.shape[-1],), jnp.float32)
        for ky in range(3):
            for kx in range(3):
                acc += jnp.einsum('bhwc,co->bhwo',
                                  hp[:, ky:ky + Hh, kx:kx + Ww, :], w[ky, kx])
        return acc + b

    def bn_relu(h, g, be):
        mu = jnp.mean(h, axis=(0, 1, 2), keepdims=True)
        var = jnp.mean((h - mu) ** 2, axis=(0, 1, 2), keepdims=True)
        return jnp.maximum((h - mu) * jax.lax.rsqrt(var + EPS) * g + be, 0.0)

    h = bn_relu(conv3x3(p, w1, b1), g1, be1)
    h = bn_relu(conv3x3(h, w2, b2), g2, be2)
    return jnp.transpose(h, (0, 3, 1, 2))


if __name__ == "__main__":
    key = jax.random.PRNGKey(0)
    B, Cin, Cout, H, W = 2, 4, 8, 16, 16
    Cmid = Cout
    ks = jax.random.split(key, 8)

    x = jax.random.normal(ks[0], (B, Cin, H, W), jnp.float32)
    # deterministic synthetic parameters (HWIO conv weights)
    w1 = 0.3 * jax.random.normal(ks[1], (3, 3, Cin, Cmid), jnp.float32)
    b1 = 0.1 * jax.random.normal(ks[2], (Cmid,), jnp.float32)
    g1 = 1.0 + 0.1 * jax.random.normal(ks[3], (Cmid,), jnp.float32)
    be1 = 0.1 * jax.random.normal(ks[4], (Cmid,), jnp.float32)
    w2 = 0.3 * jax.random.normal(ks[5], (3, 3, Cmid, Cout), jnp.float32)
    b2 = 0.1 * jax.random.normal(ks[6], (Cout,), jnp.float32)
    g2 = 1.0 + 0.05 * jax.random.normal(ks[7], (Cout,), jnp.float32)
    be2 = jnp.zeros((Cout,), jnp.float32)
    params = (w1, b1, g1, be1, w2, b2, g2, be2)

    down = jax.jit(down_forward)
    y = jax.block_until_ready(down(x, params))
    y_ref = ref_forward(x, params)

    assert y.shape == (B, Cout, H // 2, W // 2), y.shape
    # bf16 MXU operands + bf16 inter-pass activations => looser tolerance.
    err = float(jnp.max(jnp.abs(y - y_ref)))
    assert jnp.allclose(y, y_ref, atol=7e-2, rtol=7e-2), err
    print("KERNEL_OK")
</pallas_src>

<mosaic_0001>
module attributes {stable_mosaic.version = 11 : i64} {
  func.func @_bn_relu_conv2_kernel(%arg0: i32, %arg1: memref<1x8x8x128xbf16, #tpu.memory_space<vmem>>, %arg2: memref<1x1x128xf32, #tpu.memory_space<vmem>>, %arg3: memref<1x1x128xf32, #tpu.memory_space<vmem>>, %arg4: memref<9x128x128xbf16, #tpu.memory_space<vmem>>, %arg5: memref<1x128xf32, #tpu.memory_space<vmem>>, %arg6: memref<1x8x8x128xbf16, #tpu.memory_space<vmem>>, %arg7: memref<1x2x128xf32, #tpu.memory_space<vmem>>, %arg8: memref<10x10x128xbf16, #tpu.memory_space<vmem>>) attributes {dimension_semantics = [#tpu.dimension_semantics<parallel>], iteration_bounds = array<i64: 2>, scalar_prefetch = 0 : i64, scratch_operands = 1 : i64, tpu.core_type = #tpu.core_type<tc>, window_params = [{transform_indices = @transform_0, window_bounds = array<i64: 1, 8, 8, 128>}, {pipeline_mode = #tpu.pipeline_mode<synchronous>, transform_indices = @transform_1, window_bounds = array<i64: 1, 1, 128>}, {pipeline_mode = #tpu.pipeline_mode<synchronous>, transform_indices = @transform_2, window_bounds = array<i64: 1, 1, 128>}, {pipeline_mode = #tpu.pipeline_mode<synchronous>, transform_indices = @transform_3, window_bounds = array<i64: 9, 128, 128>}, {pipeline_mode = #tpu.pipeline_mode<synchronous>, transform_indices = @transform_4, window_bounds = array<i64: 1, 128>}, {transform_indices = @transform_5, window_bounds = array<i64: 1, 8, 8, 128>}, {transform_indices = @transform_6, window_bounds = array<i64: 1, 2, 128>}]} {
    %c0 = arith.constant 0 : index
    %c0_0 = arith.constant 0 : index
    %c0_1 = arith.constant 0 : index
    %c0_2 = arith.constant 0 : index
    %0 = vector.load %arg1[%c0, %c0_0, %c0_1, %c0_2] : memref<1x8x8x128xbf16, #tpu.memory_space<vmem>>, vector<1x8x8x128xbf16>
    %1 = vector.shape_cast %0 : vector<1x8x8x128xbf16> to vector<8x8x128xbf16>
    %2 = arith.extf %1 : vector<8x8x128xbf16> to vector<8x8x128xf32>
    %c0_3 = arith.constant 0 : index
    %c0_4 = arith.constant 0 : index
    %c0_5 = arith.constant 0 : index
    %3 = vector.load %arg2[%c0_3, %c0_4, %c0_5] : memref<1x1x128xf32, #tpu.memory_space<vmem>>, vector<1x1x128xf32>
    %4 = vector.broadcast %3 : vector<1x1x128xf32> to vector<8x8x128xf32>
    %5 = arith.mulf %2, %4 : vector<8x8x128xf32>
    %c0_6 = arith.constant 0 : index
    %c0_7 = arith.constant 0 : index
    %c0_8 = arith.constant 0 : index
    %6 = vector.load %arg3[%c0_6, %c0_7, %c0_8] : memref<1x1x128xf32, #tpu.memory_space<vmem>>, vector<1x1x128xf32>
    %7 = vector.broadcast %6 : vector<1x1x128xf32> to vector<8x8x128xf32>
    %8 = arith.addf %5, %7 : vector<8x8x128xf32>
    %cst = arith.constant 0.000000e+00 : f32
    %9 = vector.broadcast %cst : f32 to vector<8x8x128xf32>
    %10 = arith.maximumf %8, %9 : vector<8x8x128xf32>
    %cst_9 = arith.constant 0.000000e+00 : bf16
    %11 = vector.broadcast %cst_9 : bf16 to vector<1x10x128xbf16>
    %c0_10 = arith.constant 0 : index
    %c0_11 = arith.constant 0 : index
    %c0_12 = arith.constant 0 : index
    %12 = vector.load %arg8[%c0_10, %c0_11, %c0_12] : memref<10x10x128xbf16, #tpu.memory_space<vmem>>, vector<1x10x128xbf16>
    tpu.vector_store %arg8[%c0_10, %c0_11, %c0_12], %11 {strides = array<i32>} : memref<10x10x128xbf16, #tpu.memory_space<vmem>>, vector<1x10x128xbf16>,
    %cst_13 = arith.constant 0.000000e+00 : bf16
    %13 = vector.broadcast %cst_13 : bf16 to vector<1x10x128xbf16>
    %c9 = arith.constant 9 : index
    %c0_14 = arith.constant 0 : index
    %c0_15 = arith.constant 0 : index
    %14 = vector.load %arg8[%c9, %c0_14, %c0_15] : memref<10x10x128xbf16, #tpu.memory_space<vmem>>, vector<1x10x128xbf16>
    tpu.vector_store %arg8[%c9, %c0_14, %c0_15], %13 {strides = array<i32>} : memref<10x10x128xbf16, #tpu.memory_space<vmem>>, vector<1x10x128xbf16>,
    %cst_16 = arith.constant 0.000000e+00 : bf16
    %15 = vector.broadcast %cst_16 : bf16 to vector<10x1x128xbf16>
    %c0_17 = arith.constant 0 : index
    %c0_18 = arith.constant 0 : index
    %c0_19 = arith.constant 0 : index
    %16 = vector.load %arg8[%c0_17, %c0_18, %c0_19] : memref<10x10x128xbf16, #tpu.memory_space<vmem>>, vector<10x1x128xbf16>
    tpu.vector_store %arg8[%c0_17, %c0_18, %c0_19], %15 {strides = array<i32>} : memref<10x10x128xbf16, #tpu.memory_space<vmem>>, vector<10x1x128xbf16>,
    %cst_20 = arith.constant 0.000000e+00 : bf16
    %17 = vector.broadcast %cst_20 : bf16 to vector<10x1x128xbf16>
    %c0_21 = arith.constant 0 : index
    %c9_22 = arith.constant 9 : index
    %c0_23 = arith.constant 0 : index
    %18 = vector.load %arg8[%c0_21, %c9_22, %c0_23] : memref<10x10x128xbf16, #tpu.memory_space<vmem>>, vector<10x1x128xbf16>
    tpu.vector_store %arg8[%c0_21, %c9_22, %c0_23], %17 {strides = array<i32>} : memref<10x10x128xbf16, #tpu.memory_space<vmem>>, vector<10x1x128xbf16>,
    %19 = arith.truncf %10 : vector<8x8x128xf32> to vector<8x8x128xbf16>
    %c1 = arith.constant 1 : index
    %c1_24 = arith.constant 1 : index
    %c0_25 = arith.constant 0 : index
    %20 = vector.load %arg8[%c1, %c1_24, %c0_25] : memref<10x10x128xbf16, #tpu.memory_space<vmem>>, vector<8x8x128xbf16>
    tpu.vector_store %arg8[%c1, %c1_24, %c0_25], %19 {strides = array<i32>} : memref<10x10x128xbf16, #tpu.memory_space<vmem>>, vector<8x8x128xbf16>,
    %cst_26 = arith.constant 0.000000e+00 : f32
    %21 = vector.broadcast %cst_26 : f32 to vector<64x128xf32>
    %c0_27 = arith.constant 0 : index
    %c0_28 = arith.constant 0 : index
    %c0_29 = arith.constant 0 : index
    %22 = vector.load %arg8[%c0_27, %c0_28, %c0_29] : memref<10x10x128xbf16, #tpu.memory_space<vmem>>, vector<8x8x128xbf16>
    %23 = vector.shape_cast %22 : vector<8x8x128xbf16> to vector<64x128xbf16>
    %c0_30 = arith.constant 0 : index
    %c0_31 = arith.constant 0 : index
    %c0_32 = arith.constant 0 : index
    %24 = vector.load %arg4[%c0_30, %c0_31, %c0_32] : memref<9x128x128xbf16, #tpu.memory_space<vmem>>, vector<1x128x128xbf16>
    %25 = vector.shape_cast %24 : vector<1x128x128xbf16> to vector<128x128xbf16>
    %cst_33 = arith.constant dense<0.000000e+00> : vector<64x128xf32>
    %26 = tpu.matmul %23, %25, %cst_33 {dimension_numbers = #tpu.dot_dimension_numbers<[1], [0], [0], [1], [0, 0, 1, 1], [], []>} : vector<64x128xbf16>, vector<128x128xbf16>, vector<64x128xf32> -> vector<64x128xf32>
    %27 = arith.addf %21, %26 : vector<64x128xf32>
    %c0_34 = arith.constant 0 : index
    %c1_35 = arith.constant 1 : index
    %c0_36 = arith.constant 0 : index
    %28 = vector.load %arg8[%c0_34, %c1_35, %c0_36] : memref<10x10x128xbf16, #tpu.memory_space<vmem>>, vector<8x8x128xbf16>
    %29 = vector.shape_cast %28 : vector<8x8x128xbf16> to vector<64x128xbf16>
    %c1_37 = arith.constant 1 : index
    %c0_38 = arith.constant 0 : index
    %c0_39 = arith.constant 0 : index
    %30 = vector.load %arg4[%c1_37, %c0_38, %c0_39] : memref<9x128x128xbf16, #tpu.memory_space<vmem>>, vector<1x128x128xbf16>
    %31 = vector.shape_cast %30 : vector<1x128x128xbf16> to vector<128x128xbf16>
    %cst_40 = arith.constant dense<0.000000e+00> : vector<64x128xf32>
    %32 = tpu.matmul %29, %31, %cst_40 {dimension_numbers = #tpu.dot_dimension_numbers<[1], [0], [0], [1], [0, 0, 1, 1], [], []>} : vector<64x128xbf16>, vector<128x128xbf16>, vector<64x128xf32> -> vector<64x128xf32>
    %33 = arith.addf %27, %32 : vector<64x128xf32>
    %c0_41 = arith.constant 0 : index
    %c2 = arith.constant 2 : index
    %c0_42 = arith.constant 0 : index
    %34 = vector.load %arg8[%c0_41, %c2, %c0_42] : memref<10x10x128xbf16, #tpu.memory_space<vmem>>, vector<8x8x128xbf16>
    %35 = vector.shape_cast %34 : vector<8x8x128xbf16> to vector<64x128xbf16>
    %c2_43 = arith.constant 2 : index
    %c0_44 = arith.constant 0 : index
    %c0_45 = arith.constant 0 : index
    %36 = vector.load %arg4[%c2_43, %c0_44, %c0_45] : memref<9x128x128xbf16, #tpu.memory_space<vmem>>, vector<1x128x128xbf16>
    %37 = vector.shape_cast %36 : vector<1x128x128xbf16> to vector<128x128xbf16>
    %cst_46 = arith.constant dense<0.000000e+00> : vector<64x128xf32>
    %38 = tpu.matmul %35, %37, %cst_46 {dimension_numbers = #tpu.dot_dimension_numbers<[1], [0], [0], [1], [0, 0, 1, 1], [], []>} : vector<64x128xbf16>, vector<128x128xbf16>, vector<64x128xf32> -> vector<64x128xf32>
    %39 = arith.addf %33, %38 : vector<64x128xf32>
    %c1_47 = arith.constant 1 : index
    %c0_48 = arith.constant 0 : index
    %c0_49 = arith.constant 0 : index
    %40 = vector.load %arg8[%c1_47, %c0_48, %c0_49] : memref<10x10x128xbf16, #tpu.memory_space<vmem>>, vector<8x8x128xbf16>
    %41 = vector.shape_cast %40 : vector<8x8x128xbf16> to vector<64x128xbf16>
    %c3 = arith.constant 3 : index
    %c0_50 = arith.constant 0 : index
    %c0_51 = arith.constant 0 : index
    %42 = vector.load %arg4[%c3, %c0_50, %c0_51] : memref<9x128x128xbf16, #tpu.memory_space<vmem>>, vector<1x128x128xbf16>
    %43 = vector.shape_cast %42 : vector<1x128x128xbf16> to vector<128x128xbf16>
    %cst_52 = arith.constant dense<0.000000e+00> : vector<64x128xf32>
    %44 = tpu.matmul %41, %43, %cst_52 {dimension_numbers = #tpu.dot_dimension_numbers<[1], [0], [0], [1], [0, 0, 1, 1], [], []>} : vector<64x128xbf16>, vector<128x128xbf16>, vector<64x128xf32> -> vector<64x128xf32>
    %45 = arith.addf %39, %44 : vector<64x128xf32>
    %c1_53 = arith.constant 1 : index
    %c1_54 = arith.constant 1 : index
    %c0_55 = arith.constant 0 : index
    %46 = vector.load %arg8[%c1_53, %c1_54, %c0_55] : memref<10x10x128xbf16, #tpu.memory_space<vmem>>, vector<8x8x128xbf16>
    %47 = vector.shape_cast %46 : vector<8x8x128xbf16> to vector<64x128xbf16>
    %c4 = arith.constant 4 : index
    %c0_56 = arith.constant 0 : index
    %c0_57 = arith.constant 0 : index
    %48 = vector.load %arg4[%c4, %c0_56, %c0_57] : memref<9x128x128xbf16, #tpu.memory_space<vmem>>, vector<1x128x128xbf16>
    %49 = vector.shape_cast %48 : vector<1x128x128xbf16> to vector<128x128xbf16>
    %cst_58 = arith.constant dense<0.000000e+00> : vector<64x128xf32>
    %50 = tpu.matmul %47, %49, %cst_58 {dimension_numbers = #tpu.dot_dimension_numbers<[1], [0], [0], [1], [0, 0, 1, 1], [], []>} : vector<64x128xbf16>, vector<128x128xbf16>, vector<64x128xf32> -> vector<64x128xf32>
    %51 = arith.addf %45, %50 : vector<64x128xf32>
    %c1_59 = arith.constant 1 : index
    %c2_60 = arith.constant 2 : index
    %c0_61 = arith.constant 0 : index
    %52 = vector.load %arg8[%c1_59, %c2_60, %c0_61] : memref<10x10x128xbf16, #tpu.memory_space<vmem>>, vector<8x8x128xbf16>
    %53 = vector.shape_cast %52 : vector<8x8x128xbf16> to vector<64x128xbf16>
    %c5 = arith.constant 5 : index
    %c0_62 = arith.constant 0 : index
    %c0_63 = arith.constant 0 : index
    %54 = vector.load %arg4[%c5, %c0_62, %c0_63] : memref<9x128x128xbf16, #tpu.memory_space<vmem>>, vector<1x128x128xbf16>
    %55 = vector.shape_cast %54 : vector<1x128x128xbf16> to vector<128x128xbf16>
    %cst_64 = arith.constant dense<0.000000e+00> : vector<64x128xf32>
    %56 = tpu.matmul %53, %55, %cst_64 {dimension_numbers = #tpu.dot_dimension_numbers<[1], [0], [0], [1], [0, 0, 1, 1], [], []>} : vector<64x128xbf16>, vector<128x128xbf16>, vector<64x128xf32> -> vector<64x128xf32>
    %57 = arith.addf %51, %56 : vector<64x128xf32>
    %c2_65 = arith.constant 2 : index
    %c0_66 = arith.constant 0 : index
    %c0_67 = arith.constant 0 : index
    %58 = vector.load %arg8[%c2_65, %c0_66, %c0_67] : memref<10x10x128xbf16, #tpu.memory_space<vmem>>, vector<8x8x128xbf16>
    %59 = vector.shape_cast %58 : vector<8x8x128xbf16> to vector<64x128xbf16>
    %c6 = arith.constant 6 : index
    %c0_68 = arith.constant 0 : index
    %c0_69 = arith.constant 0 : index
    %60 = vector.load %arg4[%c6, %c0_68, %c0_69] : memref<9x128x128xbf16, #tpu.memory_space<vmem>>, vector<1x128x128xbf16>
    %61 = vector.shape_cast %60 : vector<1x128x128xbf16> to vector<128x128xbf16>
    %cst_70 = arith.constant dense<0.000000e+00> : vector<64x128xf32>
    %62 = tpu.matmul %59, %61, %cst_70 {dimension_numbers = #tpu.dot_dimension_numbers<[1], [0], [0], [1], [0, 0, 1, 1], [], []>} : vector<64x128xbf16>, vector<128x128xbf16>, vector<64x128xf32> -> vector<64x128xf32>
    %63 = arith.addf %57, %62 : vector<64x128xf32>
    %c2_71 = arith.constant 2 : index
    %c1_72 = arith.constant 1 : index
    %c0_73 = arith.constant 0 : index
    %64 = vector.load %arg8[%c2_71, %c1_72, %c0_73] : memref<10x10x128xbf16, #tpu.memory_space<vmem>>, vector<8x8x128xbf16>
    %65 = vector.shape_cast %64 : vector<8x8x128xbf16> to vector<64x128xbf16>
    %c7 = arith.constant 7 : index
    %c0_74 = arith.constant 0 : index
    %c0_75 = arith.constant 0 : index
    %66 = vector.load %arg4[%c7, %c0_74, %c0_75] : memref<9x128x128xbf16, #tpu.memory_space<vmem>>, vector<1x128x128xbf16>
    %67 = vector.shape_cast %66 : vector<1x128x128xbf16> to vector<128x128xbf16>
    %cst_76 = arith.constant dense<0.000000e+00> : vector<64x128xf32>
    %68 = tpu.matmul %65, %67, %cst_76 {dimension_numbers = #tpu.dot_dimension_numbers<[1], [0], [0], [1], [0, 0, 1, 1], [], []>} : vector<64x128xbf16>, vector<128x128xbf16>, vector<64x128xf32> -> vector<64x128xf32>
    %69 = arith.addf %63, %68 : vector<64x128xf32>
    %c2_77 = arith.constant 2 : index
    %c2_78 = arith.constant 2 : index
    %c0_79 = arith.constant 0 : index
    %70 = vector.load %arg8[%c2_77, %c2_78, %c0_79] : memref<10x10x128xbf16, #tpu.memory_space<vmem>>, vector<8x8x128xbf16>
    %71 = vector.shape_cast %70 : vector<8x8x128xbf16> to vector<64x128xbf16>
    %c8 = arith.constant 8 : index
    %c0_80 = arith.constant 0 : index
    %c0_81 = arith.constant 0 : index
    %72 = vector.load %arg4[%c8, %c0_80, %c0_81] : memref<9x128x128xbf16, #tpu.memory_space<vmem>>, vector<1x128x128xbf16>
    %73 = vector.shape_cast %72 : vector<1x128x128xbf16> to vector<128x128xbf16>
    %cst_82 = arith.constant dense<0.000000e+00> : vector<64x128xf32>
    %74 = tpu.matmul %71, %73, %cst_82 {dimension_numbers = #tpu.dot_dimension_numbers<[1], [0], [0], [1], [0, 0, 1, 1], [], []>} : vector<64x128xbf16>, vector<128x128xbf16>, vector<64x128xf32> -> vector<64x128xf32>
    %75 = arith.addf %69, %74 : vector<64x128xf32>
    %cst_83 = arith.constant dense<0.000000e+00> : vector<128xf32>
    %76 = vector.multi_reduction <add>, %75, %cst_83 [0] : vector<64x128xf32> to vector<128xf32>
    %77 = vector.shape_cast %76 : vector<128xf32> to vector<1x128xf32>
    %78 = arith.mulf %75, %75 : vector<64x128xf32>
    %cst_84 = arith.constant dense<0.000000e+00> : vector<128xf32>
    %79 = vector.multi_reduction <add>, %78, %cst_84 [0] : vector<64x128xf32> to vector<128xf32>
    %80 = vector.shape_cast %79 : vector<128xf32> to vector<1x128xf32>
    %81 = tpu.concatenate %77, %80 in 0 : vector<1x128xf32>, vector<1x128xf32> -> vector<2x128xf32>
    %c0_85 = arith.constant 0 : index
    %c0_86 = arith.constant 0 : index
    %c0_87 = arith.constant 0 : index
    %82 = vector.load %arg7[%c0_85, %c0_86, %c0_87] : memref<1x2x128xf32, #tpu.memory_space<vmem>>, vector<1x2x128xf32>
    %83 = vector.shape_cast %82 : vector<1x2x128xf32> to vector<2x128xf32>
    %84 = vector.shape_cast %81 : vector<2x128xf32> to vector<1x2x128xf32>
    tpu.vector_store %arg7[%c0_85, %c0_86, %c0_87], %84 {strides = array<i32>} : memref<1x2x128xf32, #tpu.memory_space<vmem>>, vector<1x2x128xf32>,
    %c0_88 = arith.constant 0 : index
    %c0_89 = arith.constant 0 : index
    %85 = vector.load %arg5[%c0_88, %c0_89] : memref<1x128xf32, #tpu.memory_space<vmem>>, vector<1x128xf32>
    %86 = vector.broadcast %85 : vector<1x128xf32> to vector<64x128xf32>
    %87 = arith.addf %75, %86 : vector<64x128xf32>
    %88 = vector.shape_cast %87 : vector<64x128xf32> to vector<8x8x128xf32>
    %89 = arith.truncf %88 : vector<8x8x128xf32> to vector<8x8x128xbf16>
    %c0_90 = arith.constant 0 : index
    %c0_91 = arith.constant 0 : index
    %c0_92 = arith.constant 0 : index
    %c0_93 = arith.constant 0 : index
    %90 = vector.load %arg6[%c0_90, %c0_91, %c0_92, %c0_93] : memref<1x8x8x128xbf16, #tpu.memory_space<vmem>>, vector<1x8x8x128xbf16>
    %91 = vector.shape_cast %90 : vector<1x8x8x128xbf16> to vector<8x8x128xbf16>
    %92 = vector.shape_cast %89 : vector<8x8x128xbf16> to vector<1x8x8x128xbf16>
    tpu.vector_store %arg6[%c0_90, %c0_91, %c0_92, %c0_93], %92 {strides = array<i32>} : memref<1x8x8x128xbf16, #tpu.memory_space<vmem>>, vector<1x8x8x128xbf16>,
    return
  }
  func.func @transform_0(%arg0: i32) -> (i32, i32, i32, i32) {
    %c0_i32 = arith.constant 0 : i32
    %c0_i32_0 = arith.constant 0 : i32
    %c0_i32_1 = arith.constant 0 : i32
    %c0_i32_2 = arith.constant 0 : i32
    return %arg0, %c0_i32, %c0_i32_0, %c0_i32_1 : i32, i32, i32, i32
  }
  func.func @transform_1(%arg0: i32) -> (i32, i32, i32) {
    %c0_i32 = arith.constant 0 : i32
    %c0_i32_0 = arith.constant 0 : i32
    %c0_i32_1 = arith.constant 0 : i32
    %c0_i32_2 = arith.constant 0 : i32
    return %c0_i32, %c0_i32_0, %c0_i32_1 : i32, i32, i32
  }
  func.func @transform_2(%arg0: i32) -> (i32, i32, i32) {
    %c0_i32 = arith.constant 0 : i32
    %c0_i32_0 = arith.constant 0 : i32
    %c0_i32_1 = arith.constant 0 : i32
    %c0_i32_2 = arith.constant 0 : i32
    return %c0_i32, %c0_i32_0, %c0_i32_1 : i32, i32, i32
  }
  func.func @transform_3(%arg0: i32) -> (i32, i32, i32) {
    %c0_i32 = arith.constant 0 : i32
    %c0_i32_0 = arith.constant 0 : i32
    %c0_i32_1 = arith.constant 0 : i32
    %c0_i32_2 = arith.constant 0 : i32
    return %c0_i32, %c0_i32_0, %c0_i32_1 : i32, i32, i32
  }
  func.func @transform_4(%arg0: i32) -> (i32, i32) {
    %c0_i32 = arith.constant 0 : i32
    %c0_i32_0 = arith.constant 0 : i32
    %c0_i32_1 = arith.constant 0 : i32
    return %c0_i32, %c0_i32_0 : i32, i32
  }
  func.func @transform_5(%arg0: i32) -> (i32, i32, i32, i32) {
    %c0_i32 = arith.constant 0 : i32
    %c0_i32_0 = arith.constant 0 : i32
    %c0_i32_1 = arith.constant 0 : i32
    %c0_i32_2 = arith.constant 0 : i32
    return %arg0, %c0_i32, %c0_i32_0, %c0_i32_1 : i32, i32, i32, i32
  }
  func.func @transform_6(%arg0: i32) -> (i32, i32, i32) {
    %c0_i32 = arith.constant 0 : i32
    %c0_i32_0 = arith.constant 0 : i32
    %c0_i32_1 = arith.constant 0 : i32
    return %arg0, %c0_i32, %c0_i32_0 : i32, i32, i32
  }
}

module attributes {stable_mosaic.version = 11 : i64} {
  func.func @_pool_conv1_kernel(%arg0: i32, %arg1: memref<1x8x2x8x256xf32, #tpu.memory_space<vmem>>, %arg2: memref<9x128x128xbf16, #tpu.memory_space<vmem>>, %arg3: memref<1x128xf32, #tpu.memory_space<vmem>>, %arg4: memref<1x8x8x128xbf16, #tpu.memory_space<vmem>>, %arg5: memref<1x2x128xf32, #tpu.memory_space<vmem>>, %arg6: memref<10x10x128xbf16, #tpu.memory_space<vmem>>) attributes {dimension_semantics = [#tpu.dimension_semantics<parallel>], iteration_bounds = array<i64: 2>, scalar_prefetch = 0 : i64, scratch_operands = 1 : i64, tpu.core_type = #tpu.core_type<tc>, window_params = [{transform_indices = @transform_0, window_bounds = array<i64: 1, 8, 2, 8, 256>}, {pipeline_mode = #tpu.pipeline_mode<synchronous>, transform_indices = @transform_1, window_bounds = array<i64: 9, 128, 128>}, {pipeline_mode = #tpu.pipeline_mode<synchronous>, transform_indices = @transform_2, window_bounds = array<i64: 1, 128>}, {transform_indices = @transform_3, window_bounds = array<i64: 1, 8, 8, 128>}, {transform_indices = @transform_4, window_bounds = array<i64: 1, 2, 128>}]} {
    %c0 = arith.constant 0 : index
    %c0_0 = arith.constant 0 : index
    %c0_1 = arith.constant 0 : index
    %c0_2 = arith.constant 0 : index
    %c0_3 = arith.constant 0 : index
    %0 = vector.load %arg1[%c0, %c0_0, %c0_1, %c0_2, %c0_3] : memref<1x8x2x8x256xf32, #tpu.memory_space<vmem>>, vector<1x8x2x8x256xf32>
    %1 = vector.shape_cast %0 : vector<1x8x2x8x256xf32> to vector<8x2x8x256xf32>
    %2 = vector.extract_strided_slice %1 {offsets = [0, 0, 0, 0], sizes = [8, 1, 8, 256], strides = [1, 1, 1, 1]} : vector<8x2x8x256xf32> to vector<8x1x8x256xf32>
    %3 = vector.shape_cast %2 : vector<8x1x8x256xf32> to vector<8x8x256xf32>
    %4 = vector.extract_strided_slice %1 {offsets = [0, 1, 0, 0], sizes = [8, 1, 8, 256], strides = [1, 1, 1, 1]} : vector<8x2x8x256xf32> to vector<8x1x8x256xf32>
    %5 = vector.shape_cast %4 : vector<8x1x8x256xf32> to vector<8x8x256xf32>
    %6 = arith.maximumf %3, %5 : vector<8x8x256xf32>
    %7 = vector.extract_strided_slice %6 {offsets = [0, 0, 0], sizes = [8, 8, 128], strides = [1, 1, 1]} : vector<8x8x256xf32> to vector<8x8x128xf32>
    %8 = vector.extract_strided_slice %6 {offsets = [0, 0, 128], sizes = [8, 8, 128], strides = [1, 1, 1]} : vector<8x8x256xf32> to vector<8x8x128xf32>
    %9 = arith.maximumf %7, %8 : vector<8x8x128xf32>
    %cst = arith.constant 0.000000e+00 : bf16
    %10 = vector.broadcast %cst : bf16 to vector<1x10x128xbf16>
    %c0_4 = arith.constant 0 : index
    %c0_5 = arith.constant 0 : index
    %c0_6 = arith.constant 0 : index
    %11 = vector.load %arg6[%c0_4, %c0_5, %c0_6] : memref<10x10x128xbf16, #tpu.memory_space<vmem>>, vector<1x10x128xbf16>
    tpu.vector_store %arg6[%c0_4, %c0_5, %c0_6], %10 {strides = array<i32>} : memref<10x10x128xbf16, #tpu.memory_space<vmem>>, vector<1x10x128xbf16>,
    %cst_7 = arith.constant 0.000000e+00 : bf16
    %12 = vector.broadcast %cst_7 : bf16 to vector<1x10x128xbf16>
    %c9 = arith.constant 9 : index
    %c0_8 = arith.constant 0 : index
    %c0_9 = arith.constant 0 : index
    %13 = vector.load %arg6[%c9, %c0_8, %c0_9] : memref<10x10x128xbf16, #tpu.memory_space<vmem>>, vector<1x10x128xbf16>
    tpu.vector_store %arg6[%c9, %c0_8, %c0_9], %12 {strides = array<i32>} : memref<10x10x128xbf16, #tpu.memory_space<vmem>>, vector<1x10x128xbf16>,
    %cst_10 = arith.constant 0.000000e+00 : bf16
    %14 = vector.broadcast %cst_10 : bf16 to vector<10x1x128xbf16>
    %c0_11 = arith.constant 0 : index
    %c0_12 = arith.constant 0 : index
    %c0_13 = arith.constant 0 : index
    %15 = vector.load %arg6[%c0_11, %c0_12, %c0_13] : memref<10x10x128xbf16, #tpu.memory_space<vmem>>, vector<10x1x128xbf16>
    tpu.vector_store %arg6[%c0_11, %c0_12, %c0_13], %14 {strides = array<i32>} : memref<10x10x128xbf16, #tpu.memory_space<vmem>>, vector<10x1x128xbf16>,
    %cst_14 = arith.constant 0.000000e+00 : bf16
    %16 = vector.broadcast %cst_14 : bf16 to vector<10x1x128xbf16>
    %c0_15 = arith.constant 0 : index
    %c9_16 = arith.constant 9 : index
    %c0_17 = arith.constant 0 : index
    %17 = vector.load %arg6[%c0_15, %c9_16, %c0_17] : memref<10x10x128xbf16, #tpu.memory_space<vmem>>, vector<10x1x128xbf16>
    tpu.vector_store %arg6[%c0_15, %c9_16, %c0_17], %16 {strides = array<i32>} : memref<10x10x128xbf16, #tpu.memory_space<vmem>>, vector<10x1x128xbf16>,
    %18 = arith.truncf %9 : vector<8x8x128xf32> to vector<8x8x128xbf16>
    %c1 = arith.constant 1 : index
    %c1_18 = arith.constant 1 : index
    %c0_19 = arith.constant 0 : index
    %19 = vector.load %arg6[%c1, %c1_18, %c0_19] : memref<10x10x128xbf16, #tpu.memory_space<vmem>>, vector<8x8x128xbf16>
    tpu.vector_store %arg6[%c1, %c1_18, %c0_19], %18 {strides = array<i32>} : memref<10x10x128xbf16, #tpu.memory_space<vmem>>, vector<8x8x128xbf16>,
    %cst_20 = arith.constant 0.000000e+00 : f32
    %20 = vector.broadcast %cst_20 : f32 to vector<64x128xf32>
    %c0_21 = arith.constant 0 : index
    %c0_22 = arith.constant 0 : index
    %c0_23 = arith.constant 0 : index
    %21 = vector.load %arg6[%c0_21, %c0_22, %c0_23] : memref<10x10x128xbf16, #tpu.memory_space<vmem>>, vector<8x8x128xbf16>
    %22 = vector.shape_cast %21 : vector<8x8x128xbf16> to vector<64x128xbf16>
    %c0_24 = arith.constant 0 : index
    %c0_25 = arith.constant 0 : index
    %c0_26 = arith.constant 0 : index
    %23 = vector.load %arg2[%c0_24, %c0_25, %c0_26] : memref<9x128x128xbf16, #tpu.memory_space<vmem>>, vector<1x128x128xbf16>
    %24 = vector.shape_cast %23 : vector<1x128x128xbf16> to vector<128x128xbf16>
    %cst_27 = arith.constant dense<0.000000e+00> : vector<64x128xf32>
    %25 = tpu.matmul %22, %24, %cst_27 {dimension_numbers = #tpu.dot_dimension_numbers<[1], [0], [0], [1], [0, 0, 1, 1], [], []>} : vector<64x128xbf16>, vector<128x128xbf16>, vector<64x128xf32> -> vector<64x128xf32>
    %26 = arith.addf %20, %25 : vector<64x128xf32>
    %c0_28 = arith.constant 0 : index
    %c1_29 = arith.constant 1 : index
    %c0_30 = arith.constant 0 : index
    %27 = vector.load %arg6[%c0_28, %c1_29, %c0_30] : memref<10x10x128xbf16, #tpu.memory_space<vmem>>, vector<8x8x128xbf16>
    %28 = vector.shape_cast %27 : vector<8x8x128xbf16> to vector<64x128xbf16>
    %c1_31 = arith.constant 1 : index
    %c0_32 = arith.constant 0 : index
    %c0_33 = arith.constant 0 : index
    %29 = vector.load %arg2[%c1_31, %c0_32, %c0_33] : memref<9x128x128xbf16, #tpu.memory_space<vmem>>, vector<1x128x128xbf16>
    %30 = vector.shape_cast %29 : vector<1x128x128xbf16> to vector<128x128xbf16>
    %cst_34 = arith.constant dense<0.000000e+00> : vector<64x128xf32>
    %31 = tpu.matmul %28, %30, %cst_34 {dimension_numbers = #tpu.dot_dimension_numbers<[1], [0], [0], [1], [0, 0, 1, 1], [], []>} : vector<64x128xbf16>, vector<128x128xbf16>, vector<64x128xf32> -> vector<64x128xf32>
    %32 = arith.addf %26, %31 : vector<64x128xf32>
    %c0_35 = arith.constant 0 : index
    %c2 = arith.constant 2 : index
    %c0_36 = arith.constant 0 : index
    %33 = vector.load %arg6[%c0_35, %c2, %c0_36] : memref<10x10x128xbf16, #tpu.memory_space<vmem>>, vector<8x8x128xbf16>
    %34 = vector.shape_cast %33 : vector<8x8x128xbf16> to vector<64x128xbf16>
    %c2_37 = arith.constant 2 : index
    %c0_38 = arith.constant 0 : index
    %c0_39 = arith.constant 0 : index
    %35 = vector.load %arg2[%c2_37, %c0_38, %c0_39] : memref<9x128x128xbf16, #tpu.memory_space<vmem>>, vector<1x128x128xbf16>
    %36 = vector.shape_cast %35 : vector<1x128x128xbf16> to vector<128x128xbf16>
    %cst_40 = arith.constant dense<0.000000e+00> : vector<64x128xf32>
    %37 = tpu.matmul %34, %36, %cst_40 {dimension_numbers = #tpu.dot_dimension_numbers<[1], [0], [0], [1], [0, 0, 1, 1], [], []>} : vector<64x128xbf16>, vector<128x128xbf16>, vector<64x128xf32> -> vector<64x128xf32>
    %38 = arith.addf %32, %37 : vector<64x128xf32>
    %c1_41 = arith.constant 1 : index
    %c0_42 = arith.constant 0 : index
    %c0_43 = arith.constant 0 : index
    %39 = vector.load %arg6[%c1_41, %c0_42, %c0_43] : memref<10x10x128xbf16, #tpu.memory_space<vmem>>, vector<8x8x128xbf16>
    %40 = vector.shape_cast %39 : vector<8x8x128xbf16> to vector<64x128xbf16>
    %c3 = arith.constant 3 : index
    %c0_44 = arith.constant 0 : index
    %c0_45 = arith.constant 0 : index
    %41 = vector.load %arg2[%c3, %c0_44, %c0_45] : memref<9x128x128xbf16, #tpu.memory_space<vmem>>, vector<1x128x128xbf16>
    %42 = vector.shape_cast %41 : vector<1x128x128xbf16> to vector<128x128xbf16>
    %cst_46 = arith.constant dense<0.000000e+00> : vector<64x128xf32>
    %43 = tpu.matmul %40, %42, %cst_46 {dimension_numbers = #tpu.dot_dimension_numbers<[1], [0], [0], [1], [0, 0, 1, 1], [], []>} : vector<64x128xbf16>, vector<128x128xbf16>, vector<64x128xf32> -> vector<64x128xf32>
    %44 = arith.addf %38, %43 : vector<64x128xf32>
    %c1_47 = arith.constant 1 : index
    %c1_48 = arith.constant 1 : index
    %c0_49 = arith.constant 0 : index
    %45 = vector.load %arg6[%c1_47, %c1_48, %c0_49] : memref<10x10x128xbf16, #tpu.memory_space<vmem>>, vector<8x8x128xbf16>
    %46 = vector.shape_cast %45 : vector<8x8x128xbf16> to vector<64x128xbf16>
    %c4 = arith.constant 4 : index
    %c0_50 = arith.constant 0 : index
    %c0_51 = arith.constant 0 : index
    %47 = vector.load %arg2[%c4, %c0_50, %c0_51] : memref<9x128x128xbf16, #tpu.memory_space<vmem>>, vector<1x128x128xbf16>
    %48 = vector.shape_cast %47 : vector<1x128x128xbf16> to vector<128x128xbf16>
    %cst_52 = arith.constant dense<0.000000e+00> : vector<64x128xf32>
    %49 = tpu.matmul %46, %48, %cst_52 {dimension_numbers = #tpu.dot_dimension_numbers<[1], [0], [0], [1], [0, 0, 1, 1], [], []>} : vector<64x128xbf16>, vector<128x128xbf16>, vector<64x128xf32> -> vector<64x128xf32>
    %50 = arith.addf %44, %49 : vector<64x128xf32>
    %c1_53 = arith.constant 1 : index
    %c2_54 = arith.constant 2 : index
    %c0_55 = arith.constant 0 : index
    %51 = vector.load %arg6[%c1_53, %c2_54, %c0_55] : memref<10x10x128xbf16, #tpu.memory_space<vmem>>, vector<8x8x128xbf16>
    %52 = vector.shape_cast %51 : vector<8x8x128xbf16> to vector<64x128xbf16>
    %c5 = arith.constant 5 : index
    %c0_56 = arith.constant 0 : index
    %c0_57 = arith.constant 0 : index
    %53 = vector.load %arg2[%c5, %c0_56, %c0_57] : memref<9x128x128xbf16, #tpu.memory_space<vmem>>, vector<1x128x128xbf16>
    %54 = vector.shape_cast %53 : vector<1x128x128xbf16> to vector<128x128xbf16>
    %cst_58 = arith.constant dense<0.000000e+00> : vector<64x128xf32>
    %55 = tpu.matmul %52, %54, %cst_58 {dimension_numbers = #tpu.dot_dimension_numbers<[1], [0], [0], [1], [0, 0, 1, 1], [], []>} : vector<64x128xbf16>, vector<128x128xbf16>, vector<64x128xf32> -> vector<64x128xf32>
    %56 = arith.addf %50, %55 : vector<64x128xf32>
    %c2_59 = arith.constant 2 : index
    %c0_60 = arith.constant 0 : index
    %c0_61 = arith.constant 0 : index
    %57 = vector.load %arg6[%c2_59, %c0_60, %c0_61] : memref<10x10x128xbf16, #tpu.memory_space<vmem>>, vector<8x8x128xbf16>
    %58 = vector.shape_cast %57 : vector<8x8x128xbf16> to vector<64x128xbf16>
    %c6 = arith.constant 6 : index
    %c0_62 = arith.constant 0 : index
    %c0_63 = arith.constant 0 : index
    %59 = vector.load %arg2[%c6, %c0_62, %c0_63] : memref<9x128x128xbf16, #tpu.memory_space<vmem>>, vector<1x128x128xbf16>
    %60 = vector.shape_cast %59 : vector<1x128x128xbf16> to vector<128x128xbf16>
    %cst_64 = arith.constant dense<0.000000e+00> : vector<64x128xf32>
    %61 = tpu.matmul %58, %60, %cst_64 {dimension_numbers = #tpu.dot_dimension_numbers<[1], [0], [0], [1], [0, 0, 1, 1], [], []>} : vector<64x128xbf16>, vector<128x128xbf16>, vector<64x128xf32> -> vector<64x128xf32>
    %62 = arith.addf %56, %61 : vector<64x128xf32>
    %c2_65 = arith.constant 2 : index
    %c1_66 = arith.constant 1 : index
    %c0_67 = arith.constant 0 : index
    %63 = vector.load %arg6[%c2_65, %c1_66, %c0_67] : memref<10x10x128xbf16, #tpu.memory_space<vmem>>, vector<8x8x128xbf16>
    %64 = vector.shape_cast %63 : vector<8x8x128xbf16> to vector<64x128xbf16>
    %c7 = arith.constant 7 : index
    %c0_68 = arith.constant 0 : index
    %c0_69 = arith.constant 0 : index
    %65 = vector.load %arg2[%c7, %c0_68, %c0_69] : memref<9x128x128xbf16, #tpu.memory_space<vmem>>, vector<1x128x128xbf16>
    %66 = vector.shape_cast %65 : vector<1x128x128xbf16> to vector<128x128xbf16>
    %cst_70 = arith.constant dense<0.000000e+00> : vector<64x128xf32>
    %67 = tpu.matmul %64, %66, %cst_70 {dimension_numbers = #tpu.dot_dimension_numbers<[1], [0], [0], [1], [0, 0, 1, 1], [], []>} : vector<64x128xbf16>, vector<128x128xbf16>, vector<64x128xf32> -> vector<64x128xf32>
    %68 = arith.addf %62, %67 : vector<64x128xf32>
    %c2_71 = arith.constant 2 : index
    %c2_72 = arith.constant 2 : index
    %c0_73 = arith.constant 0 : index
    %69 = vector.load %arg6[%c2_71, %c2_72, %c0_73] : memref<10x10x128xbf16, #tpu.memory_space<vmem>>, vector<8x8x128xbf16>
    %70 = vector.shape_cast %69 : vector<8x8x128xbf16> to vector<64x128xbf16>
    %c8 = arith.constant 8 : index
    %c0_74 = arith.constant 0 : index
    %c0_75 = arith.constant 0 : index
    %71 = vector.load %arg2[%c8, %c0_74, %c0_75] : memref<9x128x128xbf16, #tpu.memory_space<vmem>>, vector<1x128x128xbf16>
    %72 = vector.shape_cast %71 : vector<1x128x128xbf16> to vector<128x128xbf16>
    %cst_76 = arith.constant dense<0.000000e+00> : vector<64x128xf32>
    %73 = tpu.matmul %70, %72, %cst_76 {dimension_numbers = #tpu.dot_dimension_numbers<[1], [0], [0], [1], [0, 0, 1, 1], [], []>} : vector<64x128xbf16>, vector<128x128xbf16>, vector<64x128xf32> -> vector<64x128xf32>
    %74 = arith.addf %68, %73 : vector<64x128xf32>
    %cst_77 = arith.constant dense<0.000000e+00> : vector<128xf32>
    %75 = vector.multi_reduction <add>, %74, %cst_77 [0] : vector<64x128xf32> to vector<128xf32>
    %76 = vector.shape_cast %75 : vector<128xf32> to vector<1x128xf32>
    %77 = arith.mulf %74, %74 : vector<64x128xf32>
    %cst_78 = arith.constant dense<0.000000e+00> : vector<128xf32>
    %78 = vector.multi_reduction <add>, %77, %cst_78 [0] : vector<64x128xf32> to vector<128xf32>
    %79 = vector.shape_cast %78 : vector<128xf32> to vector<1x128xf32>
    %80 = tpu.concatenate %76, %79 in 0 : vector<1x128xf32>, vector<1x128xf32> -> vector<2x128xf32>
    %c0_79 = arith.constant 0 : index
    %c0_80 = arith.constant 0 : index
    %c0_81 = arith.constant 0 : index
    %81 = vector.load %arg5[%c0_79, %c0_80, %c0_81] : memref<1x2x128xf32, #tpu.memory_space<vmem>>, vector<1x2x128xf32>
    %82 = vector.shape_cast %81 : vector<1x2x128xf32> to vector<2x128xf32>
    %83 = vector.shape_cast %80 : vector<2x128xf32> to vector<1x2x128xf32>
    tpu.vector_store %arg5[%c0_79, %c0_80, %c0_81], %83 {strides = array<i32>} : memref<1x2x128xf32, #tpu.memory_space<vmem>>, vector<1x2x128xf32>,
    %c0_82 = arith.constant 0 : index
    %c0_83 = arith.constant 0 : index
    %84 = vector.load %arg3[%c0_82, %c0_83] : memref<1x128xf32, #tpu.memory_space<vmem>>, vector<1x128xf32>
    %85 = vector.broadcast %84 : vector<1x128xf32> to vector<64x128xf32>
    %86 = arith.addf %74, %85 : vector<64x128xf32>
    %87 = vector.shape_cast %86 : vector<64x128xf32> to vector<8x8x128xf32>
    %88 = arith.truncf %87 : vector<8x8x128xf32> to vector<8x8x128xbf16>
    %c0_84 = arith.constant 0 : index
    %c0_85 = arith.constant 0 : index
    %c0_86 = arith.constant 0 : index
    %c0_87 = arith.constant 0 : index
    %89 = vector.load %arg4[%c0_84, %c0_85, %c0_86, %c0_87] : memref<1x8x8x128xbf16, #tpu.memory_space<vmem>>, vector<1x8x8x128xbf16>
    %90 = vector.shape_cast %89 : vector<1x8x8x128xbf16> to vector<8x8x128xbf16>
    %91 = vector.shape_cast %88 : vector<8x8x128xbf16> to vector<1x8x8x128xbf16>
    tpu.vector_store %arg4[%c0_84, %c0_85, %c0_86, %c0_87], %91 {strides = array<i32>} : memref<1x8x8x128xbf16, #tpu.memory_space<vmem>>, vector<1x8x8x128xbf16>,
    return
  }
  func.func @transform_0(%arg0: i32) -> (i32, i32, i32, i32, i32) {
    %c0_i32 = arith.constant 0 : i32
    %c0_i32_0 = arith.constant 0 : i32
    %c0_i32_1 = arith.constant 0 : i32
    %c0_i32_2 = arith.constant 0 : i32
    %c0_i32_3 = arith.constant 0 : i32
    return %arg0, %c0_i32, %c0_i32_0, %c0_i32_1, %c0_i32_2 : i32, i32, i32, i32, i32
  }
  func.func @transform_1(%arg0: i32) -> (i32, i32, i32) {
    %c0_i32 = arith.constant 0 : i32
    %c0_i32_0 = arith.constant 0 : i32
    %c0_i32_1 = arith.constant 0 : i32
    %c0_i32_2 = arith.constant 0 : i32
    return %c0_i32, %c0_i32_0, %c0_i32_1 : i32, i32, i32
  }
  func.func @transform_2(%arg0: i32) -> (i32, i32) {
    %c0_i32 = arith.constant 0 : i32
    %c0_i32_0 = arith.constant 0 : i32
    %c0_i32_1 = arith.constant 0 : i32
    return %c0_i32, %c0_i32_0 : i32, i32
  }
  func.func @transform_3(%arg0: i32) -> (i32, i32, i32, i32) {
    %c0_i32 = arith.constant 0 : i32
    %c0_i32_0 = arith.constant 0 : i32
    %c0_i32_1 = arith.constant 0 : i32
    %c0_i32_2 = arith.constant 0 : i32
    return %arg0, %c0_i32, %c0_i32_0, %c0_i32_1 : i32, i32, i32, i32
  }
  func.func @transform_4(%arg0: i32) -> (i32, i32, i32) {
    %c0_i32 = arith.constant 0 : i32
    %c0_i32_0 = arith.constant 0 : i32
    %c0_i32_1 = arith.constant 0 : i32
    return %arg0, %c0_i32, %c0_i32_0 : i32, i32, i32
  }
}

module attributes {stable_mosaic.version = 11 : i64} {
  func.func @_bn_relu_kernel(%arg0: i32, %arg1: memref<1x8x8x128xbf16, #tpu.memory_space<vmem>>, %arg2: memref<1x1x128xf32, #tpu.memory_space<vmem>>, %arg3: memref<1x1x128xf32, #tpu.memory_space<vmem>>, %arg4: memref<1x8x8x128xbf16, #tpu.memory_space<vmem>>) attributes {dimension_semantics = [#tpu.dimension_semantics<parallel>], iteration_bounds = array<i64: 2>, scalar_prefetch = 0 : i64, scratch_operands = 0 : i64, tpu.core_type = #tpu.core_type<tc>, window_params = [{transform_indices = @transform_0, window_bounds = array<i64: 1, 8, 8, 128>}, {pipeline_mode = #tpu.pipeline_mode<synchronous>, transform_indices = @transform_1, window_bounds = array<i64: 1, 1, 128>}, {pipeline_mode = #tpu.pipeline_mode<synchronous>, transform_indices = @transform_2, window_bounds = array<i64: 1, 1, 128>}, {transform_indices = @transform_3, window_bounds = array<i64: 1, 8, 8, 128>}]} {
    %c0 = arith.constant 0 : index
    %c0_0 = arith.constant 0 : index
    %c0_1 = arith.constant 0 : index
    %c0_2 = arith.constant 0 : index
    %0 = vector.load %arg1[%c0, %c0_0, %c0_1, %c0_2] : memref<1x8x8x128xbf16, #tpu.memory_space<vmem>>, vector<1x8x8x128xbf16>
    %1 = vector.shape_cast %0 : vector<1x8x8x128xbf16> to vector<8x8x128xbf16>
    %2 = arith.extf %1 : vector<8x8x128xbf16> to vector<8x8x128xf32>
    %c0_3 = arith.constant 0 : index
    %c0_4 = arith.constant 0 : index
    %c0_5 = arith.constant 0 : index
    %3 = vector.load %arg2[%c0_3, %c0_4, %c0_5] : memref<1x1x128xf32, #tpu.memory_space<vmem>>, vector<1x1x128xf32>
    %4 = vector.broadcast %3 : vector<1x1x128xf32> to vector<8x8x128xf32>
    %5 = arith.mulf %2, %4 : vector<8x8x128xf32>
    %c0_6 = arith.constant 0 : index
    %c0_7 = arith.constant 0 : index
    %c0_8 = arith.constant 0 : index
    %6 = vector.load %arg3[%c0_6, %c0_7, %c0_8] : memref<1x1x128xf32, #tpu.memory_space<vmem>>, vector<1x1x128xf32>
    %7 = vector.broadcast %6 : vector<1x1x128xf32> to vector<8x8x128xf32>
    %8 = arith.addf %5, %7 : vector<8x8x128xf32>
    %cst = arith.constant 0.000000e+00 : f32
    %9 = vector.broadcast %cst : f32 to vector<8x8x128xf32>
    %10 = arith.maximumf %8, %9 : vector<8x8x128xf32>
    %11 = arith.truncf %10 : vector<8x8x128xf32> to vector<8x8x128xbf16>
    %c0_9 = arith.constant 0 : index
    %c0_10 = arith.constant 0 : index
    %c0_11 = arith.constant 0 : index
    %c0_12 = arith.constant 0 : index
    %12 = vector.load %arg4[%c0_9, %c0_10, %c0_11, %c0_12] : memref<1x8x8x128xbf16, #tpu.memory_space<vmem>>, vector<1x8x8x128xbf16>
    %13 = vector.shape_cast %12 : vector<1x8x8x128xbf16> to vector<8x8x128xbf16>
    %14 = vector.shape_cast %11 : vector<8x8x128xbf16> to vector<1x8x8x128xbf16>
    tpu.vector_store %arg4[%c0_9, %c0_10, %c0_11, %c0_12], %14 {strides = array<i32>} : memref<1x8x8x128xbf16, #tpu.memory_space<vmem>>, vector<1x8x8x128xbf16>,
    return
  }
  func.func @transform_0(%arg0: i32) -> (i32, i32, i32, i32) {
    %c0_i32 = arith.constant 0 : i32
    %c0_i32_0 = arith.constant 0 : i32
    %c0_i32_1 = arith.constant 0 : i32
    %c0_i32_2 = arith.constant 0 : i32
    return %arg0, %c0_i32, %c0_i32_0, %c0_i32_1 : i32, i32, i32, i32
  }
  func.func @transform_1(%arg0: i32) -> (i32, i32, i32) {
    %c0_i32 = arith.constant 0 : i32
    %c0_i32_0 = arith.constant 0 : i32
    %c0_i32_1 = arith.constant 0 : i32
    %c0_i32_2 = arith.constant 0 : i32
    return %c0_i32, %c0_i32_0, %c0_i32_1 : i32, i32, i32
  }
  func.func @transform_2(%arg0: i32) -> (i32, i32, i32) {
    %c0_i32 = arith.constant 0 : i32
    %c0_i32_0 = arith.constant 0 : i32
    %c0_i32_1 = arith.constant 0 : i32
    %c0_i32_2 = arith.constant 0 : i32
    return %c0_i32, %c0_i32_0, %c0_i32_1 : i32, i32, i32
  }
  func.func @transform_3(%arg0: i32) -> (i32, i32, i32, i32) {
    %c0_i32 = arith.constant 0 : i32
    %c0_i32_0 = arith.constant 0 : i32
    %c0_i32_1 = arith.constant 0 : i32
    %c0_i32_2 = arith.constant 0 : i32
    return %arg0, %c0_i32, %c0_i32_0, %c0_i32_1 : i32, i32, i32, i32
  }
}

</mosaic_0001>

<bundles_post_ra>
// kernel: down_forward.5
= control target key start
LH: loop header
LB: loop body
LE: loop exit
PB: predicated region body
PF: predicated region fallthrough
CT: control target
= control target key end

     0   :  { %s383_s12 = smov 0   ;;  %s413_s0 = inlined_call_operand.vmem [shape: bf16[2,8,8,128], index: 0, kind: input, shape index: {}, may-alias: {0,3}]   ;;  %s414_s1 = inlined_call_operand.vmem [shape: f32[1,1,128], index: 1, kind: input, shape index: {}]   ;;  %s415_s2 = inlined_call_operand.vmem [shape: f32[1,1,128], index: 2, kind: input, shape index: {}]   ;;  %s416_s3 = inlined_call_operand.vmem [shape: bf16[2,8,8,128], index: 3, kind: output, shape index: {}, may-alias: {0,3}]  }
   0x1 LB: > { %s290_s13 = sadd.s32 4294967295, %s361_s12   ;;  %p294_p0 = scmp.ge.s32.totalorder %s361_s12, 1  ;;  %s361_s12 = sphi %s383_s12, %s13_s12  }
   0x2   : > { %p137_p1 = scmp.lt.s32.totalorder %s361_s12, 3 }
   0x4   : > { %p138_p2 = pnand %p294_p0, %p137_p1 }
   0x5   : > { %p161_p3 = scmp.lt.s32.totalorder (!%p138_p2), %s290_s13, 1 }
   0x6   : > { %141 = sbr.rel (%p138_p2) target bundleno = 29 (0x1d), region = 32 }
   0xb   : > { %s418_s13 = smov (!%p161_p3, %s290_s13), 1  ;;  %v353_v0 = vld [vmem:[%s414_s1] ss:$0 sm:$0xff] }
   0xc   : > { %s301_s14 = sshll.u32 %s418_s13, 5  ;;  %v354_v9 = vld [vmem:[%s415_s2] ss:$0 sm:$0xff] }
   0xd   : > { %s165_s17 = scalar_lea.vmem %s413_s0, %s301_s14  ;;  %s170_s24 = scalar_lea.vmem %s416_s3, %s301_s14 }
   0xe   : > { %v304_v1 = vld [vmem:[%s165_s17] sm:$0xff]   ;;  %v339_v2 = vld [vmem:[%s165_s17 + $0x8] sm:$0xff]   ;;  %v340_v3 = vld [vmem:[%s165_s17 + $0x10] sm:$0xff]  }
   0xf   : > { %v305_v4 = vunpack.c.l.bf16 %v304_v1  ;;  %v306_v5 = vunpack.c.h.bf16 %v304_v1  ;;  %v309_v6 = vunpack.c.l.bf16 %v339_v2  ;;  %v310_v7 = vunpack.c.h.bf16 %v339_v2  ;;  %v341_v8 = vld [vmem:[%s165_s17 + $0x18] sm:$0xff]  }
  0x10   : > { %v313_v10 = vunpack.c.l.bf16 %v340_v3  ;;  %v314_v11 = vunpack.c.h.bf16 %v340_v3  ;;  %v317_v12 = vunpack.c.l.bf16 %v341_v8  ;;  %v318_v13 = vunpack.c.h.bf16 %v341_v8 }
  0x11   : > { %v191_v14 = vmul.f32 %v353_v0, %v305_v4  ;;  %v192_v15 = vmul.f32 %v353_v0, %v306_v5  ;;  %v193_v16 = vmul.f32 %v353_v0, %v309_v6  ;;  %v194_v17 = vmul.f32 %v353_v0, %v310_v7 }
  0x12   : > { %v195_v18 = vmul.f32 %v353_v0, %v313_v10  ;;  %v196_v19 = vmul.f32 %v353_v0, %v314_v11  ;;  %v197_v20 = vmul.f32 %v353_v0, %v317_v12  ;;  %v198_v21 = vmul.f32 %v353_v0, %v318_v13 }
  0x13   : > { %v203_v22 = vadd.f32 %v354_v9, %v191_v14  ;;  %v204_v23 = vadd.f32 %v354_v9, %v192_v15  ;;  %v205_v24 = vadd.f32 %v354_v9, %v193_v16  ;;  %v206_v25 = vadd.f32 %v354_v9, %v194_v17 }
  0x14   : > { %v207_v26 = vadd.f32 %v354_v9, %v195_v18  ;;  %v208_v27 = vadd.f32 %v354_v9, %v196_v19  ;;  %v209_v28 = vadd.f32 %v354_v9, %v197_v20  ;;  %v210_v29 = vadd.f32 %v354_v9, %v198_v21 }
  0x15   : > { %v211_v30 = vmax.f32 %v203_v22, 0.0  ;;  %v212_v31 = vmax.f32 %v204_v23, 0.0  ;;  %v213_v32 = vmax.f32 %v205_v24, 0.0  ;;  %v214_v33 = vmax.f32 %v206_v25, 0.0 }
  0x16   : > { %v215_v34 = vmax.f32 %v207_v26, 0.0  ;;  %v216_v35 = vmax.f32 %v208_v27, 0.0  ;;  %v217_v36 = vmax.f32 %v209_v28, 0.0  ;;  %v218_v37 = vmax.f32 %v210_v29, 0.0 }
  0x17   : > { %v322_v38 = vpack.c.bf16 %v212_v31, %v211_v30  ;;  %v327_v39 = vpack.c.bf16 %v214_v33, %v213_v32 }
  0x18   : > { %v332_v40 = vpack.c.bf16 %v216_v35, %v215_v34  ;;  %v337_v41 = vpack.c.bf16 %v218_v37, %v217_v36 }
  0x19   : > { %323 = vst [vmem:[%s170_s24] sm:$0xff] %v322_v38  }
  0x1a   : > { %342 = vst [vmem:[%s170_s24 + $0x8] sm:$0xff] %v327_v39  }
  0x1b   : > { %343 = vst [vmem:[%s170_s24 + $0x10] sm:$0xff] %v332_v40  }
  0x1c   : > { %344 = vst [vmem:[%s170_s24 + $0x18] sm:$0xff] %v337_v41  }
  0x1d PF: > { %s13_s12 = sadd.s32 1, %s361_s12  }
  0x1e   : > { %p10_p4 = scmp.ge.s32.totalorder %s13_s12, 4  }
  0x20   :  { %12 = sbr.rel (!%p10_p4) target bundleno = 1 (0x1), region = 62 }

// kernel: down_forward.4
= control target key start
LH: loop header
LB: loop body
LE: loop exit
PB: predicated region body
PF: predicated region fallthrough
CT: control target
= control target key end

     0   :  { %s3016_s21 = smov 0   ;;  %s3670_s0 = inlined_call_operand.vmem [shape: bf16[2,8,8,128], index: 0, kind: input, shape index: {}]   ;;  %s3671_s1 = inlined_call_operand.vmem [shape: f32[1,1,128], index: 1, kind: input, shape index: {}]   ;;  %s3672_s2 = inlined_call_operand.vmem [shape: f32[1,1,128], index: 2, kind: input, shape index: {}]   ;;  %s3673_s3 = inlined_call_operand.vmem [shape: bf16[9,128,128], index: 3, kind: input, shape index: {}]   ;;  %s3674_s4 = inlined_call_operand.vmem [shape: f32[1,128], index: 4, kind: input, shape index: {}]   ;;  %s3675_s5 = inlined_call_operand.vmem [shape: bf16[2,8,8,128], index: 5, kind: output, shape index: {0}]   ;;  %s3676_s6 = inlined_call_operand.vmem [shape: f32[2,2,128], index: 6, kind: output, shape index: {1}]  }
   0x1 LB: > { %s2316_s22 = sadd.s32 4294967295, %s2978_s21   ;;  %p2320_p0 = scmp.ge.s32.totalorder %s2978_s21, 1  ;;  %s2978_s21 = sphi %s3016_s21, %s17_s21  }
   0x2   : > { %p215_p1 = scmp.lt.s32.totalorder %s2978_s21, 3 }
   0x4   : > { %p216_p2 = pnand %p2320_p0, %p215_p1 }
   0x5   : > { %p249_p3 = scmp.lt.s32.totalorder (!%p216_p2), %s2316_s22, 1 }
   0x6   : > { %219 = sbr.rel (%p216_p2) target bundleno = 363 (0x16b), region = 40 }
   0xb   : > { %v2837_v0 = vld [vmem:[%s3673_s3 + $0x78] sm:$0xff]  ;;  %v2836_v2 = vld [vmem:[%s3673_s3 + $0x70] sm:$0xff]  ;;  %s3688_s22 = smov (!%p249_p3, %s2316_s22), 1  ;;  %v2835_v5 = vld [vmem:[%s3673_s3 + $0x68] sm:$0xff]  ;;  %vm317_vm0 = vcmask 1040384   ;;  %v2980_v8 = vmov 0  }
   0xc   : > { %v2845_v1 = vld [vmem:[%s3673_s3 + $0xb8] sm:$0xff]  ;;  %2944 = vmatpush.bf16.msra.mxu1 %v2837_v0  ;;  %749 = vmatpush.bf16.msra.mxu0 %v2837_v0  ;;  %v2844_v3 = vld [vmem:[%s3673_s3 + $0xb0] sm:$0xff]  ;;  %s2816_s11 = sshll.u32 %s3688_s22, 5  ;;  %vm318_vm1 = vsmask.f32 256  ;;  %v2843_v6 = vld [vmem:[%s3673_s3 + $0xa8] sm:$0xff] }
   0xd   : > { %1019 = vmatpush.bf16.msra.mxu2 %v2845_v1  ;;  %v2857_v4 = vld [vmem:[%s3673_s3 + $0xf8] sm:$0xff]  ;;  %vm350_vm2 = vsmask.f32 7938  ;;  %v2856_v7 = vld [vmem:[%s3673_s3 + $0xf0] sm:$0xff]  ;;  %s3056_s18 = scalar_lea.vmem %s3670_s0, %s2816_s11  ;;  %312 = vst [vmem:[#allocation2] sm:$0xf] %v2980_v8  ;;  %vm3078_vm3 = vmand %vm317_vm0, %vm318_vm1  ;;  %s3641_s7 = scalar_lea.vmem %s3675_s5, %s2816_s11 }
   0xe   : > { %1153 = vmatpush.bf16.msra.mxu3 %v2857_v4  ;;  %v3059_v9 = vld [vmem:[%s3056_s18 + $0x8] sm:$0xff]   ;;  %v2939_v10 = vld [vmem:[%s3056_s18 + $0x10] sm:$0xff]   ;;  %v3065_v11 = vld [vmem:[%s3671_s1] ss:$0 sm:$0xff]  ;;  %313 = vst [vmem:[#allocation2 + $0x4] sm:$0x1] %v2980_v8 }
   0xf   : > { %v2855_v12 = vld [vmem:[%s3673_s3 + $0xe8] sm:$0xff]  ;;  %v2909_v13 = vunpack.c.h.bf16 %v3059_v9  ;;  %v2912_v14 = vunpack.c.l.bf16 %v2939_v10  ;;  %v3074_v15 = vld [vmem:[%s3672_s2] ss:$0 sm:$0xff]  ;;  %315 = vst [vmem:[#allocation2 + $0x48] sm:$0xf] %v2980_v8  ;;  %vm3087_vm4 = vmand %vm317_vm0, %vm350_vm2  ;;  %v2913_v21 = vunpack.c.h.bf16 %v2939_v10  ;;  %vm471_vm5 = vcmask 1043456  }
  0x10   : > { %2945 = vmatpush.bf16.msra.mxu1 %v2836_v2  ;;  %750 = vmatpush.bf16.msra.mxu0 %v2836_v2  ;;  %v2834_v17 = vld [vmem:[%s3673_s3 + $0x60] sm:$0xff]  ;;  %v335_v19 = vld [vmem:[#allocation2 + $0x28] sm:$0x1]  ;;  %316 = vst [vmem:[#allocation2 + $0x4c] sm:$0x1] %v2980_v8  ;;  %v3108_v32 = vld [vmem:[%s3056_s18 + $0x18] sm:$0xff]  }
  0x11   : > { %1020 = vmatpush.bf16.msra.mxu2 %v2844_v3  ;;  %v332_v18 = vld [vmem:[#allocation2 + $0x20] sm:$0x1]  ;;  %v287_v23 = vmul.f32 %v3065_v11, %v2909_v13  ;;  %v288_v24 = vmul.f32 %v3065_v11, %v2912_v14  ;;  %v336_v26 = vsel %vm3078_vm3, 0, %v335_v19  ;;  %v364_v27 = vld [vmem:[#allocation2 + $0x24] sm:$0x1]  ;;  %v2916_v40 = vunpack.c.l.bf16 %v3108_v32  ;;  %v2833_v46 = vld [vmem:[%s3673_s3 + $0x58] sm:$0xff] }
  0x12   : > { %v2842_v22 = vld [vmem:[%s3673_s3 + $0xa0] sm:$0xff]  ;;  %1154 = vmatpush.bf16.msra.mxu3 %v2856_v7  ;;  %v333_v25 = vsel %vm3078_vm3, 0, %v332_v18  ;;  %v367_v28 = vld [vmem:[#allocation2 + $0x2c] sm:$0x1]  ;;  %v365_v29 = vsel %vm3087_vm4, 0, %v364_v27  ;;  %v289_v41 = vmul.f32 %v3065_v11, %v2913_v21  ;;  %v2841_v50 = vld [vmem:[%s3673_s3 + $0x98] sm:$0xff]  ;;  %v2908_v7 = vunpack.c.l.bf16 %v3059_v9 }
  0x13   : > { %334 = vst [vmem:[#allocation2 + $0x20] sm:$0x1] %v333_v25  ;;  %v368_v30 = vsel %vm3087_vm4, 0, %v367_v28  ;;  %v3105_v31 = vld [vmem:[%s3056_s18] sm:$0xff]   ;;  %v299_v33 = vadd.f32 %v3074_v15, %v287_v23  ;;  %v300_v34 = vadd.f32 %v3074_v15, %v288_v24  ;;  %v323_v36 = vld [vmem:[#allocation2 + $0x8] sm:$0x1]  ;;  %v290_v57 = vmul.f32 %v3065_v11, %v2916_v40  ;;  %vm3154_vm10 = vmand %vm471_vm5, %vm350_vm2 }
  0x14   : > { %2946 = vmatpush.bf16.msra.mxu1 %v2835_v5  ;;  %751 = vmatpush.bf16.msra.mxu0 %v2835_v5  ;;  %337 = vst [vmem:[#allocation2 + $0x28] sm:$0x1] %v336_v26  ;;  %v2904_v35 = vunpack.c.l.bf16 %v3105_v31  ;;  %v355_v37 = vld [vmem:[#allocation2 + $0xc] sm:$0x1]  ;;  %v320_v38 = vld [vmem:[#allocation2] sm:$0x1]  ;;  %v2905_v49 = vunpack.c.h.bf16 %v3105_v31  ;;  %v3140_v58 = vadd.f32 %v3074_v15, %v289_v41 }
  0x15   : > { %1021 = vmatpush.bf16.msra.mxu2 %v2843_v6  ;;  %366 = vst [vmem:[#allocation2 + $0x24] sm:$0x1] %v365_v29  ;;  %v324_v39 = vsel %vm3078_vm3, 0, %v323_v36  ;;  %v307_v42 = vmax.f32 %v299_v33, 0.0  ;;  %v308_v43 = vmax.f32 %v300_v34, 0.0  ;;  %v321_v45 = vsel %vm3078_vm3, 0, %v320_v38 }
  0x16   : > { %1155 = vmatpush.bf16.msra.mxu3 %v2855_v12  ;;  %369 = vst [vmem:[#allocation2 + $0x2c] sm:$0x1] %v368_v30  ;;  %v284_v44 = vmul.f32 %v3065_v11, %v2904_v35  ;;  %v352_v47 = vld [vmem:[#allocation2 + $0x4] sm:$0x1]  ;;  %v356_v48 = vsel %vm3087_vm4, 0, %v355_v37  ;;  %v2832_v56 = vld [vmem:[%s3673_s3 + $0x50] sm:$0xff]  ;;  %v285_v8 = vmul.f32 %v3065_v11, %v2905_v49  ;;  %v302_v18 = vadd.f32 %v3074_v15, %v290_v57 }
  0x17   : > { %322 = vst [vmem:[#allocation2] sm:$0x1] %v321_v45  ;;  %v385_v51 = vpack.c.bf16 %v307_v42, %v307_v42  ;;  %v386_v52 = vpack.c.bf16 %v308_v43, %v308_v43  ;;  %v2854_v53 = vld [vmem:[%s3673_s3 + $0xe0] sm:$0xff]  ;;  %v353_v55 = vsel %vm3087_vm4, 0, %v352_v47  ;;  %v2840_v59 = vld [vmem:[%s3673_s3 + $0x90] sm:$0xff]  ;;  %v2853_v2 = vld [vmem:[%s3673_s3 + $0xd8] sm:$0xff] }
  0x18   : > { %2947 = vmatpush.bf16.msra.mxu1 %v2834_v17  ;;  %752 = vmatpush.bf16.msra.mxu0 %v2834_v17  ;;  %v296_v54 = vadd.f32 %v3074_v15, %v284_v44  ;;  %325 = vst [vmem:[#allocation2 + $0x8] sm:$0x1] %v324_v39  ;;  %v3145_v0 = vld [vmem:[#allocation2] sm:$0xe]  ;;  %vm553_vm6 = vsmask.f32 3328 }
  0x19   : > { %1022 = vmatpush.bf16.msra.mxu2 %v2842_v22  ;;  %354 = vst [vmem:[#allocation2 + $0x4] sm:$0x1] %v353_v55  ;;  %v415_v60 = vshrl.u32 %v385_v51, 16  ;;  %v418_v61 = vshll.u32 %v385_v51, 16  ;;  %v423_v62 = vshrl.u32 %v386_v52, 16  ;;  %v426_v63 = vshll.u32 %v386_v52, 16 }
  0x1a   : > { %1156 = vmatpush.bf16.msra.mxu3 %v2854_v53  ;;  %vm554_vm7 = vsmask.f32 7440  ;;  %v304_v1 = vmax.f32 %v296_v54, 0.0  ;;  %357 = vst [vmem:[#allocation2 + $0xc] sm:$0x1] %v356_v48  ;;  %vm903_vm8 = vcmask 1042432  }
  0x1b   : > { %vm904_vm9 = vcmask 1046532   ;;  %v417_v3 = vrot.slane %v415_v60, 7  ;;  %v425_v4 = vrot.slane %v423_v62, 7  ;;  %v491_v5 = vld [vmem:[#allocation2 + $0x20] sm:$0xf]  ;;  %v2422_v17 = vrot.slane %v3145_v0, 9  ;;  %vm3213_vm12 = vmor %vm553_vm6, %vm554_vm7 }
  0x1c   : > { %2948 = vmatpush.bf16.msra.mxu1 %v2833_v46  ;;  %753 = vmatpush.bf16.msra.mxu0 %v2833_v46  ;;  %v497_v6 = vld [vmem:[#allocation2 + $0x28] sm:$0xf]  ;;  %v494_v12 = vld [vmem:[#allocation2 + $0x24] sm:$0x1]  ;;  %v382_v14 = vpack.c.bf16 %v304_v1, %v304_v1  ;;  %v309_v19 = vmax.f32 %v3140_v58, 0.0  ;;  %v2852_v25 = vld [vmem:[%s3673_s3 + $0xd0] sm:$0xff]  ;;  %v286_v62 = vmul.f32 %v3065_v11, %v2908_v7 }
  0x1d   : > { %1023 = vmatpush.bf16.msra.mxu2 %v2841_v50  ;;  %v500_v13 = vld [vmem:[#allocation2 + $0x2c] sm:$0x1]  ;;  %v420_v21 = vor.u32 %v418_v61, %v417_v3  ;;  %v421_v22 = vrot.slane %v417_v3, 4  ;;  %v428_v9 = vor.u32 %v426_v63, %v425_v4  ;;  %v429_v23 = vrot.slane %v425_v4, 4  ;;  %v338_v40 = vld [vmem:[#allocation2 + $0x30] sm:$0x1]  ;;  %vm3192_vm11 = vmor %vm903_vm8, %vm904_vm9 }
  0x1e   : > { %v521_v24 = vld [vmem:[#allocation2] sm:$0xf]  ;;  %1157 = vmatpush.bf16.msra.mxu3 %v2853_v2  ;;  %v2831_v26 = vld [vmem:[%s3673_s3 + $0x48] sm:$0xff]  ;;  %v391_v28 = vshrl.u32 %v382_v14, 16  ;;  %v394_v29 = vshll.u32 %v382_v14, 16  ;;  %v2829_v46 = vld [vmem:[%s3673_s3 + $0x38] sm:$0xff]  ;;  %v387_v51 = vpack.c.bf16 %v309_v19, %v309_v19  ;;  %v297_v63 = vadd.f32 %v3074_v15, %v285_v8 }
  0x1f   : > { %v2839_v27 = vld [vmem:[%s3673_s3 + $0x88] sm:$0xff]  ;;  %v557_v30 = vshrl.u32 %v521_v24, 16  ;;  %v560_v31 = vshll.u32 %v521_v24, 16  ;;  %v492_v33 = vsel %vm3154_vm10, %v420_v21, %v491_v5  ;;  %v495_v34 = vsel %vm3078_vm3, %v421_v22, %v494_v12  ;;  %v2830_v41 = vld [vmem:[%s3673_s3 + $0x40] sm:$0xff]  ;;  %v341_v57 = vld [vmem:[#allocation2 + $0x38] sm:$0x1] }
  0x20   : > { %2949 = vmatpush.bf16.msra.mxu1 %v2832_v56  ;;  %754 = vmatpush.bf16.msra.mxu0 %v2832_v56  ;;  %v498_v35 = vsel %vm3154_vm10, %v428_v9, %v497_v6  ;;  %v501_v36 = vsel %vm3078_vm3, %v429_v23, %v500_v13  ;;  %v473_v37 = vld [vmem:[#allocation2 + $0x8] sm:$0xf]  ;;  %v545_v38 = vld [vmem:[#allocation2 + $0x4] sm:$0x1]  ;;  %493 = vst [vmem:[#allocation2 + $0x20] sm:$0xf] %v492_v33 }
  0x21   : > { %1024 = vmatpush.bf16.msra.mxu2 %v2840_v59  ;;  %v2851_v39 = vld [vmem:[%s3673_s3 + $0xc8] sm:$0xff]  ;;  %v393_v42 = vrot.slane %v391_v28, 7  ;;  %v559_v43 = vrot.slane %v557_v30, 4  ;;  %v562_v44 = vrot.slane %v560_v31, 5  ;;  %v566_v45 = vshll.u32 %v545_v38, 16  ;;  %v2838_v47 = vld [vmem:[%s3673_s3 + $0x80] sm:$0xff] }
  0x22   : > { %496 = vst [vmem:[#allocation2 + $0x24] sm:$0x1] %v495_v34  ;;  %v476_v48 = vld [vmem:[#allocation2 + $0xc] sm:$0x1]  ;;  %v908_v49 = vrot.slane %v545_v38, 5  ;;  %1158 = vmatpush.bf16.msra.mxu3 %v2852_v25  ;;  %v310_v50 = vmax.f32 %v302_v18, 0.0  ;;  %v3243_v28 = vadd.f32 %v3074_v15, %v286_v62 }
  0x23   : > { %499 = vst [vmem:[#allocation2 + $0x28] sm:$0xf] %v498_v35  ;;  %v396_v52 = vor.u32 %v394_v29, %v393_v42  ;;  %v397_v53 = vrot.slane %v393_v42, 4  ;;  %v563_v54 = vor.u32 %v562_v44, %v559_v43  ;;  %v568_v55 = vrot.slane %v566_v45, 5  ;;  %v2865_v58 = vld [vmem:[%s3673_s3 + $0x138] sm:$0xff]  ;;  %v2828_v7 = vld [vmem:[%s3673_s3 + $0x30] sm:$0xff] }
  0x24   : > { %2950 = vmatpush.bf16.msra.mxu1 %v2831_v26  ;;  %755 = vmatpush.bf16.msra.mxu0 %v2831_v26  ;;  %502 = vst [vmem:[#allocation2 + $0x2c] sm:$0x1] %v501_v36  ;;  %v339_v59 = vsel %vm3078_vm3, 0, %v338_v40  ;;  %v370_v60 = vld [vmem:[#allocation2 + $0x34] sm:$0x1]  ;;  %v3201_v61 = vpack.c.bf16 %v310_v50, %v310_v50  ;;  %v342_v4 = vsel %vm3078_vm3, 0, %v341_v57  ;;  %v3224_v8 = vsel %vm3192_vm11, %v2422_v17, %v908_v49 }
  0x25   : > { %1025 = vmatpush.bf16.msra.mxu2 %v2839_v27  ;;  %v474_v1 = vsel %vm3154_vm10, %v396_v52, %v473_v37  ;;  %v477_v2 = vsel %vm3078_vm3, %v397_v53, %v476_v48  ;;  %v564_v3 = vrot.slane %v563_v54, 4  ;;  %340 = vst [vmem:[#allocation2 + $0x30] sm:$0x1] %v339_v59  ;;  %v373_v5 = vld [vmem:[#allocation2 + $0x3c] sm:$0x1]  ;;  %v371_v12 = vsel %vm3087_vm4, 0, %v370_v60 }
  0x26   : > { %475 = vst [vmem:[#allocation2 + $0x8] sm:$0xf] %v474_v1  ;;  %1159 = vmatpush.bf16.msra.mxu3 %v2851_v39  ;;  %v431_v13 = vshrl.u32 %v387_v51, 16  ;;  %v434_v14 = vshll.u32 %v387_v51, 16  ;;  %v2864_v0 = vld [vmem:[%s3673_s3 + $0x130] sm:$0xff]  ;;  %v374_v17 = vsel %vm3087_vm4, 0, %v373_v5  ;;  %v955_v27 = vunpack.c.l.b16 %v3224_v8 }
  0x27   : > { %478 = vst [vmem:[#allocation2 + $0xc] sm:$0x1] %v477_v2  ;;  %v569_v18 = vsel %vm3213_vm12, %v564_v3, %v568_v55  ;;  %v439_v19 = vshrl.u32 %v3201_v61, 16  ;;  %v442_v21 = vshll.u32 %v3201_v61, 16  ;;  %v525_v22 = vld [vmem:[#allocation2 + $0x20] sm:$0xf] }
  0x28   : > { %2951 = vmatpush.bf16.msra.mxu1 %v2830_v41  ;;  %756 = vmatpush.bf16.msra.mxu0 %v2830_v41  ;;  %343 = vst [vmem:[#allocation2 + $0x38] sm:$0x1] %v342_v4  ;;  %v3237_v9 = vrot.slane %v431_v13, 7  ;;  %v305_v23 = vmax.f32 %v297_v63, 0.0  ;;  %v613_v25 = vshrl.u32 %v525_v22, 16  ;;  %v616_v26 = vshll.u32 %v525_v22, 16 }
  0x29   : > { %1026 = vmatpush.bf16.msra.mxu2 %v2838_v47  ;;  %v3239_v24 = vld [vmem:[#allocation2 + $0x24] sm:$0x1]  ;;  %372 = vst [vmem:[#allocation2 + $0x34] sm:$0x1] %v371_v12  ;;  %v3246_v31 = vunpack.c.l.b16 %v569_v18  ;;  %v2827_v33 = vld [vmem:[%s3673_s3 + $0x28] sm:$0xff]  ;;  %v441_v44 = vrot.slane %v439_v19, 7 }
  0x2a   : > { %v526_v29 = vld [vmem:[#allocation2 + $0x28] sm:$0xf]  ;;  %v622_v30 = vshll.u32 %v3239_v24, 16  ;;  %375 = vst [vmem:[#allocation2 + $0x3c] sm:$0x1] %v374_v17  ;;  %v436_v34 = vor.u32 %v434_v14, %v3237_v9  ;;  %v437_v35 = vrot.slane %v3237_v9, 4  ;;  %v3262_v47 = vpack.c.bf16 %v305_v23, %v305_v23 }
  0x2b   : > { %v3253_v36 = vld [vmem:[#allocation2 + $0x2c] sm:$0x1]  ;;  %v615_v37 = vrot.slane %v613_v25, 4  ;;  %v618_v38 = vrot.slane %v616_v26, 5  ;;  %v627_v39 = vshrl.u32 %v526_v29, 16  ;;  %v630_v40 = vshll.u32 %v526_v29, 16 }
  0x2c   : > { %850 = vmatpush.bf16.msrb.mxu1 %v2829_v46  ;;  %1399 = vmatpush.bf16.msrb.mxu0 %v2865_v58  ;;  %v2863_v41 = vld [vmem:[%s3673_s3 + $0x128] sm:$0xff]  ;;  %v624_v42 = vrot.slane %v622_v30, 5  ;;  %v636_v43 = vshll.u32 %v3253_v36, 16  ;;  %v503_v45 = vld [vmem:[#allocation2 + $0x30] sm:$0xf]  ;;  %v2885_v46 = vld [vmem:[%s3673_s3 + $0x1b8] sm:$0xff]  ;;  %v444_v5 = vor.u32 %v442_v21, %v441_v44 }
  0x2d   : > { %v619_v48 = vor.u32 %v618_v38, %v615_v37  ;;  %v629_v49 = vrot.slane %v627_v39, 4  ;;  %v632_v50 = vrot.slane %v630_v40, 5  ;;  %v522_v51 = vld [vmem:[#allocation2 + $0x8] sm:$0xf]  ;;  %v504_v53 = vsel %vm3154_vm10, %v436_v34, %v503_v45  ;;  %v2826_v60 = vld [vmem:[%s3673_s3 + $0x20] sm:$0xff]  ;;  %1708 = vmatpush.bf16.msrb.mxu2 %v2885_v46  ;;  %v2825_v37 = vld [vmem:[%s3673_s3 + $0x18] sm:$0xff] }
  0x2e   : > { %v880_v52 = vld [vmem:[#allocation2 + $0x8] sm:$0xe]  ;;  %v638_v54 = vrot.slane %v636_v43, 5  ;;  %v546_v55 = vld [vmem:[#allocation2 + $0xc] sm:$0x1]  ;;  %v571_v57 = vshrl.u32 %v522_v51, 16 }
  0x2f   : > { %v574_v58 = vshll.u32 %v522_v51, 16  ;;  %v2423_v59 = vrot.slane %v880_v52, 9  ;;  %v620_v61 = vrot.slane %v619_v48, 4  ;;  %v633_v62 = vor.u32 %v632_v50, %v629_v49  ;;  %505 = vst [vmem:[#allocation2 + $0x30] sm:$0xf] %v504_v53  ;;  %v2850_v2 = vld [vmem:[%s3673_s3 + $0xc0] sm:$0xff] }
  0x30   : > { %851 = vmatpush.bf16.msrb.mxu1 %v2828_v7  ;;  %1400 = vmatpush.bf16.msrb.mxu0 %v2864_v0  ;;  %v580_v63 = vshll.u32 %v546_v55, 16  ;;  %v912_v1 = vrot.slane %v546_v55, 5  ;;  %v573_v3 = vrot.slane %v571_v57, 4  ;;  %v445_v7 = vrot.slane %v441_v44, 4  ;;  %v506_v12 = vld [vmem:[#allocation2 + $0x34] sm:$0x1] }
  0x31   : > { %v576_v4 = vrot.slane %v574_v58, 5  ;;  %v2862_v13 = vld [vmem:[%s3673_s3 + $0x120] sm:$0xff]  ;;  %v625_v14 = vsel %vm3213_vm12, %v620_v61, %v624_v42  ;;  %v634_v18 = vrot.slane %v633_v62, 4  ;;  %v509_v19 = vld [vmem:[#allocation2 + $0x38] sm:$0xf]  ;;  %1160 = vmatpush.bf16.msra.mxu3 %v2850_v2  ;;  %v507_v25 = vsel %vm3078_vm3, %v437_v35, %v506_v12  ;;  %v2824_v57 = vld [vmem:[%s3673_s3 + $0x10] sm:$0xff] }
  0x32   : > { %v582_v0 = vrot.slane %v580_v63, 5  ;;  %v913_v17 = vsel %vm3192_vm11, %v2423_v59, %v912_v1  ;;  %v512_v22 = vld [vmem:[#allocation2 + $0x3c] sm:$0x1]  ;;  %v689_v9 = vunpack.c.l.b16 %v625_v14  ;;  %v326_v26 = vld [vmem:[#allocation2 + $0x10] sm:$0x1]  ;;  %v306_v38 = vmax.f32 %v3243_v28, 0.0 }
  0x33   : > { %v577_v21 = vor.u32 %v576_v4, %v573_v3  ;;  %v956_v23 = vunpack.c.l.b16 %v913_v17  ;;  %v329_v29 = vld [vmem:[#allocation2 + $0x18] sm:$0x1]  ;;  %v639_v30 = vsel %vm3213_vm12, %v634_v18, %v638_v54  ;;  %508 = vst [vmem:[#allocation2 + $0x34] sm:$0x1] %v507_v25  ;;  %v513_v34 = vsel %vm3078_vm3, %v445_v7, %v512_v22  ;;  %v358_v39 = vld [vmem:[#allocation2 + $0x14] sm:$0x1] }
  0x34   : > { %852 = vmatpush.bf16.msrb.mxu1 %v2827_v33  ;;  %1401 = vmatpush.bf16.msrb.mxu0 %v2863_v41  ;;  %v510_v33 = vsel %vm3154_vm10, %v444_v5, %v509_v19  ;;  %v690_v35 = vunpack.c.l.b16 %v639_v30  ;;  %v327_v42 = vsel %vm3078_vm3, 0, %v326_v26  ;;  %v361_v43 = vld [vmem:[#allocation2 + $0x1c] sm:$0x1]  ;;  %514 = vst [vmem:[#allocation2 + $0x3c] sm:$0x1] %v513_v34  ;;  %v330_v44 = vsel %vm3078_vm3, 0, %v329_v29 }
  0x35   : > { %v578_v40 = vrot.slane %v577_v21, 4  ;;  %v963_v41 = vpack.c.b16 %v956_v23, %v955_v27  ;;  %511 = vst [vmem:[#allocation2 + $0x38] sm:$0xf] %v510_v33  ;;  %v359_v28 = vsel %vm3087_vm4, 0, %v358_v39  ;;  %v362_v45 = vsel %vm3087_vm4, 0, %v361_v43  ;;  %v2861_v8 = vld [vmem:[%s3673_s3 + $0x118] sm:$0xff] }
  0x36   : > { %v384_v46 = vpack.c.bf16 %v306_v38, %v306_v38  ;;  %v695_v27 = vpack.c.b16 %v690_v35, %v689_v9  ;;  %v527_v49 = vld [vmem:[#allocation2 + $0x30] sm:$0xf]  ;;  %328 = vst [vmem:[#allocation2 + $0x10] sm:$0x1] %v327_v42  ;;  %v399_v50 = vshrl.u32 %v3262_v47, 16  ;;  %v402_v51 = vshll.u32 %v3262_v47, 16 }
  0x37   : > { %v583_v48 = vsel %vm3213_vm12, %v578_v40, %v582_v0  ;;  %1027 = vmatmul.bf16.vlgmr.msra.gmra.mxu2 %v963_v41  ;;  %v641_v53 = vshrl.u32 %v527_v49, 16  ;;  %v644_v54 = vshll.u32 %v527_v49, 16  ;;  %331 = vst [vmem:[#allocation2 + $0x18] sm:$0x1] %v330_v44  ;;  %v2884_v63 = vld [vmem:[%s3673_s3 + $0x1b0] sm:$0xff]  ;;  %v2823_v12 = vld [vmem:[%s3673_s3 + $0x8] sm:$0xff] }
  0x38   : > { %853 = vmatpush.bf16.msrb.mxu1 %v2826_v60  ;;  %1402 = vmatpush.bf16.msrb.mxu0 %v2862_v13  ;;  %v686_v52 = vunpack.c.l.b16 %v583_v48  ;;  %v407_v55 = vshrl.u32 %v384_v46, 16  ;;  %360 = vst [vmem:[#allocation2 + $0x14] sm:$0x1] %v359_v28  ;;  %v401_v58 = vrot.slane %v399_v50, 7  ;;  %v410_v59 = vshll.u32 %v384_v46, 16  ;;  %v2860_v3 = vld [vmem:[%s3673_s3 + $0x110] sm:$0xff] }
  0x39   : > { %767 = vmatmul.bf16.vlgmr.msra.gmra.mxu1 %v695_v27  ;;  %v643_v61 = vrot.slane %v641_v53, 4  ;;  %v646_v62 = vrot.slane %v644_v54, 5  ;;  %363 = vst [vmem:[#allocation2 + $0x1c] sm:$0x1] %v362_v45  ;;  %1709 = vmatpush.bf16.msrb.mxu2 %v2884_v63  ;;  %v2893_v13 = vld [vmem:[%s3673_s3 + $0x1f8] sm:$0xff]  ;;  %v2859_v25 = vld [vmem:[%s3673_s3 + $0x108] sm:$0xff] }
  0x3a   : > { %v693_v60 = vpack.c.b16 %v686_v52, %v3246_v31  ;;  %v409_v47 = vrot.slane %v407_v55, 7  ;;  %v3315_v1 = vld [vmem:[#allocation2 + $0x34] sm:$0x1]  ;;  %v404_v2 = vor.u32 %v402_v51, %v401_v58  ;;  %v405_v17 = vrot.slane %v401_v58, 4  ;;  %1954 = vmatpush.bf16.msrb.mxu3 %v2893_v13  ;;  %v2883_v38 = vld [vmem:[%s3673_s3 + $0x1a8] sm:$0xff]  ;;  %v2822_v44 = vld [vmem:[%s3673_s3] sm:$0xff] }
  0x3b   : > { %v647_v31 = vor.u32 %v646_v62, %v643_v61  ;;  %v650_v5 = vshll.u32 %v3315_v1, 16  ;;  %v3327_v14 = vld [vmem:[#allocation2 + $0x3c] sm:$0x1]  ;;  %v2858_v28 = vld [vmem:[%s3673_s3 + $0x100] sm:$0xff]  ;;  %v1190_v45 = vld [vmem:[#allocation2 + $0x8] sm:$0xf] }
  0x3c   : > { %854 = vmatpush.bf16.msrb.mxu1 %v2825_v37  ;;  %1403 = vmatpush.bf16.msrb.mxu0 %v2861_v8  ;;  %v528_v4 = vld [vmem:[#allocation2 + $0x38] sm:$0xf]  ;;  %v412_v7 = vor.u32 %v410_v59, %v409_v47  ;;  %v413_v19 = vrot.slane %v409_v47, 4  ;;  %v664_v21 = vshll.u32 %v3327_v14, 16  ;;  %v1207_v27 = vshrl.u32 %v1190_v45, 16  ;;  %v2892_v54 = vld [vmem:[%s3673_s3 + $0x1f0] sm:$0xff] }
  0x3d   : > { %757 = vmatmul.bf16.vlgmr.msra.gmra.mxu0 %v693_v60  ;;  %v655_v18 = vshrl.u32 %v528_v4, 16  ;;  %v658_v0 = vshll.u32 %v528_v4, 16  ;;  %v648_v22 = vrot.slane %v647_v31, 4  ;;  %v652_v9 = vrot.slane %v650_v5, 5  ;;  %v479_v23 = vld [vmem:[#allocation2 + $0x10] sm:$0xf]  ;;  %1710 = vmatpush.bf16.msrb.mxu2 %v2883_v38 }
  0x3e   : > { %v480_v30 = vsel %vm3154_vm10, %v404_v2, %v479_v23  ;;  %v485_v33 = vld [vmem:[#allocation2 + $0x18] sm:$0xf]  ;;  %v666_v40 = vrot.slane %v664_v21, 5  ;;  %v2496_v50 = vld [vmem:[#allocation2 + $0x8] sm:$0xf]  ;;  %v3357_v52 = vrot.slane %v1207_v27, 4  ;;  %1955 = vmatpush.bf16.msrb.mxu3 %v2892_v54 }
  0x3f   : > { %v657_v26 = vrot.slane %v655_v18, 4  ;;  %v660_v29 = vrot.slane %v658_v0, 5  ;;  %481 = vst [vmem:[#allocation2 + $0x10] sm:$0xf] %v480_v30  ;;  %v482_v34 = vld [vmem:[#allocation2 + $0x14] sm:$0x1]  ;;  %v486_v37 = vsel %vm3154_vm10, %v412_v7, %v485_v33  ;;  %v653_v39 = vsel %vm3213_vm12, %v648_v22, %v652_v9 }
  0x40   : > { %855 = vmatpush.bf16.msrb.mxu1 %v2824_v57  ;;  %1404 = vmatpush.bf16.msrb.mxu0 %v2860_v3  ;;  %v483_v41 = vsel %vm3078_vm3, %v405_v17, %v482_v34  ;;  %487 = vst [vmem:[#allocation2 + $0x18] sm:$0xf] %v486_v37  ;;  %v488_v42 = vld [vmem:[#allocation2 + $0x1c] sm:$0x1]  ;;  %v691_v48 = vunpack.c.l.b16 %v653_v39  ;;  %v1210_v53 = vshll.u32 %v1190_v45, 16  ;;  %v2872_v55 = vld [vmem:[%s3673_s3 + $0x170] sm:$0xff] }
  0x41   : > { %v661_v35 = vor.u32 %v660_v29, %v657_v26  ;;  %484 = vst [vmem:[#allocation2 + $0x14] sm:$0x1] %v483_v41  ;;  %v489_v43 = vsel %vm3078_vm3, %v413_v19, %v488_v42  ;;  %v2873_v8 = vld [vmem:[%s3673_s3 + $0x178] sm:$0xff]  ;;  %v2882_v57 = vld [vmem:[%s3673_s3 + $0x1a0] sm:$0xff]  ;;  %v2891_v34 = vld [vmem:[%s3673_s3 + $0x1e8] sm:$0xff]  ;;  %s2325_s11 = sshll.u32 %s3688_s22, 1 }
  0x42   : > { %490 = vst [vmem:[#allocation2 + $0x1c] sm:$0x1] %v489_v43  ;;  %1711 = vmatpush.bf16.msrb.mxu2 %v2882_v57  ;;  %v1212_v33 = vrot.slane %v1210_v53, 5  ;;  %v2871_v41 = vld [vmem:[%s3673_s3 + $0x168] sm:$0xff]  ;;  %1956 = vmatpush.bf16.msrb.mxu3 %v2891_v34  ;;  %v3386_v45 = vld [vmem:[%s3673_s3 + $0x238] sm:$0xff]  ;;  %s262_s10 = scalar_lea.vmem %s3676_s6, %s2325_s11 }
  0x43   : > { %v662_v46 = vrot.slane %v661_v35, 4  ;;  %v883_v27 = vld [vmem:[#allocation2 + $0x20] sm:$0xe]  ;;  %v884_v54 = vld [vmem:[#allocation2 + $0x28] sm:$0xe] }
  0x44   : > { %856 = vmatpush.bf16.msrb.mxu1 %v2823_v12  ;;  %1405 = vmatpush.bf16.msrb.mxu0 %v2859_v25  ;;  %v379_v16 = vld [vmem:[#allocation2 + $0x4c] sm:$0x1]  ;;  %v2672_v20 = vld [vmem:[#allocation2 + $0x30] sm:$0xf] }
  0x45   : > { %v667_v49 = vsel %vm3213_vm12, %v662_v46, %v666_v40  ;;  %v3375_v40 = vld [vmem:[#allocation2 + $0xc] sm:$0x1] }
  0x46   : > { %v692_v51 = vunpack.c.l.b16 %v667_v49  ;;  %v523_v58 = vld [vmem:[#allocation2 + $0x10] sm:$0xf] }
  0x47   : > { %v2846_v59 = vld [vmem:[#allocation2 + $0xc] sm:$0xf0]  ;;  %v524_v62 = vld [vmem:[#allocation2 + $0x18] sm:$0xf]  ;;  %v585_v47 = vshrl.u32 %v523_v58, 16  ;;  %v588_v63 = vshll.u32 %v523_v58, 16 }
  0x48   : > { %857 = vmatpush.bf16.msrb.mxu1 %v2822_v44  ;;  %1406 = vmatpush.bf16.msrb.mxu0 %v2858_v28  ;;  %v881_v60 = vld [vmem:[#allocation2 + $0x10] sm:$0xe]  ;;  %v696_v61 = vpack.c.b16 %v692_v51, %v691_v48  ;;  %v2497_v2 = vor.u32 %v2846_v59, %v2496_v50  ;;  %v882_v3 = vld [vmem:[#allocation2 + $0x18] sm:$0xe]  ;;  %v547_v4 = vld [vmem:[#allocation2 + $0x14] sm:$0x1]  ;;  %v1213_v59 = vor.u32 %v1212_v33, %v3357_v52 }
  0x49   : > { %v599_v31 = vshrl.u32 %v524_v62, 16  ;;  %v602_v5 = vshll.u32 %v524_v62, 16  ;;  %v2424_v7 = vrot.slane %v881_v60, 9  ;;  %v2425_v12 = vrot.slane %v882_v3, 9  ;;  %v548_v13 = vld [vmem:[#allocation2 + $0x1c] sm:$0x1] }
  0x4a   : > { %772 = vmatmul.bf16.gmra.mxu1 %v696_v61  ;;  %v587_v18 = vrot.slane %v585_v47, 4  ;;  %v590_v0 = vrot.slane %v588_v63, 5  ;;  %v594_v17 = vshll.u32 %v547_v4, 16  ;;  %1161 = vmatmul.bf16.vlgmr.msra.gmra.mxu3 %v2497_v2  ;;  %v916_v19 = vrot.slane %v547_v4, 5  ;;  %v1192_v30 = vld [vmem:[#allocation2 + $0x10] sm:$0xf] }
  0x4b   : > { %v601_v22 = vrot.slane %v599_v31, 4  ;;  %v604_v9 = vrot.slane %v602_v5, 5  ;;  %v608_v21 = vshll.u32 %v548_v13, 16  ;;  %v920_v23 = vrot.slane %v548_v13, 5  ;;  %v2881_v28 = vld [vmem:[%s3673_s3 + $0x198] sm:$0xff] }
  0x4c   : > { %1573 = vmatpush.bf16.msra.mxu1 %v2873_v8  ;;  %v591_v25 = vor.u32 %v590_v0, %v587_v18  ;;  %v596_v26 = vrot.slane %v594_v17, 5  ;;  %v917_v29 = vsel %vm3192_vm11, %v2424_v7, %v916_v19  ;;  %v1221_v44 = vshrl.u32 %v1192_v30, 16  ;;  %v3390_v50 = vld [vmem:[#allocation2 + $0x14] sm:$0x1]  ;;  %1712 = vmatpush.bf16.msrb.mxu2 %v2881_v28  ;;  %v2376_v58 = vld [vmem:[#allocation2] sm:$0xf] }
  0x4d   : > { %v605_v37 = vor.u32 %v604_v9, %v601_v22  ;;  %v610_v38 = vrot.slane %v608_v21, 5  ;;  %v921_v39 = vsel %vm3192_vm11, %v2425_v12, %v920_v23  ;;  %v957_v35 = vunpack.c.l.b16 %v917_v29  ;;  %2128 = vmatpush.bf16.msra.mxu0 %v3386_v45  ;;  %v2818_v62 = vld [vmem:[#allocation2 + $0x4] sm:$0xf0]  ;;  %v2847_v47 = vld [vmem:[#allocation2 + $0x1c] sm:$0xf0]  ;;  %v2889_v29 = vld [vmem:[%s3673_s3 + $0x1d8] sm:$0xff] }
  0x4e   : > { %v592_v42 = vrot.slane %v591_v25, 4  ;;  %v958_v43 = vunpack.c.l.b16 %v921_v39  ;;  %v1224_v8 = vshll.u32 %v1192_v30, 16  ;;  %v1216_v51 = vshll.u32 %v3375_v40, 16  ;;  %v2500_v3 = vld [vmem:[#allocation2 + $0x18] sm:$0xf]  ;;  %v2870_v22 = vld [vmem:[%s3673_s3 + $0x160] sm:$0xff] }
  0x4f   : > { %v606_v46 = vrot.slane %v605_v37, 4  ;;  %v1223_v53 = vrot.slane %v1221_v44, 4  ;;  %v2426_v63 = vrot.slane %v883_v27, 9  ;;  %v924_v2 = vrot.slane %v3239_v24, 5  ;;  %v1194_v19 = vld [vmem:[#allocation2 + $0x18] sm:$0xf] }
  0x50   : > { %1574 = vmatpush.bf16.msra.mxu1 %v2872_v55  ;;  %v597_v48 = vsel %vm3213_vm12, %v592_v42, %v596_v26  ;;  %v964_v49 = vpack.c.b16 %v958_v43, %v957_v35  ;;  %v1226_v60 = vrot.slane %v1224_v8, 5  ;;  %v1230_v31 = vshll.u32 %v3390_v50, 16  ;;  %v2890_v24 = vld [vmem:[%s3673_s3 + $0x1e0] sm:$0xff]  ;;  %v2880_v25 = vld [vmem:[%s3673_s3 + $0x190] sm:$0xff]  ;;  %v2879_v42 = vld [vmem:[%s3673_s3 + $0x188] sm:$0xff] }
  0x51   : > { %v611_v55 = vsel %vm3213_vm12, %v606_v46, %v610_v38  ;;  %v687_v57 = vunpack.c.l.b16 %v597_v48  ;;  %v2427_v5 = vrot.slane %v884_v54, 9  ;;  %v928_v7 = vrot.slane %v3253_v36, 5  ;;  %v1196_v23 = vld [vmem:[#allocation2 + $0x20] sm:$0xf]  ;;  %v3416_v26 = vld [vmem:[%s3673_s3 + $0x230] sm:$0xff]  ;;  %1957 = vmatpush.bf16.msrb.mxu3 %v2890_v24  ;;  %1713 = vmatpush.bf16.msrb.mxu2 %v2880_v25  ;;  %v3433_v43 = vld [vmem:[%s3673_s3 + $0x228] sm:$0xff] }
  0x52   : > { %v688_v61 = vunpack.c.l.b16 %v611_v55  ;;  %1032 = vmatmul.bf16.gmra.mxu2 %v964_v49  ;;  %v1227_v4 = vor.u32 %v1226_v60, %v1223_v53  ;;  %v1214_v13 = vrot.slane %v1213_v59, 4  ;;  %v1218_v18 = vrot.slane %v1216_v51, 5  ;;  %v344_v30 = vld [vmem:[#allocation2 + $0x40] sm:$0x1]  ;;  %2129 = vmatpush.bf16.msra.mxu0 %v3416_v26  ;;  %v3440_v48 = vld [vmem:[#allocation2 + $0x1c] sm:$0x1] }
  0x53   : > { %v2377_v52 = vor.u32 %v2818_v62, %v2376_v58  ;;  %v2501_v0 = vor.u32 %v2847_v47, %v2500_v3  ;;  %v925_v17 = vsel %vm3192_vm11, %v2426_v63, %v924_v2  ;;  %v1232_v36 = vrot.slane %v1230_v31, 5  ;;  %v2878_v49 = vld [vmem:[%s3673_s3 + $0x180] sm:$0xff]  ;;  %v886_v47 = vld [vmem:[#allocation2 + $0x38] sm:$0xe]  ;;  %v2380_v63 = vld [vmem:[#allocation2 + $0x10] sm:$0xf] }
  0x54   : > { %1575 = vmatpush.bf16.msra.mxu1 %v2871_v41  ;;  %v694_v12 = vpack.c.b16 %v688_v61, %v687_v57  ;;  %v1228_v9 = vrot.slane %v1227_v4, 4  ;;  %v929_v21 = vsel %vm3192_vm11, %v2427_v5, %v928_v7  ;;  %v1219_v33 = vsel %vm3213_vm12, %v1214_v13, %v1218_v18  ;;  %v2869_v41 = vld [vmem:[%s3673_s3 + $0x158] sm:$0xff]  ;;  %v3447_v54 = vld [vmem:[#allocation2 + $0x24] sm:$0x1]  ;;  %v885_v61 = vld [vmem:[#allocation2 + $0x30] sm:$0xe] }
  0x55   : > { %v959_v34 = vunpack.c.l.b16 %v925_v17  ;;  %v960_v37 = vunpack.c.l.b16 %v929_v21  ;;  %v1235_v38 = vshrl.u32 %v1194_v19, 16  ;;  %v1238_v39 = vshll.u32 %v1194_v19, 16  ;;  %1958 = vmatpush.bf16.msrb.mxu3 %v2889_v29  ;;  %1714 = vmatpush.bf16.msrb.mxu2 %v2879_v42  ;;  %v376_v58 = vld [vmem:[#allocation2 + $0x44] sm:$0x1]  ;;  %v2819_v5 = vld [vmem:[#allocation2 + $0x14] sm:$0xf0] }
  0x56   : > { %762 = vmatmul.bf16.gmra.mxu0 %v694_v12  ;;  %v1249_v35 = vshrl.u32 %v1196_v23, 16  ;;  %v1233_v44 = vsel %vm3213_vm12, %v1228_v9, %v1232_v36  ;;  %v1252_v28 = vshll.u32 %v1196_v23, 16  ;;  %v2917_v46 = vunpack.c.h.bf16 %v3108_v32  ;;  %v2848_v18 = vld [vmem:[#allocation2 + $0x2c] sm:$0xf0]  ;;  %v1198_v36 = vld [vmem:[#allocation2 + $0x28] sm:$0xf] }
  0x57   : > { %v345_v8 = vsel %vm3078_vm3, 0, %v344_v30  ;;  %v1335_v27 = vunpack.c.l.b16 %v1219_v33  ;;  %2130 = vmatpush.bf16.msra.mxu0 %v3433_v43  ;;  %v1336_v53 = vunpack.c.l.b16 %v1233_v44  ;;  %v965_v32 = vpack.c.b16 %v960_v37, %v959_v34  ;;  %v1200_v21 = vld [vmem:[#allocation2 + $0x30] sm:$0xf]  ;;  %v2887_v42 = vld [vmem:[%s3673_s3 + $0x1c8] sm:$0xff] }
  0x58   : > { %1576 = vmatpush.bf16.msra.mxu1 %v2870_v22  ;;  %346 = vst [vmem:[#allocation2 + $0x40] sm:$0x1] %v345_v8  ;;  %v291_v51 = vmul.f32 %v3065_v11, %v2917_v46  ;;  %v1237_v55 = vrot.slane %v1235_v38, 4  ;;  %v1240_v57 = vrot.slane %v1238_v39, 5  ;;  %v1251_v59 = vrot.slane %v1249_v35, 4  ;;  %v2888_v30 = vld [vmem:[%s3673_s3 + $0x1d0] sm:$0xff] }
  0x59   : > { %v1254_v60 = vrot.slane %v1252_v28, 5  ;;  %v1244_v2 = vshll.u32 %v3440_v48, 16  ;;  %v1258_v3 = vshll.u32 %v3447_v54, 16  ;;  %1715 = vmatpush.bf16.msrb.mxu2 %v2878_v49  ;;  %v377_v4 = vsel %vm3087_vm4, 0, %v376_v58  ;;  %1959 = vmatpush.bf16.msrb.mxu3 %v2888_v30 }
  0x5a   : > { %858 = vmatmul.bf16.vlgmr.msrb.gmra.mxu1 %v2377_v52  ;;  %1166 = vmatmul.bf16.gmra.mxu3 %v2501_v0  ;;  %v303_v62 = vadd.f32 %v3074_v15, %v291_v51  ;;  %v1343_v31 = vpack.c.b16 %v1336_v53, %v1335_v27  ;;  %v1241_v7 = vor.u32 %v1240_v57, %v1237_v55  ;;  %v2428_v12 = vrot.slane %v885_v61, 9  ;;  %v2504_v15 = vld [vmem:[#allocation2 + $0x28] sm:$0xf]  ;;  %v2897_v53 = vld [vmem:[%s3673_s3 + $0x218] sm:$0xff] }
  0x5b   : > { %v932_v13 = vrot.slane %v3315_v1, 5  ;;  %378 = vst [vmem:[#allocation2 + $0x44] sm:$0x1] %v377_v4  ;;  %v1255_v52 = vor.u32 %v1254_v60, %v1251_v59  ;;  %v2429_v0 = vrot.slane %v886_v47, 9  ;;  %v936_v17 = vrot.slane %v3327_v14, 5  ;;  %v2868_v14 = vld [vmem:[%s3673_s3 + $0x150] sm:$0xff] }
  0x5c   : > { %1577 = vmatpush.bf16.msra.mxu1 %v2869_v41  ;;  %v311_v11 = vmax.f32 %v303_v62, 0.0  ;;  %v2381_v24 = vor.u32 %v2819_v5, %v2380_v63  ;;  %v2505_v23 = vor.u32 %v2848_v18, %v2504_v15  ;;  %v1242_v25 = vrot.slane %v1241_v7, 4  ;;  %v1745_v59 = vld [vmem:[#allocation2 + $0x10] sm:$0xf]  ;;  %v2886_v60 = vld [vmem:[%s3673_s3 + $0x1c0] sm:$0xff] }
  0x5d   : > { %2952 = vmatpush.bf16.msra.mxu2 %v3386_v45  ;;  %v1246_v29 = vrot.slane %v1244_v2, 5  ;;  %v1260_v1 = vrot.slane %v1258_v3, 5  ;;  %v2898_v45 = vld [vmem:[%s3673_s3 + $0x220] sm:$0xff]  ;;  %v1256_v33 = vrot.slane %v1255_v52, 4  ;;  %v933_v34 = vsel %vm3192_vm11, %v2428_v12, %v932_v13  ;;  %1960 = vmatpush.bf16.msrb.mxu3 %v2887_v42  ;;  %v1747_v61 = vld [vmem:[#allocation2 + $0x18] sm:$0xf] }
  0x5e   : > { %v389_v19 = vpack.c.bf16 %v311_v11, %v311_v11  ;;  %v937_v37 = vsel %vm3192_vm11, %v2429_v0, %v936_v17  ;;  %v1263_v35 = vshrl.u32 %v1198_v36, 16  ;;  %v1266_v41 = vshll.u32 %v1198_v36, 16  ;;  %2131 = vmatpush.bf16.msra.mxu0 %v2898_v45  ;;  %v3492_v4 = vld [vmem:[#allocation2 + $0x2c] sm:$0x1]  ;;  %v2384_v17 = vld [vmem:[#allocation2 + $0x20] sm:$0xf] }
  0x5f   : > { %v515_v39 = vld [vmem:[#allocation2 + $0x40] sm:$0xf]  ;;  %v1277_v46 = vshrl.u32 %v1200_v21, 16  ;;  %v1280_v8 = vshll.u32 %v1200_v21, 16  ;;  %v961_v49 = vunpack.c.l.b16 %v933_v34  ;;  %v962_v51 = vunpack.c.l.b16 %v937_v37 }
  0x60   : > { %v447_v22 = vshrl.u32 %v389_v19, 16  ;;  %v450_v9 = vshll.u32 %v389_v19, 16  ;;  %1578 = vmatpush.bf16.msra.mxu1 %v2868_v14  ;;  %v1261_v55 = vsel %vm3213_vm12, %v1256_v33, %v1260_v1  ;;  %v1265_v62 = vrot.slane %v1263_v35, 4  ;;  %v2820_v19 = vld [vmem:[#allocation2 + $0x24] sm:$0xf0] }
  0x61   : > { %2953 = vmatpush.bf16.msra.mxu2 %v3416_v26  ;;  %v2867_v26 = vld [vmem:[%s3673_s3 + $0x148] sm:$0xff]  ;;  %v1268_v47 = vrot.slane %v1266_v41, 5  ;;  %v1279_v63 = vrot.slane %v1277_v46, 4  ;;  %v1282_v2 = vrot.slane %v1280_v8, 5  ;;  %v1338_v3 = vunpack.c.l.b16 %v1261_v55  ;;  %1961 = vmatpush.bf16.msrb.mxu3 %v2886_v60  ;;  %v1202_v33 = vld [vmem:[#allocation2 + $0x38] sm:$0xf] }
  0x62   : > { %1037 = vmatmul.bf16.gmra.mxu2 %v965_v32  ;;  %v449_v38 = vrot.slane %v447_v22, 7  ;;  %v518_v27 = vld [vmem:[#allocation2 + $0x44] sm:$0x1]  ;;  %v1247_v32 = vsel %vm3213_vm12, %v1242_v25, %v1246_v29  ;;  %2132 = vmatpush.bf16.msra.mxu0 %v2897_v53  ;;  %v966_v11 = vpack.c.b16 %v962_v51, %v961_v49  ;;  %v1765_v5 = vshll.u32 %v1745_v59, 16  ;;  %v3498_v25 = vld [vmem:[#allocation2 + $0x14] sm:$0x1] }
  0x63   : > { %v1337_v10 = vunpack.c.l.b16 %v1247_v32  ;;  %v1776_v7 = vshrl.u32 %v1747_v61, 16  ;;  %v1779_v12 = vshll.u32 %v1747_v61, 16  ;;  %v1269_v13 = vor.u32 %v1268_v47, %v1265_v62  ;;  %v3500_v29 = vld [vmem:[#allocation2 + $0x1c] sm:$0x1]  ;;  %v1749_v55 = vld [vmem:[#allocation2 + $0x20] sm:$0xf] }
  0x64   : > { %v452_v44 = vor.u32 %v450_v9, %v449_v38  ;;  %v453_v28 = vrot.slane %v449_v38, 4  ;;  %1579 = vmatpush.bf16.msra.mxu1 %v2867_v26  ;;  %v1272_v15 = vshll.u32 %v3492_v4, 16  ;;  %v1283_v18 = vor.u32 %v1282_v2, %v1279_v63  ;;  %v2866_v38 = vld [vmem:[%s3673_s3 + $0x140] sm:$0xff]  ;;  %v2664_v26 = vld [vmem:[#allocation2 + $0x10] sm:$0xf] }
  0x65   : > { %2954 = vmatpush.bf16.msra.mxu2 %v3433_v43  ;;  %v3494_v43 = vld [vmem:[#allocation2 + $0x34] sm:$0x1]  ;;  %v1344_v0 = vpack.c.b16 %v1338_v3, %v1337_v10  ;;  %v1767_v36 = vrot.slane %v1765_v5, 5  ;;  %v1778_v21 = vrot.slane %v1776_v7, 4  ;;  %v1270_v1 = vrot.slane %v1269_v13, 4  ;;  %v2894_v3 = vld [vmem:[%s3673_s3 + $0x200] sm:$0xff] }
  0x66   : > { %1407 = vmatmul.bf16.vlgmr.msrb.gmra.mxu0 %v1343_v31  ;;  %v516_v57 = vsel %vm3154_vm10, %v452_v44, %v515_v39  ;;  %v519_v58 = vsel %vm3078_vm3, %v453_v28, %v518_v27  ;;  %v1762_v31 = vshrl.u32 %v1745_v59, 16  ;;  %v1286_v52 = vshll.u32 %v3494_v43, 16  ;;  %v2896_v39 = vld [vmem:[%s3673_s3 + $0x210] sm:$0xff]  ;;  %v2895_v27 = vld [vmem:[%s3673_s3 + $0x208] sm:$0xff] }
  0x67   : > { %517 = vst [vmem:[#allocation2 + $0x40] sm:$0xf] %v516_v57  ;;  %v1274_v30 = vrot.slane %v1272_v15, 5  ;;  %v1284_v14 = vrot.slane %v1283_v18, 4  ;;  %v2385_v34 = vor.u32 %v2820_v19, %v2384_v17  ;;  %v1771_v42 = vshll.u32 %v3498_v25, 16  ;;  %2133 = vmatpush.bf16.msra.mxu0 %v2896_v39 }
  0x68   : > { %520 = vst [vmem:[#allocation2 + $0x44] sm:$0x1] %v519_v58  ;;  %v1764_v9 = vrot.slane %v1762_v31, 4  ;;  %v1785_v28 = vshll.u32 %v3500_v29, 16  ;;  %v1291_v46 = vshrl.u32 %v1202_v33, 16  ;;  %v1294_v8 = vshll.u32 %v1202_v33, 16  ;;  %1580 = vmatpush.bf16.msra.mxu1 %v2866_v38 }
  0x69   : > { %2955 = vmatpush.bf16.msra.mxu2 %v2898_v45  ;;  %v1288_v45 = vrot.slane %v1286_v52, 5  ;;  %v1275_v49 = vsel %vm3213_vm12, %v1270_v1, %v1274_v30  ;;  %v1751_v57 = vld [vmem:[#allocation2 + $0x28] sm:$0xf]  ;;  %v2874_v58 = vld [vmem:[#allocation2 + $0x14] sm:$0xf0]  ;;  %v1773_v60 = vrot.slane %v1771_v42, 5 }
  0x6a   : > { %863 = vmatmul.bf16.gmra.mxu1 %v2381_v24  ;;  %1171 = vmatmul.bf16.gmra.mxu3 %v2505_v23  ;;  %v2508_v24 = vld [vmem:[#allocation2 + $0x38] sm:$0xf]  ;;  %v1781_v23 = vrot.slane %v1779_v12, 5  ;;  %v1768_v41 = vor.u32 %v1767_v36, %v1764_v9  ;;  %v1787_v62 = vrot.slane %v1785_v28, 5  ;;  %v1339_v47 = vunpack.c.l.b16 %v1275_v49  ;;  %v3530_v33 = vld [vmem:[#allocation2 + $0x24] sm:$0x1] }
  0x6b   : > { %v1289_v51 = vsel %vm3213_vm12, %v1284_v14, %v1288_v45  ;;  %v1293_v2 = vrot.slane %v1291_v46, 4  ;;  %v1296_v10 = vrot.slane %v1294_v8, 5  ;;  %2134 = vmatpush.bf16.msra.mxu0 %v2895_v27  ;;  %v1790_v31 = vshrl.u32 %v1749_v55, 16  ;;  %v2821_v38 = vld [vmem:[#allocation2 + $0x34] sm:$0xf0] }
  0x6c   : > { %v1782_v44 = vor.u32 %v1781_v23, %v1778_v21  ;;  %v1769_v59 = vrot.slane %v1768_v41, 4  ;;  %v1340_v63 = vunpack.c.l.b16 %v1289_v51  ;;  %v1793_v5 = vshll.u32 %v1749_v55, 16  ;;  %v1436_v41 = vld [vmem:[#allocation2 + $0x8] sm:$0xe]  ;;  %v1437_v42 = vld [vmem:[#allocation2 + $0x10] sm:$0xe] }
  0x6d   : > { %2956 = vmatpush.bf16.msra.mxu2 %v2897_v53  ;;  %v1804_v7 = vshrl.u32 %v1751_v57, 16  ;;  %v1807_v12 = vshll.u32 %v1751_v57, 16  ;;  %v2665_v13 = vor.u32 %v2874_v58, %v2664_v26  ;;  %v1792_v9 = vrot.slane %v1790_v31, 4  ;;  %v2668_v57 = vld [vmem:[#allocation2 + $0x20] sm:$0xf] }
  0x6e   : > { %v2849_v22 = vld [vmem:[#allocation2 + $0x3c] sm:$0xf0]  ;;  %v1783_v61 = vrot.slane %v1782_v44, 4  ;;  %v1345_v19 = vpack.c.b16 %v1340_v63, %v1339_v47  ;;  %v1795_v36 = vrot.slane %v1793_v5, 5  ;;  %v1799_v28 = vshll.u32 %v3530_v33, 16 }
  0x6f   : > { %v2509_v37 = vor.u32 %v2849_v22, %v2508_v24  ;;  %v1204_v35 = vld [vmem:[#allocation2 + $0x40] sm:$0xf]  ;;  %v3522_v52 = vld [vmem:[#allocation2 + $0x44] sm:$0x1]  ;;  %v1297_v24 = vor.u32 %v1296_v10, %v1293_v2  ;;  %2135 = vmatpush.bf16.msra.mxu0 %v2894_v3  ;;  %v1806_v21 = vrot.slane %v1804_v7, 4  ;;  %v1809_v23 = vrot.slane %v1807_v12, 5 }
  0x70   : > { %v1305_v53 = vshrl.u32 %v1204_v35, 16  ;;  %v1308_v32 = vshll.u32 %v1204_v35, 16  ;;  %v1788_v17 = vsel %vm3213_vm12, %v1783_v61, %v1787_v62  ;;  %v1314_v30 = vshll.u32 %v3522_v52, 16  ;;  %v1753_v10 = vld [vmem:[#allocation2 + $0x30] sm:$0xf] }
  0x71   : > { %2957 = vmatpush.bf16.msra.mxu2 %v2896_v39  ;;  %v1891_v45 = vunpack.c.l.b16 %v1788_v17  ;;  %v1298_v39 = vrot.slane %v1297_v24, 4  ;;  %v1796_v44 = vor.u32 %v1795_v36, %v1792_v9  ;;  %v1810_v46 = vor.u32 %v1809_v23, %v1806_v21 }
  0x72   : > { %1042 = vmatmul.bf16.gmra.mxu2 %v966_v11  ;;  %v3520_v11 = vld [vmem:[#allocation2 + $0x3c] sm:$0x1]  ;;  %v1307_v15 = vrot.slane %v1305_v53, 4  ;;  %v1310_v18 = vrot.slane %v1308_v32, 5  ;;  %v1316_v51 = vrot.slane %v1314_v30, 5  ;;  %v1462_v53 = vrot.slane %v3375_v40, 5 }
  0x73   : > { %v1300_v22 = vshll.u32 %v3520_v11, 16  ;;  %v1466_v32 = vrot.slane %v3390_v50, 5  ;;  %v2590_v58 = vrot.slane %v1436_v41, 9  ;;  %v1797_v61 = vrot.slane %v1796_v44, 4  ;;  %v1755_v40 = vld [vmem:[#allocation2 + $0x38] sm:$0xf] }
  0x74   : > { %v1311_v1 = vor.u32 %v1310_v18, %v1307_v15  ;;  %v1801_v62 = vrot.slane %v1799_v28, 5  ;;  %v1811_v47 = vrot.slane %v1810_v46, 4  ;;  %v1818_v15 = vshrl.u32 %v1753_v10, 16  ;;  %v347_v18 = vld [vmem:[#allocation2 + $0x48] sm:$0x1] }
  0x75   : > { %2958 = vmatpush.bf16.msra.mxu2 %v2895_v27  ;;  %v1302_v35 = vrot.slane %v1300_v22, 5  ;;  %v1463_v31 = vsel %vm3192_vm11, %v2590_v58, %v1462_v53  ;;  %v1832_v17 = vshrl.u32 %v1755_v40, 16  ;;  %v348_v24 = vsel %vm3078_vm3, 0, %v347_v18  ;;  %v1991_v30 = vld [vmem:[#allocation2 + $0x10] sm:$0xe] }
  0x76   : > { %1412 = vmatmul.bf16.gmra.mxu0 %v1344_v0  ;;  %v1774_v0 = vsel %vm3213_vm12, %v1769_v59, %v1773_v60  ;;  %v1312_v49 = vrot.slane %v1311_v1, 4  ;;  %v2591_v59 = vrot.slane %v1437_v42, 9  ;;  %v2875_v60 = vld [vmem:[#allocation2 + $0x24] sm:$0xf0]  ;;  %v1802_v12 = vsel %vm3213_vm12, %v1797_v61, %v1801_v62  ;;  %349 = vst [vmem:[#allocation2 + $0x48] sm:$0x1] %v348_v24 }
  0x77   : > { %v1890_v14 = vunpack.c.l.b16 %v1774_v0  ;;  %v1303_v55 = vsel %vm3213_vm12, %v1298_v39, %v1302_v35  ;;  %v2669_v50 = vor.u32 %v2875_v60, %v2668_v57  ;;  %v1821_v0 = vshll.u32 %v1753_v10, 16  ;;  %v3553_v35 = vld [vmem:[#allocation2 + $0x34] sm:$0x1]  ;;  %v3555_v41 = vld [vmem:[#allocation2 + $0x3c] sm:$0x1] }
  0x78   : > { %v1317_v2 = vsel %vm3213_vm12, %v1312_v49, %v1316_v51  ;;  %v1467_v5 = vsel %vm3192_vm11, %v2591_v59, %v1466_v32  ;;  %v2017_v22 = vrot.slane %v3498_v25, 5  ;;  %v1509_v9 = vunpack.c.l.b16 %v1463_v31  ;;  %v1439_v49 = vld [vmem:[#allocation2 + $0x20] sm:$0xe]  ;;  %v2876_v61 = vld [vmem:[#allocation2 + $0x34] sm:$0xf0] }
  0x79   : > { %2959 = vmatpush.bf16.msra.mxu2 %v2894_v3  ;;  %v1898_v26 = vpack.c.b16 %v1891_v45, %v1890_v14  ;;  %v1341_v3 = vunpack.c.l.b16 %v1303_v55  ;;  %v1342_v7 = vunpack.c.l.b16 %v1317_v2  ;;  %v1510_v21 = vunpack.c.l.b16 %v1467_v5  ;;  %v1992_v14 = vld [vmem:[#allocation2 + $0x18] sm:$0xe]  ;;  %v1757_v10 = vld [vmem:[#allocation2 + $0x40] sm:$0xf] }
  0x7a   : > { %868 = vmatmul.bf16.gmra.mxu1 %v2385_v34  ;;  %1176 = vmatmul.bf16.gmra.mxu3 %v2509_v37  ;;  %v3532_v34 = vld [vmem:[#allocation2 + $0x2c] sm:$0x1]  ;;  %v2388_v37 = vld [vmem:[#allocation2 + $0x30] sm:$0xf]  ;;  %v1892_v23 = vunpack.c.l.b16 %v1802_v12  ;;  %v1820_v45 = vrot.slane %v1818_v15, 4  ;;  %v2021_v42 = vrot.slane %v3500_v29, 5  ;;  %v2673_v31 = vor.u32 %v2876_v61, %v2672_v20 }
  0x7b   : > { %v1813_v8 = vshll.u32 %v3532_v34, 16  ;;  %v2389_v27 = vor.u32 %v2821_v38, %v2388_v37  ;;  %v1346_v36 = vpack.c.b16 %v1342_v7, %v1341_v3  ;;  %v1823_v37 = vrot.slane %v1821_v0, 5 }
  0x7c   : > { %v1834_v38 = vrot.slane %v1832_v17, 4  ;;  %v2758_v25 = vrot.slane %v1991_v30, 9  ;;  %v2759_v44 = vrot.slane %v1992_v14, 9  ;;  %v380_v28 = vsel %vm3087_vm4, 0, %v379_v16  ;;  %v1758_v14 = vld [vmem:[#allocation2 + $0x44] sm:$0x1] }
  0x7d   : > { %v1815_v63 = vrot.slane %v1813_v8, 5  ;;  %v1517_v46 = vpack.c.b16 %v1510_v21, %v1509_v9  ;;  %381 = vst [vmem:[#allocation2 + $0x4c] sm:$0x1] %v380_v28  ;;  %v1824_v51 = vor.u32 %v1823_v37, %v1820_v45  ;;  %v1841_v32 = vshll.u32 %v3555_v41, 16  ;;  %v1993_v9 = vld [vmem:[#allocation2 + $0x20] sm:$0xe] }
  0x7e   : > { %v2018_v29 = vsel %vm3192_vm11, %v2758_v25, %v2017_v22  ;;  %v2022_v55 = vsel %vm3192_vm11, %v2759_v44, %v2021_v42  ;;  %v1470_v58 = vrot.slane %v3440_v48, 5  ;;  %v2593_v59 = vrot.slane %v1439_v49, 9  ;;  %v1440_v44 = vld [vmem:[#allocation2 + $0x28] sm:$0xe]  ;;  %v1441_v28 = vld [vmem:[#allocation2 + $0x30] sm:$0xe] }
  0x7f   : > { %v1474_v60 = vrot.slane %v3447_v54, 5  ;;  %v1825_v62 = vrot.slane %v1824_v51, 4  ;;  %v1843_v2 = vrot.slane %v1841_v32, 5  ;;  %v2064_v3 = vunpack.c.l.b16 %v2018_v29 }
  0x80   : > { %v1846_v12 = vshrl.u32 %v1757_v10, 16  ;;  %v2760_v37 = vrot.slane %v1993_v9, 9  ;;  %v2029_v16 = vrot.slane %v3532_v34, 5  ;;  %v1478_v34 = vrot.slane %v3492_v4, 5 }
  0x81   : > { %v1475_v48 = vsel %vm3192_vm11, %v2593_v59, %v1474_v60  ;;  %v2595_v32 = vrot.slane %v1441_v28, 9  ;;  %v1482_v29 = vrot.slane %v3494_v43, 5 }
  0x82   : > { %1716 = vmatmul.bf16.vlgmr.msrb.gmra.mxu2 %v2665_v13  ;;  %v1816_v13 = vsel %vm3213_vm12, %v1811_v47, %v1815_v63  ;;  %v1848_v21 = vrot.slane %v1846_v12, 4  ;;  %v1996_v12 = vld [vmem:[#allocation2 + $0x38] sm:$0xe] }
  0x83   : > { %v1893_v1 = vunpack.c.l.b16 %v1816_v13  ;;  %v1849_v13 = vshll.u32 %v1757_v10, 16  ;;  %v1998_v10 = vld [vmem:[#allocation2 + $0x48] sm:$0xe] }
  0x84   : > { %v1760_v45 = vld [vmem:[#allocation2 + $0x4c] sm:$0x1] }
  0x85   : > { %v1899_v8 = vpack.c.b16 %v1893_v1, %v1892_v23  ;;  %v1851_v23 = vrot.slane %v1849_v13, 5  ;;  %v1869_v49 = vshll.u32 %v1760_v45, 16 }
  0x86   : > { %1417 = vmatmul.bf16.gmra.mxu0 %v1345_v19  ;;  %v1835_v19 = vshll.u32 %v1755_v40, 16  ;;  %v1759_v40 = vld [vmem:[#allocation2 + $0x48] sm:$0xf] }
  0x87   : > { %v1860_v15 = vshrl.u32 %v1759_v40, 16  ;;  %v1863_v18 = vshll.u32 %v1759_v40, 16  ;;  %v1871_v59 = vrot.slane %v1869_v49, 5 }
  0x88   : > { %v1837_v39 = vrot.slane %v1835_v19, 5  ;;  %v1512_v19 = vunpack.c.l.b16 %v1475_v48  ;;  %v1995_v48 = vld [vmem:[#allocation2 + $0x30] sm:$0xe] }
  0x89   : > { %v1862_v1 = vrot.slane %v1860_v15, 4  ;;  %v1865_v30 = vrot.slane %v1863_v18, 5  ;;  %v2765_v15 = vrot.slane %v1998_v10, 9 }
  0x8a   : > { %873 = vmatmul.bf16.gmra.mxu1 %v2389_v27  ;;  %1962 = vmatmul.bf16.vlgmr.msrb.gmra.mxu3 %v1898_v26  ;;  %v1438_v27 = vld [vmem:[#allocation2 + $0x18] sm:$0xe]  ;;  %v1827_v26 = vshll.u32 %v3553_v35, 16  ;;  %v1838_v53 = vor.u32 %v1837_v39, %v1834_v38  ;;  %v2025_v38 = vrot.slane %v3530_v33, 5  ;;  %v2676_v33 = vld [vmem:[#allocation2 + $0x40] sm:$0xf] }
  0x8b   : > { %v2592_v57 = vrot.slane %v1438_v27, 9  ;;  %v1866_v27 = vor.u32 %v1865_v30, %v1862_v1 }
  0x8c   : > { %v1829_v47 = vrot.slane %v1827_v26, 5  ;;  %v1839_v63 = vrot.slane %v1838_v53, 4  ;;  %v2026_v51 = vsel %vm3192_vm11, %v2760_v37, %v2025_v38  ;;  %v2594_v53 = vrot.slane %v1440_v44, 9 }
  0x8d   : > { %v1471_v5 = vsel %vm3192_vm11, %v2592_v57, %v1470_v58  ;;  %v1867_v58 = vrot.slane %v1866_v27, 4  ;;  %v2066_v60 = vunpack.c.l.b16 %v2026_v51  ;;  %v1490_v38 = vrot.slane %v3522_v52, 5 }
  0x8e   : > { %v1830_v54 = vsel %vm3213_vm12, %v1825_v62, %v1829_v47  ;;  %v1844_v7 = vsel %vm3213_vm12, %v1839_v63, %v1843_v2  ;;  %v1511_v17 = vunpack.c.l.b16 %v1471_v5  ;;  %v1479_v47 = vsel %vm3192_vm11, %v2594_v53, %v1478_v34  ;;  %v1997_v2 = vld [vmem:[#allocation2 + $0x40] sm:$0xe] }
  0x8f   : > { %v1894_v24 = vunpack.c.l.b16 %v1830_v54  ;;  %v1895_v22 = vunpack.c.l.b16 %v1844_v7  ;;  %v1483_v63 = vsel %vm3192_vm11, %v2595_v32, %v1482_v29  ;;  %v1872_v43 = vsel %vm3213_vm12, %v1867_v58, %v1871_v59 }
  0x90   : > { %v1518_v42 = vpack.c.b16 %v1512_v19, %v1511_v17  ;;  %v1513_v40 = vunpack.c.l.b16 %v1479_v47  ;;  %v1897_v5 = vunpack.c.l.b16 %v1872_v43  ;;  %v2041_v54 = vrot.slane %v1758_v14, 5 }
  0x91   : > { %v1900_v25 = vpack.c.b16 %v1895_v22, %v1894_v24  ;;  %v2045_v7 = vrot.slane %v1760_v45, 5  ;;  %v2764_v13 = vrot.slane %v1997_v2, 9  ;;  %v2033_v19 = vrot.slane %v3553_v35, 5 }
  0x92   : > { %1721 = vmatmul.bf16.gmra.mxu2 %v2669_v50  ;;  %v2065_v50 = vunpack.c.l.b16 %v2022_v55  ;;  %v2877_v55 = vld [vmem:[#allocation2 + $0x44] sm:$0xf0]  ;;  %v2763_v24 = vrot.slane %v1996_v12, 9  ;;  %v2037_v22 = vrot.slane %v3555_v41, 5  ;;  %v1486_v41 = vrot.slane %v3520_v11, 5 }
  0x93   : > { %v2677_v62 = vor.u32 %v2877_v55, %v2676_v33  ;;  %v2042_v9 = vsel %vm3192_vm11, %v2764_v13, %v2041_v54 }
  0x94   : > { %v2072_v0 = vpack.c.b16 %v2065_v50, %v2064_v3  ;;  %v1514_v3 = vunpack.c.l.b16 %v1483_v63  ;;  %v2038_v30 = vsel %vm3192_vm11, %v2763_v24, %v2037_v22  ;;  %v2070_v35 = vunpack.c.l.b16 %v2042_v9 }
  0x96   : > { %1422 = vmatmul.bf16.gmra.mxu0 %v1346_v36  ;;  %v1994_v36 = vld [vmem:[#allocation2 + $0x28] sm:$0xe]  ;;  %v1519_v18 = vpack.c.b16 %v1514_v3, %v1513_v40 }
  0x97   : > { %v2761_v39 = vrot.slane %v1994_v36, 9  ;;  %v2046_v36 = vsel %vm3192_vm11, %v2765_v15, %v2045_v7 }
  0x99   : > { %v2030_v26 = vsel %vm3192_vm11, %v2761_v39, %v2029_v16 }
  0x9a   : > { %1581 = vmatmul.bf16.vlgmr.msra.gmra.mxu1 %v1517_v46  ;;  %1967 = vmatmul.bf16.gmra.mxu3 %v1899_v8  ;;  %v1852_v46 = vor.u32 %v1851_v23, %v1848_v21  ;;  %v1855_v8 = vshll.u32 %v1758_v14, 16  ;;  %v2067_v61 = vunpack.c.l.b16 %v2030_v26  ;;  %v1442_v21 = vld [vmem:[#allocation2 + $0x38] sm:$0xe]  ;;  %v1443_v23 = vld [vmem:[#allocation2 + $0x40] sm:$0xe]  ;;  %v2071_v14 = vunpack.c.l.b16 %v2046_v36 }
  0x9b   : > { %v2596_v45 = vrot.slane %v1442_v21, 9  ;;  %v2597_v37 = vrot.slane %v1443_v23, 9 }
  0x9c   : > { %v1853_v20 = vrot.slane %v1852_v46, 4  ;;  %v1857_v57 = vrot.slane %v1855_v8, 5  ;;  %v2073_v50 = vpack.c.b16 %v2067_v61, %v2066_v60 }
  0x9d   : > { %v1487_v28 = vsel %vm3192_vm11, %v2596_v45, %v1486_v41  ;;  %v1491_v46 = vsel %vm3192_vm11, %v2597_v37, %v1490_v38 }
  0x9e   : > { %v1858_v4 = vsel %vm3213_vm12, %v1853_v20, %v1857_v57  ;;  %v1515_v49 = vunpack.c.l.b16 %v1487_v28  ;;  %v1516_v51 = vunpack.c.l.b16 %v1491_v46 }
  0xa0   : > { %v1520_v11 = vpack.c.b16 %v1516_v51, %v1515_v49 }
  0xa2   : > { %1726 = vmatmul.bf16.gmra.mxu2 %v2673_v31  ;;  %v1896_v31 = vunpack.c.l.b16 %v1858_v4 }
  0xa4   : > { %v1901_v6 = vpack.c.b16 %v1897_v5, %v1896_v31 }
  0xa6   : > { %2136 = vmatmul.bf16.vlgmr.msra.gmra.mxu0 %v2072_v0  ;;  %v2762_v0 = vrot.slane %v1995_v48, 9 }
  0xa8   : > { %v2034_v1 = vsel %vm3192_vm11, %v2762_v0, %v2033_v19 }
  0xa9   : > { %v2068_v16 = vunpack.c.l.b16 %v2034_v1 }
  0xaa   : > { %1586 = vmatmul.bf16.gmra.mxu1 %v1518_v42  ;;  %1972 = vmatmul.bf16.gmra.mxu3 %v1900_v25  ;;  %v2069_v42 = vunpack.c.l.b16 %v2038_v30  ;;  %v2075_v25 = vpack.c.b16 %v2071_v14, %v2070_v35 }
  0xac   : > { %v2074_v27 = vpack.c.b16 %v2069_v42, %v2068_v16 }
  0xb2   : > { %1731 = vmatmul.bf16.gmra.mxu2 %v2677_v62 }
  0xb6   : > { %2141 = vmatmul.bf16.gmra.mxu0 %v2073_v50  ;;  %v3592_v17 = vpop.f32.mrf.mxu1 }
  0xba   : > { %1591 = vmatmul.bf16.gmra.mxu1 %v1519_v18  ;;  %1977 = vmatmul.bf16.gmra.mxu3 %v1901_v6  ;;  %v758_v44 = vpop.f32.mrf.mxu0  ;;  %v1028_v8 = vpop.f32.mrf.mxu2 }
  0xbe   : > { %v770_v39 = vpop.f32.mrf.mxu1 }
  0xc2   : > { %2151 = vmatmul.bf16.vlgmr.msra.gmra.mxu2 %v2075_v25  ;;  %v760_v52 = vpop.f32.mrf.mxu0  ;;  %v1030_v33 = vpop.f32.mrf.mxu2 }
  0xc6   : > { %2146 = vmatmul.bf16.gmra.mxu0 %v2074_v27 }
  0xc7   : > { %v773_v26 = vpop.f32.mrf.mxu1 }
  0xca   : > { %1596 = vmatmul.bf16.gmra.mxu1 %v1520_v11 }
  0xcd   : > { %v1162_v53 = vpop.f32.mrf.mxu3 }
  0xcf   : > { %v775_v34 = vpop.f32.mrf.mxu1 }
  0xd3   : > { %v763_v32 = vpop.f32.mrf.mxu0 }
  0xd5   : > { %v1033_v29 = vpop.f32.mrf.mxu2  ;;  %v1164_v55 = vpop.f32.mrf.mxu3 }
  0xd7   : > { %v859_v20 = vpop.f32.mrf.mxu1 }
  0xd8   : > { %v860_v57 = vadd.f32 %v859_v20, %v758_v44 }
  0xda   : > { %v1048_v56 = vadd.f32 %v1028_v8, %v860_v57 }
  0xdb   : > { %v765_v58 = vpop.f32.mrf.mxu0 }
  0xdc   : > { %v1182_v59 = vadd.f32 %v1162_v53, %v1048_v56 }
  0xdd   : > { %v1035_v60 = vpop.f32.mrf.mxu2  ;;  %v1167_v61 = vpop.f32.mrf.mxu3 }
  0xdf   : > { %v861_v62 = vpop.f32.mrf.mxu1 }
  0xe0   : > { %v862_v47 = vadd.f32 %v861_v62, %v760_v52 }
  0xe2   : > { %v1049_v63 = vadd.f32 %v1030_v33, %v862_v47 }
  0xe3   : > { %v1408_v4 = vpop.f32.mrf.mxu0 }
  0xe4   : > { %v1428_v43 = vadd.f32 %v1408_v4, %v1182_v59  ;;  %v1183_v11 = vadd.f32 %v1164_v55, %v1049_v63  ;;  %v3632_v55 = vld [vmem:[%s3674_s4] ss:$0 sm:$0xff] }
  0xe5   : > { %v1038_v2 = vpop.f32.mrf.mxu2  ;;  %v1169_v10 = vpop.f32.mrf.mxu3 }
  0xe7   : > { %v864_v40 = vpop.f32.mrf.mxu1 }
  0xe8   : > { %v865_v3 = vadd.f32 %v864_v40, %v763_v32 }
  0xea   : > { %v1050_v50 = vadd.f32 %v1033_v29, %v865_v3 }
  0xeb   : > { %v1410_v31 = vpop.f32.mrf.mxu0 }
  0xec   : > { %v1184_v5 = vadd.f32 %v1167_v61, %v1050_v50 }
  0xed   : > { %v1040_v48 = vpop.f32.mrf.mxu2  ;;  %v1172_v54 = vpop.f32.mrf.mxu3 }
  0xef   : > { %v866_v7 = vpop.f32.mrf.mxu1 }
  0xf0   : > { %v867_v12 = vadd.f32 %v866_v7, %v765_v58 }
  0xf2   : > { %v1051_v13 = vadd.f32 %v1035_v60, %v867_v12 }
  0xf3   : > { %v1413_v15 = vpop.f32.mrf.mxu0 }
  0xf4   : > { %v1430_v18 = vadd.f32 %v1413_v15, %v1184_v5  ;;  %v1185_v47 = vadd.f32 %v1169_v10, %v1051_v13 }
  0xf5   : > { %v1043_v0 = vpop.f32.mrf.mxu2  ;;  %v3610_v6 = vpop.f32.mrf.mxu3 }
  0xf7   : > { %v869_v19 = vpop.f32.mrf.mxu1 }
  0xf8   : > { %v870_v24 = vadd.f32 %v869_v19, %v3592_v17 }
  0xfa   : > { %v1052_v22 = vadd.f32 %v1038_v2, %v870_v24 }
  0xfb   : > { %v1415_v9 = vpop.f32.mrf.mxu0 }
  0xfc   : > { %v1186_v36 = vadd.f32 %v1172_v54, %v1052_v22  ;;  %v1431_v3 = vadd.f32 %v1415_v9, %v1185_v47 }
  0xfd   : > { %v1045_v21 = vpop.f32.mrf.mxu2  ;;  %v3613_v23 = vpop.f32.mrf.mxu3 }
  0xff   : > { %v871_v1 = vpop.f32.mrf.mxu1 }
 0x100   : > { %v872_v30 = vadd.f32 %v871_v1, %v770_v39 }
 0x102   : > { %v3615_v35 = vadd.f32 %v1040_v48, %v872_v30 }
 0x103   : > { %v1418_v14 = vpop.f32.mrf.mxu0 }
 0x104   : > { %v3617_v45 = vadd.f32 %v1418_v14, %v1186_v36 }
 0x105   : > { %v1717_v41 = vpop.f32.mrf.mxu2  ;;  %v3619_v37 = vpop.f32.mrf.mxu3 }
 0x107   : > { %v874_v38 = vpop.f32.mrf.mxu1 }
 0x108   : > { %v875_v16 = vadd.f32 %v874_v38, %v773_v26  ;;  %v1429_v26 = vadd.f32 %v1410_v31, %v1183_v11  ;;  %v1187_v38 = vadd.f32 %v3610_v6, %v3615_v35 }
 0x10a   : > { %v3621_v42 = vadd.f32 %v1043_v0, %v875_v16 }
 0x10b   : > { %v1420_v17 = vpop.f32.mrf.mxu0 }
 0x10c   : > { %v1188_v6 = vadd.f32 %v3613_v23, %v3621_v42 }
 0x10d   : > { %v1719_v25 = vpop.f32.mrf.mxu2  ;;  %v1963_v44 = vpop.f32.mrf.mxu3 }
 0x10f   : > { %v876_v28 = vpop.f32.mrf.mxu1 }
 0x110   : > { %v877_v46 = vadd.f32 %v876_v28, %v775_v34  ;;  %v1433_v28 = vadd.f32 %v1420_v17, %v1187_v38 }
 0x112   : > { %v3623_v8 = vadd.f32 %v1045_v21, %v877_v46 }
 0x113   : > { %v3625_v39 = vpop.f32.mrf.mxu0 }
 0x115   : > { %v1722_v27 = vpop.f32.mrf.mxu2  ;;  %v1965_v51 = vpop.f32.mrf.mxu3 }
 0x117   : > { %v1582_v49 = vpop.f32.mrf.mxu1 }
 0x118   : > { %v1602_v33 = vadd.f32 %v1582_v49, %v1428_v43 }
 0x11a   : > { %v1737_v20 = vadd.f32 %v1717_v41, %v1602_v33 }
 0x11b   : > { %v3627_v52 = vpop.f32.mrf.mxu0 }
 0x11c   : > { %v1983_v34 = vadd.f32 %v1963_v44, %v1737_v20 }
 0x11d   : > { %v1724_v53 = vpop.f32.mrf.mxu2  ;;  %v1968_v57 = vpop.f32.mrf.mxu3 }
 0x11f   : > { %v1584_v32 = vpop.f32.mrf.mxu1 }
 0x120   : > { %v1603_v29 = vadd.f32 %v1584_v32, %v1429_v26 }
 0x122   : > { %v1738_v58 = vadd.f32 %v1719_v25, %v1603_v29 }
 0x123   : > { %v2137_v56 = vpop.f32.mrf.mxu0 }
 0x124   : > { %v1984_v61 = vadd.f32 %v1965_v51, %v1738_v58  ;;  %v2157_v4 = vadd.f32 %v2137_v56, %v1983_v34 }
 0x125   : > { %v1727_v59 = vpop.f32.mrf.mxu2  ;;  %v1970_v40 = vpop.f32.mrf.mxu3 }
 0x126   : > { %v2178_v50 = vmul.f32 %v2157_v4, %v2157_v4  ;;  %v2206_v31 = vadd.f32 %v3632_v55, %v2157_v4 }
 0x127   : > { %v1587_v60 = vpop.f32.mrf.mxu1 }
 0x128   : > { %v1604_v62 = vadd.f32 %v1587_v60, %v1430_v18 }
 0x12a   : > { %v1739_v2 = vadd.f32 %v1722_v27, %v1604_v62 }
 0x12b   : > { %v2139_v63 = vpop.f32.mrf.mxu0 }
 0x12c   : > { %v2158_v43 = vadd.f32 %v2139_v63, %v1984_v61  ;;  %v1985_v15 = vadd.f32 %v1968_v57, %v1739_v2  ;;  %v1434_v57 = vadd.f32 %v3625_v39, %v1188_v6 }
 0x12d   : > { %v1729_v7 = vpop.f32.mrf.mxu2  ;;  %v1973_v36 = vpop.f32.mrf.mxu3 }
 0x12e   : > { %v2165_v5 = vadd.f32 %v2158_v43, %v2157_v4  ;;  %v2179_v48 = vmul.f32 %v2158_v43, %v2158_v43  ;;  %v2207_v54 = vadd.f32 %v3632_v55, %v2158_v43  ;;  %v1189_v4 = vadd.f32 %v3619_v37, %v3623_v8 }
 0x12f   : > { %v1589_v10 = vpop.f32.mrf.mxu1 }
 0x130   : > { %v2186_v12 = vadd.f32 %v2179_v48, %v2178_v50  ;;  %v2921_v13 = vpack.c.bf16 %v2207_v54, %v2206_v31  ;;  %v1605_v18 = vadd.f32 %v1589_v10, %v1431_v3  ;;  %v1435_v31 = vadd.f32 %v3627_v52, %v1189_v4 }
 0x132   : > { %2922 = vst [vmem:[%s3641_s7] sm:$0xff] %v2921_v13   ;;  %v1740_v24 = vadd.f32 %v1724_v53, %v1605_v18 }
 0x133   : > { %v2142_v0 = vpop.f32.mrf.mxu0 }
 0x134   : > { %v2159_v19 = vadd.f32 %v2142_v0, %v1985_v15  ;;  %v1986_v14 = vadd.f32 %v1970_v40, %v1740_v24 }
 0x135   : > { %v1732_v30 = vpop.f32.mrf.mxu2  ;;  %v1975_v26 = vpop.f32.mrf.mxu3 }
 0x136   : > { %v2166_v22 = vadd.f32 %v2165_v5, %v2159_v19  ;;  %v2180_v9 = vmul.f32 %v2159_v19, %v2159_v19  ;;  %v2208_v46 = vadd.f32 %v3632_v55, %v2159_v19 }
 0x137   : > { %v1592_v21 = vpop.f32.mrf.mxu1 }
 0x138   : > { %v2187_v1 = vadd.f32 %v2186_v12, %v2180_v9  ;;  %v1606_v41 = vadd.f32 %v1592_v21, %v3617_v45 }
 0x13a   : > { %v1741_v44 = vadd.f32 %v1727_v59, %v1606_v41 }
 0x13b   : > { %v2144_v16 = vpop.f32.mrf.mxu0 }
 0x13c   : > { %v2160_v25 = vadd.f32 %v2144_v16, %v1986_v14  ;;  %v1987_v32 = vadd.f32 %v1973_v36, %v1741_v44 }
 0x13d   : > { %v1734_v35 = vpop.f32.mrf.mxu2  ;;  %v1978_v62 = vpop.f32.mrf.mxu3 }
 0x13e   : > { %v2167_v27 = vadd.f32 %v2166_v22, %v2160_v25  ;;  %v2181_v49 = vmul.f32 %v2160_v25, %v2160_v25  ;;  %v2209_v51 = vadd.f32 %v3632_v55, %v2160_v25 }
 0x13f   : > { %v1594_v11 = vpop.f32.mrf.mxu1 }
 0x140   : > { %v2188_v33 = vadd.f32 %v2187_v1, %v2181_v49  ;;  %v2926_v53 = vpack.c.bf16 %v2209_v51, %v2208_v46  ;;  %v1607_v45 = vadd.f32 %v1594_v11, %v1433_v28 }
 0x142   : > { %2941 = vst [vmem:[%s3641_s7 + $0x8] sm:$0xff] %v2926_v53   ;;  %v1742_v17 = vadd.f32 %v1729_v7, %v1607_v45 }
 0x143   : > { %v2147_v29 = vpop.f32.mrf.mxu0 }
 0x144   : > { %v2161_v20 = vadd.f32 %v2147_v29, %v1987_v32  ;;  %v1988_v60 = vadd.f32 %v1975_v26, %v1742_v17 }
 0x145   : > { %v2152_v42 = vpop.f32.mrf.mxu2  ;;  %v1980_v13 = vpop.f32.mrf.mxu3 }
 0x146   : > { %v2168_v56 = vadd.f32 %v2167_v27, %v2161_v20  ;;  %v2182_v58 = vmul.f32 %v2161_v20, %v2161_v20  ;;  %v2210_v2 = vadd.f32 %v3632_v55, %v2161_v20 }
 0x147   : > { %v1597_v34 = vpop.f32.mrf.mxu1 }
 0x148   : > { %v2189_v59 = vadd.f32 %v2188_v33, %v2182_v58  ;;  %v1608_v61 = vadd.f32 %v1597_v34, %v1434_v57 }
 0x14a   : > { %v1743_v47 = vadd.f32 %v1732_v30, %v1608_v61 }
 0x14b   : > { %v2149_v63 = vpop.f32.mrf.mxu0 }
 0x14c   : > { %v2162_v23 = vadd.f32 %v2149_v63, %v1988_v60  ;;  %v1989_v43 = vadd.f32 %v1978_v62, %v1743_v47 }
 0x14d   : > { %v2154_v18 = vpop.f32.mrf.mxu2 }
 0x14e   : > { %v2169_v40 = vadd.f32 %v2168_v56, %v2162_v23  ;;  %v2183_v39 = vmul.f32 %v2162_v23, %v2162_v23  ;;  %v2211_v3 = vadd.f32 %v3632_v55, %v2162_v23  ;;  %v2163_v50 = vadd.f32 %v2152_v42, %v1989_v43 }
 0x14f   : > { %v1599_v5 = vpop.f32.mrf.mxu1 }
 0x150   : > { %v2190_v48 = vadd.f32 %v2189_v59, %v2183_v39  ;;  %v2931_v54 = vpack.c.bf16 %v2211_v3, %v2210_v2  ;;  %v2170_v7 = vadd.f32 %v2169_v40, %v2163_v50  ;;  %v2184_v10 = vmul.f32 %v2163_v50, %v2163_v50 }
 0x151   : > { %v1609_v37 = vadd.f32 %v1599_v5, %v1435_v31  ;;  %v2212_v19 = vadd.f32 %v3632_v55, %v2163_v50 }
 0x152   : > { %2942 = vst [vmem:[%s3641_s7 + $0x10] sm:$0xff] %v2931_v54   ;;  %v2191_v8 = vadd.f32 %v2190_v48, %v2184_v10 }
 0x153   : > { %v1744_v12 = vadd.f32 %v1734_v35, %v1609_v37 }
 0x155   : > { %v1990_v15 = vadd.f32 %v1980_v13, %v1744_v12 }
 0x157   : > { %v2164_v0 = vadd.f32 %v2154_v18, %v1990_v15 }
 0x159   : > { %v2171_v24 = vadd.f32 %v2170_v7, %v2164_v0  ;;  %v2185_v22 = vmul.f32 %v2164_v0, %v2164_v0  ;;  %v2213_v52 = vadd.f32 %v3632_v55, %v2164_v0 }
 0x15b   : > { %v2172_v9 = vrot.slane %v2171_v24, 4  ;;  %v2192_v36 = vadd.f32 %v2191_v8, %v2185_v22  ;;  %v2936_v21 = vpack.c.bf16 %v2213_v52, %v2212_v19 }
 0x15d   : > { %v2173_v1 = vadd.f32 %v2172_v9, %v2171_v24  ;;  %v2193_v30 = vrot.slane %v2192_v36, 4  ;;  %2943 = vst [vmem:[%s3641_s7 + $0x18] sm:$0xff] %v2936_v21  }
 0x15f   : > { %v2174_v14 = vrot.slane %v2173_v1, 2  ;;  %v2194_v41 = vadd.f32 %v2193_v30, %v2192_v36 }
 0x161   : > { %v2175_v38 = vadd.f32 %v2174_v14, %v2173_v1  ;;  %v2195_v16 = vrot.slane %v2194_v41, 2 }
 0x163   : > { %v2176_v25 = vrot.slane %v2175_v38, 1  ;;  %v2196_v44 = vadd.f32 %v2195_v16, %v2194_v41 }
 0x165   : > { %v2197_v28 = vrot.slane %v2196_v44, 1  ;;  %v2177_v46 = vadd.f32 %v2176_v25, %v2175_v38 }
 0x167   : > { %v2198_v55 = vadd.f32 %v2197_v28, %v2196_v44 }
 0x169   : > { %v2200_v27 = vsel %vm317_vm0, %v2177_v46, %v2198_v55 }
 0x16a   : > { %2201 = vst [vmem:[%s262_s10] sm:$0x3] %v2200_v27 }
 0x16b PF: > { %s17_s21 = sadd.s32 1, %s2978_s21  }
 0x16c   : > { %p14_p4 = scmp.ge.s32.totalorder %s17_s21, 4  }
 0x16e   :  { %16 = sbr.rel (!%p14_p4) target bundleno = 1 (0x1), region = 93 }

// kernel: down_forward.3
= control target key start
LH: loop header
LB: loop body
LE: loop exit
PB: predicated region body
PF: predicated region fallthrough
CT: control target
= control target key end

     0   :  { %s2939_s15 = smov 0   ;;  %s3574_s0 = inlined_call_operand.vmem [shape: f32[2,8,2,8,256], index: 0, kind: input, shape index: {}]   ;;  %s3575_s1 = inlined_call_operand.vmem [shape: bf16[9,128,128], index: 1, kind: input, shape index: {}]   ;;  %s3576_s2 = inlined_call_operand.vmem [shape: f32[1,128], index: 2, kind: input, shape index: {}]   ;;  %s3577_s3 = inlined_call_operand.vmem [shape: bf16[2,8,8,128], index: 3, kind: output, shape index: {0}]   ;;  %s3578_s4 = inlined_call_operand.vmem [shape: f32[2,2,128], index: 4, kind: output, shape index: {1}]  }
   0x1 LB: > { %s2270_s16 = sadd.s32 4294967295, %s2911_s15   ;;  %p2274_p0 = scmp.ge.s32.totalorder %s2911_s15, 1  ;;  %s2911_s15 = sphi %s2939_s15, %s15_s15  }
   0x2   : > { %p165_p1 = scmp.lt.s32.totalorder %s2911_s15, 3 }
   0x4   : > { %p166_p2 = pnand %p2274_p0, %p165_p1 }
   0x5   : > { %p195_p3 = scmp.lt.s32.totalorder (!%p166_p2), %s2270_s16, 1 }
   0x6   : > { %169 = sbr.rel (%p166_p2) target bundleno = 366 (0x16e), region = 32 }
   0xb   : > { %v2791_v0 = vld [vmem:[%s3575_s1 + $0x78] sm:$0xff]  ;;  %v2790_v2 = vld [vmem:[%s3575_s1 + $0x70] sm:$0xff]  ;;  %s3590_s16 = smov (!%p195_p3, %s2270_s16), 1  ;;  %vm271_vm0 = vcmask 1040384   ;;  %vm272_vm1 = vsmask.f32 256 }
   0xc   : > { %v2799_v1 = vld [vmem:[%s3575_s1 + $0xb8] sm:$0xff]  ;;  %2879 = vmatpush.bf16.msra.mxu1 %v2791_v0  ;;  %703 = vmatpush.bf16.msra.mxu0 %v2791_v0  ;;  %v2798_v3 = vld [vmem:[%s3575_s1 + $0xb0] sm:$0xff]  ;;  %v2789_v5 = vld [vmem:[%s3575_s1 + $0x68] sm:$0xff]  ;;  %s2770_s29 = sshll.u32 %s3590_s16, 8  ;;  %vm304_vm3 = vsmask.f32 7938 }
   0xd   : > { %973 = vmatpush.bf16.msra.mxu2 %v2799_v1  ;;  %v2811_v4 = vld [vmem:[%s3575_s1 + $0xf8] sm:$0xff]  ;;  %v2797_v6 = vld [vmem:[%s3575_s1 + $0xa8] sm:$0xff]  ;;  %v2810_v7 = vld [vmem:[%s3575_s1 + $0xf0] sm:$0xff]  ;;  %s2977_s10 = scalar_lea.vmem %s3574_s0, %s2770_s29  ;;  %v2913_v9 = vmov 0   ;;  %vm425_vm5 = vcmask 1043456   ;;  %vm857_vm9 = vcmask 1042432  }
   0xe   : > { %1107 = vmatpush.bf16.msra.mxu3 %v2811_v4  ;;  %vm2980_vm2 = vmand %vm271_vm0, %vm272_vm1  ;;  %266 = vst [vmem:[#allocation2] sm:$0xf] %v2913_v9  ;;  %v222_v10 = vld [vmem:[%s2977_s10 + $0x60] sm:$0xff]  ;;  %v223_v11 = vld [vmem:[%s2977_s10 + $0x68] sm:$0xff]  ;;  %vm507_vm7 = vsmask.f32 3328 }
   0xf   : > { %v224_v12 = vld [vmem:[%s2977_s10 + $0x70] sm:$0xff]  ;;  %267 = vst [vmem:[#allocation2 + $0x4] sm:$0x1] %v2913_v9  ;;  %v2809_v13 = vld [vmem:[%s3575_s1 + $0xe8] sm:$0xff]  ;;  %v225_v14 = vld [vmem:[%s2977_s10 + $0x78] sm:$0xff]  ;;  %vm858_vm10 = vcmask 1046532  }
  0x10   : > { %2880 = vmatpush.bf16.msra.mxu1 %v2790_v2  ;;  %704 = vmatpush.bf16.msra.mxu0 %v2790_v2  ;;  %v226_v15 = vld [vmem:[%s2977_s10 + $0x80] sm:$0xff]  ;;  %v227_v16 = vld [vmem:[%s2977_s10 + $0x88] sm:$0xff]  ;;  %v248_v17 = vmax.f32 %v222_v10, %v224_v12  ;;  %269 = vst [vmem:[#allocation2 + $0x48] sm:$0xf] %v2913_v9  ;;  %v228_v19 = vld [vmem:[%s2977_s10 + $0x90] sm:$0xff]  ;;  %v249_v21 = vmax.f32 %v223_v11, %v225_v14  ;;  %s2771_s26 = sshll.u32 %s3590_s16, 5 }
  0x11   : > { %974 = vmatpush.bf16.msra.mxu2 %v2798_v3  ;;  %v2788_v18 = vld [vmem:[%s3575_s1 + $0x60] sm:$0xff]  ;;  %v229_v20 = vld [vmem:[%s2977_s10 + $0x98] sm:$0xff]  ;;  %270 = vst [vmem:[#allocation2 + $0x4c] sm:$0x1] %v2913_v9  ;;  %v250_v23 = vmax.f32 %v226_v15, %v228_v19  ;;  %v289_v26 = vld [vmem:[#allocation2 + $0x28] sm:$0x1]  ;;  %s3544_s29 = scalar_lea.vmem %s3577_s3, %s2771_s26 }
  0x12   : > { %v286_v22 = vld [vmem:[#allocation2 + $0x20] sm:$0x1]  ;;  %1108 = vmatpush.bf16.msra.mxu3 %v2810_v7  ;;  %v251_v24 = vmax.f32 %v227_v16, %v229_v20  ;;  %vm3002_vm4 = vmand %vm271_vm0, %vm304_vm3  ;;  %v318_v28 = vld [vmem:[#allocation2 + $0x24] sm:$0x1]  ;;  %v261_v29 = vmax.f32 %v248_v17, %v249_v21  ;;  %v290_v30 = vsel %vm2980_vm2, 0, %v289_v26  ;;  %s2279_s30 = sshll.u32 %s3590_s16, 1 }
  0x13   : > { %v287_v25 = vsel %vm2980_vm2, 0, %v286_v22  ;;  %v319_v31 = vsel %vm3002_vm4, 0, %v318_v28  ;;  %v321_v32 = vld [vmem:[#allocation2 + $0x2c] sm:$0x1]  ;;  %v2796_v33 = vld [vmem:[%s3575_s1 + $0xa0] sm:$0xff]  ;;  %v212_v41 = vld [vmem:[%s2977_s10 + $0x10] sm:$0xff]  ;;  %s208_s7 = scalar_lea.vmem %s3578_s4, %s2279_s30 }
  0x14   : > { %2881 = vmatpush.bf16.msra.mxu1 %v2789_v5  ;;  %705 = vmatpush.bf16.msra.mxu0 %v2789_v5  ;;  %288 = vst [vmem:[#allocation2 + $0x20] sm:$0x1] %v287_v25  ;;  %v262_v34 = vmax.f32 %v250_v23, %v251_v24  ;;  %v322_v35 = vsel %vm3002_vm4, 0, %v321_v32  ;;  %v339_v36 = vpack.c.bf16 %v261_v29, %v261_v29  ;;  %v2808_v37 = vld [vmem:[%s3575_s1 + $0xe0] sm:$0xff]  ;;  %v211_v40 = vld [vmem:[%s2977_s10 + $0x8] sm:$0xff]  ;;  %v2787_v42 = vld [vmem:[%s3575_s1 + $0x58] sm:$0xff] }
  0x15   : > { %975 = vmatpush.bf16.msra.mxu2 %v2797_v6  ;;  %291 = vst [vmem:[#allocation2 + $0x28] sm:$0x1] %v290_v30  ;;  %v210_v39 = vld [vmem:[%s2977_s10] sm:$0xff]  ;;  %v213_v45 = vld [vmem:[%s2977_s10 + $0x18] sm:$0xff]  ;;  %v277_v53 = vld [vmem:[#allocation2 + $0x8] sm:$0x1] }
  0x16   : > { %320 = vst [vmem:[#allocation2 + $0x24] sm:$0x1] %v319_v31  ;;  %1109 = vmatpush.bf16.msra.mxu3 %v2809_v13  ;;  %v340_v38 = vpack.c.bf16 %v262_v34, %v262_v34  ;;  %v369_v43 = vshrl.u32 %v339_v36, 16  ;;  %v372_v44 = vshll.u32 %v339_v36, 16  ;;  %v242_v46 = vmax.f32 %v210_v39, %v212_v41  ;;  %v274_v47 = vld [vmem:[#allocation2] sm:$0x1]  ;;  %vm3037_vm6 = vmand %vm425_vm5, %vm304_vm3 }
  0x17   : > { %323 = vst [vmem:[#allocation2 + $0x2c] sm:$0x1] %v322_v35  ;;  %v2795_v48 = vld [vmem:[%s3575_s1 + $0x98] sm:$0xff]  ;;  %v243_v51 = vmax.f32 %v211_v40, %v213_v45  ;;  %v275_v52 = vsel %vm2980_vm2, 0, %v274_v47  ;;  %v2786_v54 = vld [vmem:[%s3575_s1 + $0x50] sm:$0xff]  ;;  %v278_v56 = vsel %vm2980_vm2, 0, %v277_v53  ;;  %vm3109_vm11 = vmor %vm857_vm9, %vm858_vm10 }
  0x18   : > { %2882 = vmatpush.bf16.msra.mxu1 %v2788_v18  ;;  %706 = vmatpush.bf16.msra.mxu0 %v2788_v18  ;;  %v377_v49 = vshrl.u32 %v340_v38, 16  ;;  %v380_v50 = vshll.u32 %v340_v38, 16  ;;  %v371_v55 = vrot.slane %v369_v43, 7  ;;  %276 = vst [vmem:[#allocation2] sm:$0x1] %v275_v52  ;;  %v2807_v2 = vld [vmem:[%s3575_s1 + $0xd8] sm:$0xff] }
  0x19   : > { %976 = vmatpush.bf16.msra.mxu2 %v2796_v33  ;;  %v306_v57 = vld [vmem:[#allocation2 + $0x4] sm:$0x1]  ;;  %v258_v61 = vmax.f32 %v242_v46, %v243_v51  ;;  %279 = vst [vmem:[#allocation2 + $0x8] sm:$0x1] %v278_v56  ;;  %v2794_v3 = vld [vmem:[%s3575_s1 + $0x90] sm:$0xff]  ;;  %v2785_v10 = vld [vmem:[%s3575_s1 + $0x48] sm:$0xff] }
  0x1a   : > { %v379_v58 = vrot.slane %v377_v49, 7  ;;  %1110 = vmatpush.bf16.msra.mxu3 %v2808_v37  ;;  %v307_v62 = vsel %vm3002_vm4, 0, %v306_v57  ;;  %v374_v63 = vor.u32 %v372_v44, %v371_v55  ;;  %v375_v0 = vrot.slane %v371_v55, 4  ;;  %v309_v7 = vld [vmem:[#allocation2 + $0xc] sm:$0x1]  ;;  %v2806_v20 = vld [vmem:[%s3575_s1 + $0xd0] sm:$0xff] }
  0x1b   : > { %v445_v60 = vld [vmem:[#allocation2 + $0x20] sm:$0xf]  ;;  %308 = vst [vmem:[#allocation2 + $0x4] sm:$0x1] %v307_v62  ;;  %v336_v9 = vpack.c.bf16 %v258_v61, %v258_v61  ;;  %v2793_v17 = vld [vmem:[%s3575_s1 + $0x88] sm:$0xff]  ;;  %v310_v21 = vsel %vm3002_vm4, 0, %v309_v7 }
  0x1c   : > { %2883 = vmatpush.bf16.msra.mxu1 %v2787_v42  ;;  %707 = vmatpush.bf16.msra.mxu0 %v2787_v42  ;;  %v451_v1 = vld [vmem:[#allocation2 + $0x28] sm:$0xf]  ;;  %v382_v4 = vor.u32 %v380_v50, %v379_v58  ;;  %v383_v5 = vrot.slane %v379_v58, 4  ;;  %v446_v11 = vsel %vm3037_vm6, %v374_v63, %v445_v60  ;;  %v3056_v14 = vld [vmem:[#allocation2] sm:$0xe]  ;;  %v2783_v31 = vld [vmem:[%s3575_s1 + $0x38] sm:$0xff] }
  0x1d   : > { %977 = vmatpush.bf16.msra.mxu2 %v2795_v48  ;;  %v448_v6 = vld [vmem:[#allocation2 + $0x24] sm:$0x1]  ;;  %447 = vst [vmem:[#allocation2 + $0x20] sm:$0xf] %v446_v11  ;;  %v345_v18 = vshrl.u32 %v336_v9, 16  ;;  %v348_v19 = vshll.u32 %v336_v9, 16 }
  0x1e   : > { %v449_v12 = vsel %vm2980_vm2, %v375_v0, %v448_v6  ;;  %v454_v13 = vld [vmem:[#allocation2 + $0x2c] sm:$0x1]  ;;  %v452_v15 = vsel %vm3037_vm6, %v382_v4, %v451_v1  ;;  %1111 = vmatpush.bf16.msra.mxu3 %v2807_v2  ;;  %vm508_vm8 = vsmask.f32 7440  ;;  %v230_v22 = vld [vmem:[%s2977_s10 + $0xa0] sm:$0xff]  ;;  %v2376_v25 = vrot.slane %v3056_v14, 9 }
  0x1f   : > { %v455_v16 = vsel %vm2980_vm2, %v383_v5, %v454_v13  ;;  %450 = vst [vmem:[#allocation2 + $0x24] sm:$0x1] %v449_v12  ;;  %v3071_v23 = vrot.slane %v345_v18, 7  ;;  %v475_v24 = vld [vmem:[#allocation2] sm:$0xf]  ;;  %v2805_v35 = vld [vmem:[%s3575_s1 + $0xc8] sm:$0xff]  ;;  %vm3130_vm12 = vmor %vm507_vm7, %vm508_vm8 }
  0x20   : > { %2884 = vmatpush.bf16.msra.mxu1 %v2786_v54  ;;  %708 = vmatpush.bf16.msra.mxu0 %v2786_v54  ;;  %453 = vst [vmem:[#allocation2 + $0x28] sm:$0xf] %v452_v15  ;;  %v2784_v26 = vld [vmem:[%s3575_s1 + $0x40] sm:$0xff]  ;;  %v427_v28 = vld [vmem:[#allocation2 + $0x8] sm:$0xf]  ;;  %v511_v29 = vshrl.u32 %v475_v24, 16 }
  0x21   : > { %978 = vmatpush.bf16.msra.mxu2 %v2794_v3  ;;  %456 = vst [vmem:[#allocation2 + $0x2c] sm:$0x1] %v455_v16  ;;  %v514_v30 = vshll.u32 %v475_v24, 16  ;;  %v2792_v32 = vld [vmem:[%s3575_s1 + $0x80] sm:$0xff]  ;;  %v350_v33 = vor.u32 %v348_v19, %v3071_v23  ;;  %v231_v36 = vld [vmem:[%s2977_s10 + $0xa8] sm:$0xff]  ;;  %v351_v37 = vrot.slane %v3071_v23, 4 }
  0x22   : > { %311 = vst [vmem:[#allocation2 + $0xc] sm:$0x1] %v310_v21  ;;  %v499_v34 = vld [vmem:[#allocation2 + $0x4] sm:$0x1]  ;;  %1112 = vmatpush.bf16.msra.mxu3 %v2806_v20  ;;  %v513_v38 = vrot.slane %v511_v29, 4  ;;  %v2819_v41 = vld [vmem:[%s3575_s1 + $0x138] sm:$0xff] }
  0x23   : > { %v516_v39 = vrot.slane %v514_v30, 5  ;;  %v520_v40 = vshll.u32 %v499_v34, 16  ;;  %v232_v42 = vld [vmem:[%s2977_s10 + $0xb0] sm:$0xff]  ;;  %v233_v43 = vld [vmem:[%s2977_s10 + $0xb8] sm:$0xff]  ;;  %v428_v44 = vsel %vm3037_vm6, %v350_v33, %v427_v28  ;;  %v862_v45 = vrot.slane %v499_v34, 5  ;;  %v234_v46 = vld [vmem:[%s2977_s10 + $0xc0] sm:$0xff] }
  0x24   : > { %2885 = vmatpush.bf16.msra.mxu1 %v2785_v10  ;;  %709 = vmatpush.bf16.msra.mxu0 %v2785_v10  ;;  %v235_v47 = vld [vmem:[%s2977_s10 + $0xc8] sm:$0xff]  ;;  %v236_v48 = vld [vmem:[%s2977_s10 + $0xd0] sm:$0xff]  ;;  %v252_v49 = vmax.f32 %v230_v22, %v232_v42  ;;  %v253_v50 = vmax.f32 %v231_v36, %v233_v43  ;;  %v479_v51 = vld [vmem:[#allocation2 + $0x20] sm:$0xf]  ;;  %429 = vst [vmem:[#allocation2 + $0x8] sm:$0xf] %v428_v44 }
  0x25   : > { %979 = vmatpush.bf16.msra.mxu2 %v2793_v17  ;;  %v517_v52 = vor.u32 %v516_v39, %v513_v38  ;;  %v3099_v53 = vrot.slane %v520_v40, 5  ;;  %v237_v54 = vld [vmem:[%s2977_s10 + $0xd8] sm:$0xff]  ;;  %v254_v55 = vmax.f32 %v234_v46, %v236_v48  ;;  %v567_v57 = vshrl.u32 %v479_v51, 16  ;;  %v2782_v60 = vld [vmem:[%s3575_s1 + $0x30] sm:$0xff]  ;;  %v2781_v14 = vld [vmem:[%s3575_s1 + $0x28] sm:$0xff] }
  0x26   : > { %v3102_v56 = vld [vmem:[#allocation2 + $0x24] sm:$0x1]  ;;  %v570_v58 = vshll.u32 %v479_v51, 16  ;;  %1113 = vmatpush.bf16.msra.mxu3 %v2805_v35  ;;  %v255_v62 = vmax.f32 %v235_v47, %v237_v54  ;;  %v292_v63 = vld [vmem:[#allocation2 + $0x30] sm:$0x1]  ;;  %v263_v4 = vmax.f32 %v252_v49, %v253_v50  ;;  %v3126_v16 = vsel %vm3109_vm11, %v2376_v25, %v862_v45  ;;  %v2817_v28 = vld [vmem:[%s3575_s1 + $0x128] sm:$0xff] }
  0x27   : > { %v480_v0 = vld [vmem:[#allocation2 + $0x28] sm:$0xf]  ;;  %v576_v1 = vshll.u32 %v3102_v56, 16  ;;  %v518_v2 = vrot.slane %v517_v52, 4  ;;  %v2818_v3 = vld [vmem:[%s3575_s1 + $0x130] sm:$0xff]  ;;  %v293_v5 = vsel %vm2980_vm2, 0, %v292_v63 }
  0x28   : > { %2886 = vmatpush.bf16.msra.mxu1 %v2784_v26  ;;  %710 = vmatpush.bf16.msra.mxu0 %v2784_v26  ;;  %v3119_v6 = vld [vmem:[#allocation2 + $0x2c] sm:$0x1]  ;;  %v569_v7 = vrot.slane %v567_v57, 4  ;;  %v572_v9 = vrot.slane %v570_v58, 5  ;;  %v581_v10 = vshrl.u32 %v480_v0, 16  ;;  %v584_v11 = vshll.u32 %v480_v0, 16 }
  0x29   : > { %980 = vmatpush.bf16.msra.mxu2 %v2792_v32  ;;  %v578_v12 = vrot.slane %v576_v1, 5  ;;  %v590_v13 = vshll.u32 %v3119_v6, 16  ;;  %v430_v15 = vld [vmem:[#allocation2 + $0xc] sm:$0x1]  ;;  %v264_v17 = vmax.f32 %v254_v55, %v255_v62  ;;  %294 = vst [vmem:[#allocation2 + $0x30] sm:$0x1] %v293_v5  ;;  %v523_v26 = vsel %vm3130_vm12, %v518_v2, %v3099_v53 }
  0x2a   : > { %v573_v19 = vor.u32 %v572_v9, %v569_v7  ;;  %v583_v20 = vrot.slane %v581_v10, 4  ;;  %v586_v21 = vrot.slane %v584_v11, 5  ;;  %v431_v22 = vsel %vm2980_vm2, %v351_v37, %v430_v15  ;;  %v295_v23 = vld [vmem:[#allocation2 + $0x38] sm:$0x1]  ;;  %v324_v24 = vld [vmem:[#allocation2 + $0x34] sm:$0x1] }
  0x2b   : > { %v592_v25 = vrot.slane %v590_v13, 5  ;;  %432 = vst [vmem:[#allocation2 + $0xc] sm:$0x1] %v431_v22  ;;  %v296_v29 = vsel %vm2980_vm2, 0, %v295_v23  ;;  %v325_v30 = vsel %vm3002_vm4, 0, %v324_v24  ;;  %v341_v35 = vpack.c.bf16 %v263_v4, %v263_v4  ;;  %v3152_v37 = vld [vmem:[%s2977_s10 + $0x20] sm:$0xff] }
  0x2c   : > { %804 = vmatpush.bf16.msrb.mxu1 %v2783_v31  ;;  %1353 = vmatpush.bf16.msrb.mxu0 %v2819_v41  ;;  %v574_v31 = vrot.slane %v573_v19, 4  ;;  %v587_v32 = vor.u32 %v586_v21, %v583_v20  ;;  %v476_v33 = vld [vmem:[#allocation2 + $0x8] sm:$0xf]  ;;  %v342_v36 = vpack.c.bf16 %v264_v17, %v264_v17  ;;  %v909_v41 = vunpack.c.l.b16 %v3126_v16  ;;  %297 = vst [vmem:[#allocation2 + $0x38] sm:$0x1] %v296_v29  ;;  %v2839_v42 = vld [vmem:[%s3575_s1 + $0x1b8] sm:$0xff] }
  0x2d   : > { %v3149_v34 = vld [vmem:[#allocation2 + $0x8] sm:$0xe]  ;;  %v525_v38 = vshrl.u32 %v476_v33, 16  ;;  %v528_v39 = vshll.u32 %v476_v33, 16  ;;  %v3161_v45 = vunpack.c.l.b16 %v523_v26  ;;  %v2780_v46 = vld [vmem:[%s3575_s1 + $0x20] sm:$0xff]  ;;  %v385_v48 = vshrl.u32 %v341_v35, 16  ;;  %1662 = vmatpush.bf16.msrb.mxu2 %v2839_v42 }
  0x2e   : > { %v2377_v40 = vrot.slane %v3149_v34, 9  ;;  %v579_v43 = vsel %vm3130_vm12, %v574_v31, %v578_v12  ;;  %v588_v44 = vrot.slane %v587_v32, 4  ;;  %326 = vst [vmem:[#allocation2 + $0x34] sm:$0x1] %v325_v30  ;;  %v327_v47 = vld [vmem:[#allocation2 + $0x3c] sm:$0x1] }
  0x2f   : > { %v643_v49 = vunpack.c.l.b16 %v579_v43  ;;  %v527_v50 = vrot.slane %v525_v38, 4  ;;  %v530_v51 = vrot.slane %v528_v39, 5  ;;  %v328_v52 = vsel %vm3002_vm4, 0, %v327_v47  ;;  %v2804_v53 = vld [vmem:[%s3575_s1 + $0xc0] sm:$0xff]  ;;  %v215_v55 = vld [vmem:[%s2977_s10 + $0x28] sm:$0xff]  ;;  %v216_v63 = vld [vmem:[%s2977_s10 + $0x30] sm:$0xff] }
  0x30   : > { %805 = vmatpush.bf16.msrb.mxu1 %v2782_v60  ;;  %1354 = vmatpush.bf16.msrb.mxu0 %v2818_v3  ;;  %v2816_v54 = vld [vmem:[%s3575_s1 + $0x120] sm:$0xff]  ;;  %v593_v57 = vsel %vm3130_vm12, %v588_v44, %v592_v25  ;;  %329 = vst [vmem:[#allocation2 + $0x3c] sm:$0x1] %v328_v52  ;;  %v387_v58 = vrot.slane %v385_v48, 7  ;;  %v388_v60 = vshll.u32 %v341_v35, 16  ;;  %v393_v62 = vshrl.u32 %v342_v36, 16 }
  0x31   : > { %v644_v0 = vunpack.c.l.b16 %v593_v57  ;;  %v531_v1 = vor.u32 %v530_v51, %v527_v50  ;;  %v396_v2 = vshll.u32 %v342_v36, 16  ;;  %v457_v3 = vld [vmem:[#allocation2 + $0x30] sm:$0xf]  ;;  %1114 = vmatpush.bf16.msra.mxu3 %v2804_v53  ;;  %v217_v4 = vld [vmem:[%s2977_s10 + $0x38] sm:$0xff]  ;;  %v218_v5 = vld [vmem:[%s2977_s10 + $0x40] sm:$0xff]  ;;  %v244_v7 = vmax.f32 %v3152_v37, %v216_v63 }
  0x32   : > { %v500_v9 = vld [vmem:[#allocation2 + $0xc] sm:$0x1]  ;;  %v390_v10 = vor.u32 %v388_v60, %v387_v58  ;;  %v391_v11 = vrot.slane %v387_v58, 4  ;;  %v395_v12 = vrot.slane %v393_v62, 7  ;;  %v220_v15 = vld [vmem:[%s2977_s10 + $0x50] sm:$0xff]  ;;  %v245_v17 = vmax.f32 %v215_v55, %v217_v4  ;;  %v2779_v29 = vld [vmem:[%s3575_s1 + $0x18] sm:$0xff] }
  0x33   : > { %v219_v13 = vld [vmem:[%s2977_s10 + $0x48] sm:$0xff]  ;;  %v649_v19 = vpack.c.b16 %v644_v0, %v643_v49  ;;  %v532_v20 = vrot.slane %v531_v1, 4  ;;  %v534_v21 = vshll.u32 %v500_v9, 16  ;;  %v866_v22 = vrot.slane %v500_v9, 5  ;;  %v280_v23 = vld [vmem:[#allocation2 + $0x10] sm:$0x1] }
  0x34   : > { %806 = vmatpush.bf16.msrb.mxu1 %v2781_v14  ;;  %1355 = vmatpush.bf16.msrb.mxu0 %v2817_v28  ;;  %v221_v14 = vld [vmem:[%s2977_s10 + $0x58] sm:$0xff]  ;;  %v398_v24 = vor.u32 %v396_v2, %v395_v12  ;;  %v399_v25 = vrot.slane %v395_v12, 4  ;;  %v458_v26 = vsel %vm3037_vm6, %v390_v10, %v457_v3  ;;  %v246_v30 = vmax.f32 %v218_v5, %v220_v15  ;;  %v312_v43 = vld [vmem:[#allocation2 + $0x14] sm:$0x1]  ;;  %v2777_v58 = vld [vmem:[%s3575_s1 + $0x8] sm:$0xff] }
  0x35   : > { %v463_v28 = vld [vmem:[#allocation2 + $0x38] sm:$0xf]  ;;  %721 = vmatmul.bf16.vlgmr.msra.gmra.mxu1 %v649_v19  ;;  %v536_v32 = vrot.slane %v534_v21, 5  ;;  %v867_v33 = vsel %vm3109_vm11, %v2377_v40, %v866_v22  ;;  %459 = vst [vmem:[#allocation2 + $0x30] sm:$0xf] %v458_v26  ;;  %v247_v35 = vmax.f32 %v219_v13, %v221_v14  ;;  %v281_v36 = vsel %vm2980_vm2, 0, %v280_v23 }
  0x36   : > { %v283_v31 = vld [vmem:[#allocation2 + $0x18] sm:$0x1]  ;;  %v460_v34 = vld [vmem:[#allocation2 + $0x34] sm:$0x1]  ;;  %v910_v37 = vunpack.c.l.b16 %v867_v33  ;;  %v464_v39 = vsel %vm3037_vm6, %v398_v24, %v463_v28  ;;  %v259_v42 = vmax.f32 %v244_v7, %v245_v17  ;;  %282 = vst [vmem:[#allocation2 + $0x10] sm:$0x1] %v281_v36 }
  0x37   : > { %v461_v38 = vsel %vm2980_vm2, %v391_v11, %v460_v34  ;;  %v315_v44 = vld [vmem:[#allocation2 + $0x1c] sm:$0x1]  ;;  %v537_v40 = vsel %vm3130_vm12, %v532_v20, %v536_v32  ;;  %v260_v47 = vmax.f32 %v246_v30, %v247_v35  ;;  %v284_v48 = vsel %vm2980_vm2, 0, %v283_v31  ;;  %465 = vst [vmem:[#allocation2 + $0x38] sm:$0xf] %v464_v39  ;;  %v2778_v52 = vld [vmem:[%s3575_s1 + $0x10] sm:$0xff] }
  0x38   : > { %807 = vmatpush.bf16.msrb.mxu1 %v2780_v46  ;;  %1356 = vmatpush.bf16.msrb.mxu0 %v2816_v54  ;;  %462 = vst [vmem:[#allocation2 + $0x34] sm:$0x1] %v461_v38  ;;  %v466_v46 = vld [vmem:[#allocation2 + $0x3c] sm:$0x1]  ;;  %v640_v49 = vunpack.c.l.b16 %v537_v40  ;;  %v917_v50 = vpack.c.b16 %v910_v37, %v909_v41  ;;  %v313_v53 = vsel %vm3002_vm4, 0, %v312_v43  ;;  %v316_v54 = vsel %vm3002_vm4, 0, %v315_v44 }
  0x39   : > { %v467_v51 = vsel %vm2980_vm2, %v399_v25, %v466_v46  ;;  %v337_v55 = vpack.c.bf16 %v259_v42, %v259_v42  ;;  %v338_v57 = vpack.c.bf16 %v260_v47, %v260_v47  ;;  %v2815_v16 = vld [vmem:[%s3575_s1 + $0x118] sm:$0xff]  ;;  %285 = vst [vmem:[#allocation2 + $0x18] sm:$0x1] %v284_v48  ;;  %v2838_v60 = vld [vmem:[%s3575_s1 + $0x1b0] sm:$0xff]  ;;  %v2776_v12 = vld [vmem:[%s3575_s1] sm:$0xff] }
  0x3a   : > { %468 = vst [vmem:[#allocation2 + $0x3c] sm:$0x1] %v467_v51  ;;  %v647_v41 = vpack.c.b16 %v640_v49, %v3161_v45  ;;  %981 = vmatmul.bf16.vlgmr.msra.gmra.mxu2 %v917_v50  ;;  %v2814_v1 = vld [vmem:[%s3575_s1 + $0x110] sm:$0xff]  ;;  %v2847_v3 = vld [vmem:[%s3575_s1 + $0x1f8] sm:$0xff]  ;;  %v2813_v21 = vld [vmem:[%s3575_s1 + $0x108] sm:$0xff] }
  0x3b   : > { %314 = vst [vmem:[#allocation2 + $0x14] sm:$0x1] %v313_v53  ;;  %v353_v62 = vshrl.u32 %v337_v55, 16  ;;  %v356_v63 = vshll.u32 %v337_v55, 16  ;;  %v361_v0 = vshrl.u32 %v338_v57, 16  ;;  %v364_v2 = vshll.u32 %v338_v57, 16  ;;  %1663 = vmatpush.bf16.msrb.mxu2 %v2838_v60  ;;  %1908 = vmatpush.bf16.msrb.mxu3 %v2847_v3 }
  0x3c   : > { %808 = vmatpush.bf16.msrb.mxu1 %v2779_v29  ;;  %1357 = vmatpush.bf16.msrb.mxu0 %v2815_v16  ;;  %v481_v45 = vld [vmem:[#allocation2 + $0x30] sm:$0xf]  ;;  %317 = vst [vmem:[#allocation2 + $0x1c] sm:$0x1] %v316_v54  ;;  %v2837_v26 = vld [vmem:[%s3575_s1 + $0x1a8] sm:$0xff]  ;;  %v2827_v33 = vld [vmem:[%s3575_s1 + $0x178] sm:$0xff] }
  0x3d   : > { %711 = vmatmul.bf16.vlgmr.msra.gmra.mxu0 %v647_v41  ;;  %v595_v4 = vshrl.u32 %v481_v45, 16  ;;  %v598_v5 = vshll.u32 %v481_v45, 16  ;;  %v355_v7 = vrot.slane %v353_v62, 7  ;;  %v363_v9 = vrot.slane %v361_v0, 7  ;;  %v433_v11 = vld [vmem:[#allocation2 + $0x10] sm:$0xf] }
  0x3e   : > { %v482_v13 = vld [vmem:[#allocation2 + $0x38] sm:$0xf]  ;;  %v2812_v44 = vld [vmem:[%s3575_s1 + $0x100] sm:$0xff]  ;;  %v1144_v50 = vld [vmem:[#allocation2 + $0x8] sm:$0xf] }
  0x3f   : > { %v3228_v10 = vld [vmem:[#allocation2 + $0x34] sm:$0x1]  ;;  %v597_v15 = vrot.slane %v595_v4, 4  ;;  %v600_v17 = vrot.slane %v598_v5, 5  ;;  %v358_v20 = vor.u32 %v356_v63, %v355_v7  ;;  %v609_v14 = vshrl.u32 %v482_v13, 16  ;;  %1664 = vmatpush.bf16.msrb.mxu2 %v2837_v26 }
  0x40   : > { %809 = vmatpush.bf16.msrb.mxu1 %v2778_v52  ;;  %v604_v19 = vshll.u32 %v3228_v10, 16  ;;  %1358 = vmatpush.bf16.msrb.mxu0 %v2814_v1  ;;  %v612_v23 = vshll.u32 %v482_v13, 16  ;;  %v359_v24 = vrot.slane %v355_v7, 4  ;;  %v366_v25 = vor.u32 %v364_v2, %v363_v9  ;;  %v439_v32 = vld [vmem:[#allocation2 + $0x18] sm:$0xf] }
  0x41   : > { %v3237_v22 = vld [vmem:[#allocation2 + $0x3c] sm:$0x1]  ;;  %v601_v28 = vor.u32 %v600_v17, %v597_v15  ;;  %v367_v31 = vrot.slane %v363_v9, 4  ;;  %v611_v34 = vrot.slane %v609_v14, 4  ;;  %v434_v36 = vsel %vm3037_vm6, %v358_v20, %v433_v11  ;;  %v2450_v53 = vld [vmem:[#allocation2 + $0x8] sm:$0xf] }
  0x42   : > { %v606_v29 = vrot.slane %v604_v19, 5  ;;  %v618_v30 = vshll.u32 %v3237_v22, 16  ;;  %v614_v35 = vrot.slane %v612_v23, 5  ;;  %v436_v37 = vld [vmem:[#allocation2 + $0x14] sm:$0x1]  ;;  %v440_v38 = vsel %vm3037_vm6, %v366_v25, %v439_v32 }
  0x43   : > { %v602_v39 = vrot.slane %v601_v28, 4  ;;  %435 = vst [vmem:[#allocation2 + $0x10] sm:$0xf] %v434_v36  ;;  %v437_v42 = vsel %vm2980_vm2, %v359_v24, %v436_v37  ;;  %v442_v43 = vld [vmem:[#allocation2 + $0x1c] sm:$0x1]  ;;  %v1161_v55 = vshrl.u32 %v1144_v50, 16 }
  0x44   : > { %810 = vmatpush.bf16.msrb.mxu1 %v2777_v58  ;;  %1359 = vmatpush.bf16.msrb.mxu0 %v2813_v21  ;;  %v615_v40 = vor.u32 %v614_v35, %v611_v34  ;;  %v620_v46 = vrot.slane %v618_v30, 5  ;;  %438 = vst [vmem:[#allocation2 + $0x14] sm:$0x1] %v437_v42  ;;  %v443_v47 = vsel %vm2980_vm2, %v367_v31, %v442_v43  ;;  %v1164_v57 = vshll.u32 %v1144_v50, 16  ;;  %v2846_v25 = vld [vmem:[%s3575_s1 + $0x1f0] sm:$0xff]  ;;  %v2836_v31 = vld [vmem:[%s3575_s1 + $0x1a0] sm:$0xff] }
  0x45   : > { %v607_v48 = vsel %vm3130_vm12, %v602_v39, %v606_v29  ;;  %441 = vst [vmem:[#allocation2 + $0x18] sm:$0xf] %v440_v38  ;;  %v1163_v29 = vrot.slane %v1161_v55, 4  ;;  %v2826_v30 = vld [vmem:[%s3575_s1 + $0x170] sm:$0xff]  ;;  %v3274_v36 = vld [vmem:[#allocation2 + $0xc] sm:$0x1]  ;;  %1909 = vmatpush.bf16.msrb.mxu3 %v2846_v25  ;;  %1665 = vmatpush.bf16.msrb.mxu2 %v2836_v31 }
  0x46   : > { %v616_v49 = vrot.slane %v615_v40, 4  ;;  %444 = vst [vmem:[#allocation2 + $0x1c] sm:$0x1] %v443_v47  ;;  %v645_v51 = vunpack.c.l.b16 %v607_v48  ;;  %v837_v37 = vld [vmem:[#allocation2 + $0x20] sm:$0xe]  ;;  %v2845_v38 = vld [vmem:[%s3575_s1 + $0x1e8] sm:$0xff] }
  0x47   : > { %v1166_v42 = vrot.slane %v1164_v57, 5  ;;  %v2825_v40 = vld [vmem:[%s3575_s1 + $0x168] sm:$0xff]  ;;  %v2835_v50 = vld [vmem:[%s3575_s1 + $0x198] sm:$0xff] }
  0x48   : > { %811 = vmatpush.bf16.msrb.mxu1 %v2776_v12  ;;  %1360 = vmatpush.bf16.msrb.mxu0 %v2812_v44  ;;  %v621_v52 = vsel %vm3130_vm12, %v616_v49, %v620_v46  ;;  %v3285_v46 = vld [vmem:[%s3575_s1 + $0x238] sm:$0xff]  ;;  %v838_v55 = vld [vmem:[#allocation2 + $0x28] sm:$0xe] }
  0x49   : > { %v646_v54 = vunpack.c.l.b16 %v621_v52  ;;  %1910 = vmatpush.bf16.msrb.mxu3 %v2845_v38  ;;  %1666 = vmatpush.bf16.msrb.mxu2 %v2835_v50  ;;  %v241_v31 = vld [vmem:[%s2977_s10 + $0xf8] sm:$0xff] }
  0x4a   : > { %v477_v16 = vld [vmem:[#allocation2 + $0x10] sm:$0xf]  ;;  %v2823_v38 = vld [vmem:[%s3575_s1 + $0x158] sm:$0xff] }
  0x4b   : > { %v2800_v41 = vld [vmem:[#allocation2 + $0xc] sm:$0xf0]  ;;  %v650_v60 = vpack.c.b16 %v646_v54, %v645_v51  ;;  %v501_v62 = vld [vmem:[#allocation2 + $0x14] sm:$0x1]  ;;  %v539_v63 = vshrl.u32 %v477_v16, 16  ;;  %v542_v0 = vshll.u32 %v477_v16, 16 }
  0x4c   : > { %1527 = vmatpush.bf16.msra.mxu1 %v2827_v33  ;;  %v835_v58 = vld [vmem:[#allocation2 + $0x10] sm:$0xe]  ;;  %v2451_v1 = vor.u32 %v2800_v41, %v2450_v53  ;;  %v478_v45 = vld [vmem:[#allocation2 + $0x18] sm:$0xf]  ;;  %v548_v2 = vshll.u32 %v501_v62, 16  ;;  %v870_v17 = vrot.slane %v501_v62, 5  ;;  %2082 = vmatpush.bf16.msra.mxu0 %v3285_v46 }
  0x4d   : > { %v836_v3 = vld [vmem:[#allocation2 + $0x18] sm:$0xe]  ;;  %v2378_v4 = vrot.slane %v835_v58, 9  ;;  %726 = vmatmul.bf16.gmra.mxu1 %v650_v60  ;;  %v502_v5 = vld [vmem:[#allocation2 + $0x1c] sm:$0x1]  ;;  %v541_v7 = vrot.slane %v539_v63, 4 }
  0x4e   : > { %v544_v9 = vrot.slane %v542_v0, 5  ;;  %v553_v11 = vshrl.u32 %v478_v45, 16  ;;  %v556_v12 = vshll.u32 %v478_v45, 16  ;;  %1115 = vmatmul.bf16.vlgmr.msra.gmra.mxu3 %v2451_v1  ;;  %v550_v13 = vrot.slane %v548_v2, 5  ;;  %v1146_v24 = vld [vmem:[#allocation2 + $0x10] sm:$0xf] }
  0x4f   : > { %v562_v15 = vshll.u32 %v502_v5, 16  ;;  %v2379_v19 = vrot.slane %v836_v3, 9  ;;  %v874_v23 = vrot.slane %v502_v5, 5  ;;  %v871_v28 = vsel %vm3109_vm11, %v2378_v4, %v870_v17  ;;  %v3289_v49 = vld [vmem:[#allocation2 + $0x14] sm:$0x1] }
  0x50   : > { %v545_v20 = vor.u32 %v544_v9, %v541_v7  ;;  %v555_v21 = vrot.slane %v553_v11, 4  ;;  %v558_v14 = vrot.slane %v556_v12, 5  ;;  %v911_v35 = vunpack.c.l.b16 %v871_v28  ;;  %1528 = vmatpush.bf16.msra.mxu1 %v2826_v30  ;;  %v2330_v16 = vld [vmem:[#allocation2] sm:$0xf]  ;;  %v2772_v41 = vld [vmem:[#allocation2 + $0x4] sm:$0xf0] }
  0x51   : > { %v564_v26 = vrot.slane %v562_v15, 5  ;;  %v875_v34 = vsel %vm3109_vm11, %v2379_v19, %v874_v23  ;;  %v1175_v43 = vshrl.u32 %v1146_v24, 16  ;;  %v1178_v44 = vshll.u32 %v1146_v24, 16  ;;  %v2454_v63 = vld [vmem:[#allocation2 + $0x18] sm:$0xf]  ;;  %v238_v15 = vld [vmem:[%s2977_s10 + $0xe0] sm:$0xff] }
  0x52   : > { %v546_v32 = vrot.slane %v545_v20, 4  ;;  %v559_v33 = vor.u32 %v558_v14, %v555_v21  ;;  %v912_v39 = vunpack.c.l.b16 %v875_v34  ;;  %v1170_v58 = vshll.u32 %v3274_v36, 16  ;;  %v2801_v0 = vld [vmem:[#allocation2 + $0x1c] sm:$0xf0]  ;;  %v1148_v9 = vld [vmem:[#allocation2 + $0x18] sm:$0xf] }
  0x53   : > { %v1177_v53 = vrot.slane %v1175_v43, 4  ;;  %v1180_v54 = vrot.slane %v1178_v44, 5  ;;  %v2380_v60 = vrot.slane %v837_v37, 9  ;;  %v1167_v1 = vor.u32 %v1166_v42, %v1163_v29  ;;  %v240_v17 = vld [vmem:[%s2977_s10 + $0xf0] sm:$0xff]  ;;  %v2824_v14 = vld [vmem:[%s3575_s1 + $0x160] sm:$0xff]  ;;  %v239_v30 = vld [vmem:[%s2977_s10 + $0xe8] sm:$0xff] }
  0x54   : > { %v551_v47 = vsel %vm3130_vm12, %v546_v32, %v550_v13  ;;  %v560_v48 = vrot.slane %v559_v33, 4  ;;  %v918_v52 = vpack.c.b16 %v912_v39, %v911_v35  ;;  %v1184_v45 = vshll.u32 %v3289_v49, 16  ;;  %1529 = vmatpush.bf16.msra.mxu1 %v2825_v40  ;;  %v1150_v13 = vld [vmem:[#allocation2 + $0x20] sm:$0xf]  ;;  %v2834_v23 = vld [vmem:[%s3575_s1 + $0x190] sm:$0xff]  ;;  %v2843_v34 = vld [vmem:[%s3575_s1 + $0x1d8] sm:$0xff] }
  0x55   : > { %v641_v51 = vunpack.c.l.b16 %v551_v47  ;;  %v878_v2 = vrot.slane %v3102_v56, 5  ;;  %v1181_v3 = vor.u32 %v1180_v54, %v1177_v53  ;;  %v2381_v4 = vrot.slane %v838_v55, 9  ;;  %v3319_v29 = vld [vmem:[%s3575_s1 + $0x230] sm:$0xff]  ;;  %v298_v37 = vld [vmem:[#allocation2 + $0x40] sm:$0x1]  ;;  %1667 = vmatpush.bf16.msrb.mxu2 %v2834_v23  ;;  %v2833_v40 = vld [vmem:[%s3575_s1 + $0x188] sm:$0xff] }
  0x56   : > { %v565_v57 = vsel %vm3130_vm12, %v560_v48, %v564_v26  ;;  %986 = vmatmul.bf16.gmra.mxu2 %v918_v52  ;;  %v882_v5 = vrot.slane %v3119_v6, 5  ;;  %v2331_v11 = vor.u32 %v2772_v41, %v2330_v16  ;;  %v2455_v12 = vor.u32 %v2801_v0, %v2454_v63  ;;  %v2844_v6 = vld [vmem:[%s3575_s1 + $0x1e0] sm:$0xff]  ;;  %v3331_v44 = vld [vmem:[#allocation2 + $0x1c] sm:$0x1]  ;;  %2083 = vmatpush.bf16.msra.mxu0 %v3319_v29  ;;  %v3340_v47 = vld [vmem:[%s3575_s1 + $0x228] sm:$0xff] }
  0x57   : > { %v642_v62 = vunpack.c.l.b16 %v565_v57  ;;  %v1168_v19 = vrot.slane %v1167_v1, 4  ;;  %v1172_v20 = vrot.slane %v1170_v58, 5  ;;  %v1186_v21 = vrot.slane %v1184_v45, 5  ;;  %1911 = vmatpush.bf16.msrb.mxu3 %v2844_v6  ;;  %v330_v41 = vld [vmem:[#allocation2 + $0x44] sm:$0x1] }
  0x58   : > { %v879_v56 = vsel %vm3109_vm11, %v2380_v60, %v878_v2  ;;  %v1182_v24 = vrot.slane %v1181_v3, 4  ;;  %v883_v25 = vsel %vm3109_vm11, %v2381_v4, %v882_v5  ;;  %v1189_v26 = vshrl.u32 %v1148_v9, 16  ;;  %1530 = vmatpush.bf16.msra.mxu1 %v2824_v14  ;;  %v839_v45 = vld [vmem:[#allocation2 + $0x30] sm:$0xe]  ;;  %v2832_v2 = vld [vmem:[%s3575_s1 + $0x180] sm:$0xff] }
  0x59   : > { %v648_v7 = vpack.c.b16 %v642_v62, %v641_v51  ;;  %v1192_v28 = vshll.u32 %v1148_v9, 16  ;;  %v1203_v32 = vshrl.u32 %v1150_v13, 16  ;;  %v1206_v33 = vshll.u32 %v1150_v13, 16  ;;  %v3344_v51 = vld [vmem:[#allocation2 + $0x24] sm:$0x1]  ;;  %1668 = vmatpush.bf16.msrb.mxu2 %v2833_v40  ;;  %v2841_v40 = vld [vmem:[%s3575_s1 + $0x1c8] sm:$0xff] }
  0x5a   : > { %v256_v35 = vmax.f32 %v238_v15, %v240_v17  ;;  %v1173_v39 = vsel %vm3130_vm12, %v1168_v19, %v1172_v20  ;;  %v913_v42 = vunpack.c.l.b16 %v879_v56  ;;  %v914_v43 = vunpack.c.l.b16 %v883_v25  ;;  %2084 = vmatpush.bf16.msra.mxu0 %v3340_v47  ;;  %v2773_v13 = vld [vmem:[#allocation2 + $0x14] sm:$0xf0]  ;;  %v2458_v17 = vld [vmem:[#allocation2 + $0x28] sm:$0xf]  ;;  %v2802_v19 = vld [vmem:[#allocation2 + $0x2c] sm:$0xf0] }
  0x5b   : > { %716 = vmatmul.bf16.gmra.mxu0 %v648_v7  ;;  %v257_v48 = vmax.f32 %v239_v30, %v241_v31  ;;  %v1187_v50 = vsel %vm3130_vm12, %v1182_v24, %v1186_v21  ;;  %v1191_v52 = vrot.slane %v1189_v26, 4  ;;  %v1194_v53 = vrot.slane %v1192_v28, 5  ;;  %1912 = vmatpush.bf16.msrb.mxu3 %v2843_v34  ;;  %v840_v7 = vld [vmem:[#allocation2 + $0x38] sm:$0xe]  ;;  %v1152_v34 = vld [vmem:[#allocation2 + $0x28] sm:$0xf] }
  0x5c   : > { %v299_v54 = vsel %vm2980_vm2, 0, %v298_v37  ;;  %v1205_v55 = vrot.slane %v1203_v32, 4  ;;  %v1208_v57 = vrot.slane %v1206_v33, 5  ;;  %1531 = vmatpush.bf16.msra.mxu1 %v2823_v38  ;;  %v1289_v58 = vunpack.c.l.b16 %v1173_v39  ;;  %v2822_v37 = vld [vmem:[%s3575_s1 + $0x150] sm:$0xff] }
  0x5d   : > { %812 = vmatmul.bf16.vlgmr.msrb.gmra.mxu1 %v2331_v11  ;;  %v265_v16 = vmax.f32 %v256_v35, %v257_v48  ;;  %300 = vst [vmem:[#allocation2 + $0x40] sm:$0x1] %v299_v54  ;;  %v1290_v60 = vunpack.c.l.b16 %v1187_v50  ;;  %v919_v62 = vpack.c.b16 %v914_v43, %v913_v42  ;;  %v1198_v63 = vshll.u32 %v3331_v44, 16  ;;  %1669 = vmatpush.bf16.msrb.mxu2 %v2832_v2  ;;  %v1154_v35 = vld [vmem:[#allocation2 + $0x30] sm:$0xf]  ;;  %v2821_v54 = vld [vmem:[%s3575_s1 + $0x148] sm:$0xff] }
  0x5e   : > { %1120 = vmatmul.bf16.gmra.mxu3 %v2455_v12  ;;  %v1212_v1 = vshll.u32 %v3344_v51, 16  ;;  %v331_v3 = vsel %vm3002_vm4, 0, %v330_v41  ;;  %v1195_v4 = vor.u32 %v1194_v53, %v1191_v52  ;;  %v1209_v5 = vor.u32 %v1208_v57, %v1205_v55  ;;  %v2334_v12 = vld [vmem:[#allocation2 + $0x10] sm:$0xf]  ;;  %v2851_v41 = vld [vmem:[%s3575_s1 + $0x218] sm:$0xff] }
  0x5f   : > { %v343_v0 = vpack.c.bf16 %v265_v16, %v265_v16  ;;  %332 = vst [vmem:[#allocation2 + $0x44] sm:$0x1] %v331_v3  ;;  %v1297_v15 = vpack.c.b16 %v1290_v60, %v1289_v58  ;;  %v1200_v20 = vrot.slane %v1198_v63, 5  ;;  %v2382_v56 = vrot.slane %v839_v45, 9  ;;  %v1699_v58 = vld [vmem:[#allocation2 + $0x10] sm:$0xf] }
  0x60   : > { %v886_v6 = vrot.slane %v3228_v10, 5  ;;  %v2383_v14 = vrot.slane %v840_v7, 9  ;;  %v890_v23 = vrot.slane %v3237_v22, 5  ;;  %v1196_v25 = vrot.slane %v1195_v4, 4  ;;  %v2842_v22 = vld [vmem:[%s3575_s1 + $0x1d0] sm:$0xff]  ;;  %1532 = vmatpush.bf16.msra.mxu1 %v2822_v37 }
  0x61   : > { %v401_v9 = vshrl.u32 %v343_v0, 16  ;;  %v404_v11 = vshll.u32 %v343_v0, 16  ;;  %v1210_v26 = vrot.slane %v1209_v5, 4  ;;  %v1214_v28 = vrot.slane %v1212_v1, 5  ;;  %2887 = vmatpush.bf16.msra.mxu2 %v3285_v46  ;;  %v2852_v46 = vld [vmem:[%s3575_s1 + $0x220] sm:$0xff]  ;;  %1913 = vmatpush.bf16.msrb.mxu3 %v2842_v22 }
  0x62   : > { %v2335_v31 = vor.u32 %v2773_v13, %v2334_v12  ;;  %v2459_v32 = vor.u32 %v2802_v19, %v2458_v17  ;;  %v887_v38 = vsel %vm3109_vm11, %v2382_v56, %v886_v6  ;;  %v891_v39 = vsel %vm3109_vm11, %v2383_v14, %v890_v23  ;;  %2085 = vmatpush.bf16.msra.mxu0 %v2852_v46  ;;  %v1701_v60 = vld [vmem:[#allocation2 + $0x18] sm:$0xf]  ;;  %v2840_v0 = vld [vmem:[%s3575_s1 + $0x1c0] sm:$0xff]  ;;  %v3393_v1 = vld [vmem:[#allocation2 + $0x2c] sm:$0x1] }
  0x63   : > { %v403_v21 = vrot.slane %v401_v9, 7  ;;  %v1201_v59 = vsel %vm3130_vm12, %v1196_v25, %v1200_v20  ;;  %v1215_v42 = vsel %vm3130_vm12, %v1210_v26, %v1214_v28  ;;  %v1217_v43 = vshrl.u32 %v1152_v34, 16  ;;  %v3395_v7 = vld [vmem:[#allocation2 + $0x34] sm:$0x1]  ;;  %v2338_v12 = vld [vmem:[#allocation2 + $0x20] sm:$0xf] }
  0x64   : > { %v469_v24 = vld [vmem:[#allocation2 + $0x40] sm:$0xf]  ;;  %v1220_v50 = vshll.u32 %v1152_v34, 16  ;;  %v1231_v52 = vshrl.u32 %v1154_v35, 16  ;;  %v1234_v53 = vshll.u32 %v1154_v35, 16  ;;  %v915_v57 = vunpack.c.l.b16 %v887_v38  ;;  %1533 = vmatpush.bf16.msra.mxu1 %v2821_v54 }
  0x65   : > { %v406_v30 = vor.u32 %v404_v11, %v403_v21  ;;  %v407_v33 = vrot.slane %v403_v21, 4  ;;  %v916_v16 = vunpack.c.l.b16 %v891_v39  ;;  %2888 = vmatpush.bf16.msra.mxu2 %v3319_v29  ;;  %v1292_v63 = vunpack.c.l.b16 %v1215_v42  ;;  %1914 = vmatpush.bf16.msrb.mxu3 %v2841_v40  ;;  %v2774_v19 = vld [vmem:[#allocation2 + $0x24] sm:$0xf0]  ;;  %v2462_v20 = vld [vmem:[#allocation2 + $0x38] sm:$0xf] }
  0x66   : > { %991 = vmatmul.bf16.gmra.mxu2 %v919_v62  ;;  %v472_v48 = vld [vmem:[#allocation2 + $0x44] sm:$0x1]  ;;  %v1291_v62 = vunpack.c.l.b16 %v1201_v59  ;;  %v1219_v45 = vrot.slane %v1217_v43, 4  ;;  %v1222_v2 = vrot.slane %v1220_v50, 5  ;;  %v1233_v3 = vrot.slane %v1231_v52, 4  ;;  %2086 = vmatpush.bf16.msra.mxu0 %v2851_v41  ;;  %v2849_v40 = vld [vmem:[%s3575_s1 + $0x208] sm:$0xff] }
  0x67   : > { %v470_v10 = vsel %vm3037_vm6, %v406_v30, %v469_v24  ;;  %v473_v55 = vsel %vm2980_vm2, %v407_v33, %v472_v48  ;;  %v1236_v4 = vrot.slane %v1234_v53, 5  ;;  %v920_v5 = vpack.c.b16 %v916_v16, %v915_v57  ;;  %v3400_v28 = vld [vmem:[#allocation2 + $0x14] sm:$0x1]  ;;  %v2820_v59 = vld [vmem:[%s3575_s1 + $0x140] sm:$0xff]  ;;  %v2618_v42 = vld [vmem:[#allocation2 + $0x10] sm:$0xf] }
  0x68   : > { %471 = vst [vmem:[#allocation2 + $0x40] sm:$0xf] %v470_v10  ;;  %v1716_v29 = vshrl.u32 %v1699_v58, 16  ;;  %v1719_v9 = vshll.u32 %v1699_v58, 16  ;;  %v1730_v11 = vshrl.u32 %v1701_v60, 16  ;;  %v1226_v13 = vshll.u32 %v3393_v1, 16  ;;  %1534 = vmatpush.bf16.msra.mxu1 %v2820_v59 }
  0x69   : > { %474 = vst [vmem:[#allocation2 + $0x44] sm:$0x1] %v473_v55  ;;  %2889 = vmatpush.bf16.msra.mxu2 %v3340_v47  ;;  %1915 = vmatpush.bf16.msrb.mxu3 %v2840_v0  ;;  %v1298_v17 = vpack.c.b16 %v1292_v63, %v1291_v62  ;;  %v1223_v21 = vor.u32 %v1222_v2, %v1219_v45  ;;  %v1240_v6 = vshll.u32 %v3395_v7, 16  ;;  %v3402_v47 = vld [vmem:[#allocation2 + $0x1c] sm:$0x1]  ;;  %v1725_v37 = vshll.u32 %v3400_v28, 16 }
  0x6a   : > { %v1237_v56 = vor.u32 %v1236_v4, %v1233_v3  ;;  %v1718_v23 = vrot.slane %v1716_v29, 4  ;;  %v1721_v24 = vrot.slane %v1719_v9, 5  ;;  %v1732_v25 = vrot.slane %v1730_v11, 4  ;;  %v1156_v10 = vld [vmem:[#allocation2 + $0x38] sm:$0xf]  ;;  %v2848_v0 = vld [vmem:[%s3575_s1 + $0x200] sm:$0xff] }
  0x6b   : > { %1361 = vmatmul.bf16.vlgmr.msrb.gmra.mxu0 %v1297_v15  ;;  %v1733_v15 = vshll.u32 %v1701_v60, 16  ;;  %v2339_v30 = vor.u32 %v2774_v19, %v2338_v12  ;;  %v1224_v33 = vrot.slane %v1223_v21, 4  ;;  %v1242_v35 = vrot.slane %v1240_v6, 5  ;;  %v1703_v54 = vld [vmem:[#allocation2 + $0x20] sm:$0xf] }
  0x6c   : > { %v1238_v34 = vrot.slane %v1237_v56, 4  ;;  %v1722_v22 = vor.u32 %v1721_v24, %v1718_v23  ;;  %v1739_v39 = vshll.u32 %v3402_v47, 16  ;;  %v1245_v52 = vshrl.u32 %v1156_v10, 16  ;;  %v1705_v55 = vld [vmem:[#allocation2 + $0x28] sm:$0xf] }
  0x6d   : > { %817 = vmatmul.bf16.gmra.mxu1 %v2335_v31  ;;  %v1735_v26 = vrot.slane %v1733_v15, 5  ;;  %2890 = vmatpush.bf16.msra.mxu2 %v2852_v46  ;;  %v1228_v31 = vrot.slane %v1226_v13, 5  ;;  %v2850_v46 = vld [vmem:[%s3575_s1 + $0x210] sm:$0xff]  ;;  %v1248_v53 = vshll.u32 %v1156_v10, 16  ;;  %v2828_v57 = vld [vmem:[#allocation2 + $0x14] sm:$0xf0] }
  0x6e   : > { %1125 = vmatmul.bf16.gmra.mxu3 %v2459_v32  ;;  %2087 = vmatpush.bf16.msra.mxu0 %v2850_v46  ;;  %v1243_v50 = vsel %vm3130_vm12, %v1238_v34, %v1242_v35  ;;  %v1723_v16 = vrot.slane %v1722_v22, 4  ;;  %v1741_v60 = vrot.slane %v1739_v39, 5  ;;  %v1744_v45 = vshrl.u32 %v1703_v54, 16 }
  0x6f   : > { %v2803_v14 = vld [vmem:[#allocation2 + $0x3c] sm:$0xf0]  ;;  %v1736_v38 = vor.u32 %v1735_v26, %v1732_v25  ;;  %v1229_v48 = vsel %vm3130_vm12, %v1224_v33, %v1228_v31  ;;  %v1747_v2 = vshll.u32 %v1703_v54, 16  ;;  %v1758_v3 = vshrl.u32 %v1705_v55, 16  ;;  %v3430_v26 = vld [vmem:[#allocation2 + $0x24] sm:$0x1] }
  0x70   : > { %v2463_v32 = vor.u32 %v2803_v14, %v2462_v20  ;;  %v1158_v43 = vld [vmem:[#allocation2 + $0x40] sm:$0xf]  ;;  %v1761_v4 = vshll.u32 %v1705_v55, 16  ;;  %v1294_v29 = vunpack.c.l.b16 %v1243_v50  ;;  %v2619_v9 = vor.u32 %v2828_v57, %v2618_v42  ;;  %v3428_v21 = vld [vmem:[#allocation2 + $0x44] sm:$0x1] }
  0x71   : > { %2891 = vmatpush.bf16.msra.mxu2 %v2851_v41  ;;  %v1727_v41 = vrot.slane %v1725_v37, 5  ;;  %v1737_v58 = vrot.slane %v1736_v38, 4  ;;  %v1259_v62 = vshrl.u32 %v1158_v43, 16  ;;  %v1262_v63 = vshll.u32 %v1158_v43, 16  ;;  %v2775_v33 = vld [vmem:[#allocation2 + $0x34] sm:$0xf0] }
  0x72   : > { %2088 = vmatpush.bf16.msra.mxu0 %v2849_v40  ;;  %v1247_v11 = vrot.slane %v1245_v52, 4  ;;  %v1250_v12 = vrot.slane %v1248_v53, 5  ;;  %v1746_v56 = vrot.slane %v1744_v45, 4  ;;  %v1749_v6 = vrot.slane %v1747_v2, 5  ;;  %v1390_v37 = vld [vmem:[#allocation2 + $0x8] sm:$0xe] }
  0x73   : > { %v1728_v13 = vsel %vm3130_vm12, %v1723_v16, %v1727_v41  ;;  %v1742_v15 = vsel %vm3130_vm12, %v1737_v58, %v1741_v60  ;;  %v1261_v19 = vrot.slane %v1259_v62, 4  ;;  %v1264_v20 = vrot.slane %v1262_v63, 5  ;;  %v1391_v38 = vld [vmem:[#allocation2 + $0x10] sm:$0xe]  ;;  %v2622_v45 = vld [vmem:[#allocation2 + $0x20] sm:$0xf] }
  0x74   : > { %v1760_v14 = vrot.slane %v1758_v3, 4  ;;  %v1763_v23 = vrot.slane %v1761_v4, 5  ;;  %v1844_v24 = vunpack.c.l.b16 %v1728_v13  ;;  %v1845_v25 = vunpack.c.l.b16 %v1742_v15  ;;  %v1707_v63 = vld [vmem:[#allocation2 + $0x30] sm:$0xf]  ;;  %v2829_v2 = vld [vmem:[#allocation2 + $0x24] sm:$0xf0] }
  0x75   : > { %2892 = vmatpush.bf16.msra.mxu2 %v2850_v46  ;;  %v1251_v34 = vor.u32 %v1250_v12, %v1247_v11  ;;  %v1265_v10 = vor.u32 %v1264_v20, %v1261_v19  ;;  %v1268_v22 = vshll.u32 %v3428_v21, 16  ;;  %v1750_v39 = vor.u32 %v1749_v6, %v1746_v56 }
  0x76   : > { %996 = vmatmul.bf16.gmra.mxu2 %v920_v5  ;;  %v1293_v5 = vunpack.c.l.b16 %v1229_v48  ;;  %2089 = vmatpush.bf16.msra.mxu0 %v2848_v0  ;;  %v1753_v59 = vshll.u32 %v3430_v26, 16  ;;  %v1764_v46 = vor.u32 %v1763_v23, %v1760_v14  ;;  %v1416_v48 = vrot.slane %v3274_v36, 5 }
  0x77   : > { %v1420_v50 = vrot.slane %v3289_v49, 5  ;;  %v1252_v52 = vrot.slane %v1251_v34, 4  ;;  %v1266_v54 = vrot.slane %v1265_v10, 4  ;;  %v1270_v55 = vrot.slane %v1268_v22, 5 }
  0x78   : > { %v1299_v31 = vpack.c.b16 %v1294_v29, %v1293_v5  ;;  %v2544_v57 = vrot.slane %v1390_v37, 9  ;;  %v2545_v16 = vrot.slane %v1391_v38, 9  ;;  %v1751_v41 = vrot.slane %v1750_v39, 4  ;;  %v3454_v37 = vld [vmem:[#allocation2 + $0x34] sm:$0x1] }
  0x79   : > { %2893 = vmatpush.bf16.msra.mxu2 %v2849_v40  ;;  %v1852_v40 = vpack.c.b16 %v1845_v25, %v1844_v24  ;;  %v1755_v58 = vrot.slane %v1753_v59, 5  ;;  %v1765_v60 = vrot.slane %v1764_v46, 4  ;;  %v1271_v49 = vsel %vm3130_vm12, %v1266_v54, %v1270_v55  ;;  %v3456_v38 = vld [vmem:[#allocation2 + $0x3c] sm:$0x1] }
  0x7a   : > { %v1417_v3 = vsel %vm3109_vm11, %v2544_v57, %v1416_v48  ;;  %v1421_v4 = vsel %vm3109_vm11, %v2545_v16, %v1420_v50  ;;  %v1772_v11 = vshrl.u32 %v1707_v63, 16  ;;  %v1775_v12 = vshll.u32 %v1707_v63, 16  ;;  %v1392_v48 = vld [vmem:[#allocation2 + $0x18] sm:$0xe]  ;;  %v2626_v16 = vld [vmem:[#allocation2 + $0x30] sm:$0xf] }
  0x7b   : > { %1366 = vmatmul.bf16.gmra.mxu0 %v1298_v17  ;;  %v3426_v17 = vld [vmem:[#allocation2 + $0x3c] sm:$0x1]  ;;  %v1756_v5 = vsel %vm3130_vm12, %v1751_v41, %v1755_v58  ;;  %v1296_v20 = vunpack.c.l.b16 %v1271_v49  ;;  %v2623_v56 = vor.u32 %v2829_v2, %v2622_v45  ;;  %v1463_v14 = vunpack.c.l.b16 %v1417_v3  ;;  %v1711_v45 = vld [vmem:[#allocation2 + $0x40] sm:$0xf] }
  0x7c   : > { %v1254_v35 = vshll.u32 %v3426_v17, 16  ;;  %v1464_v23 = vunpack.c.l.b16 %v1421_v4  ;;  %v1846_v24 = vunpack.c.l.b16 %v1756_v5  ;;  %v1777_v34 = vrot.slane %v1775_v12, 5 }
  0x7d   : > { %822 = vmatmul.bf16.gmra.mxu1 %v2339_v30  ;;  %v3432_v30 = vld [vmem:[#allocation2 + $0x2c] sm:$0x1]  ;;  %2894 = vmatpush.bf16.msra.mxu2 %v2848_v0  ;;  %v1709_v0 = vld [vmem:[#allocation2 + $0x38] sm:$0xf]  ;;  %v1971_v8 = vrot.slane %v3400_v28, 5  ;;  %v1975_v39 = vrot.slane %v3402_v47, 5 }
  0x7e   : > { %1130 = vmatmul.bf16.gmra.mxu3 %v2463_v32  ;;  %v2342_v32 = vld [vmem:[#allocation2 + $0x30] sm:$0xf]  ;;  %v1767_v42 = vshll.u32 %v3432_v30, 16  ;;  %v1256_v53 = vrot.slane %v1254_v35, 5  ;;  %v1786_v13 = vshrl.u32 %v1709_v0, 16  ;;  %v1789_v15 = vshll.u32 %v1709_v0, 16 }
  0x7f   : > { %v2343_v43 = vor.u32 %v2775_v33, %v2342_v32  ;;  %v1946_v32 = vld [vmem:[#allocation2 + $0x18] sm:$0xe]  ;;  %v1774_v33 = vrot.slane %v1772_v11, 4  ;;  %v1781_v54 = vshll.u32 %v3454_v37, 16  ;;  %v1795_v57 = vshll.u32 %v3456_v38, 16 }
  0x80   : > { %v1769_v62 = vrot.slane %v1767_v42, 5  ;;  %v1257_v36 = vsel %vm3130_vm12, %v1252_v52, %v1256_v53  ;;  %v1788_v35 = vrot.slane %v1786_v13, 4  ;;  %v1791_v10 = vrot.slane %v1789_v15, 5  ;;  %v333_v42 = vld [vmem:[#allocation2 + $0x4c] sm:$0x1] }
  0x81   : > { %v1295_v19 = vunpack.c.l.b16 %v1257_v36  ;;  %v2713_v46 = vrot.slane %v1946_v32, 9  ;;  %v334_v50 = vsel %vm3002_vm4, 0, %v333_v42  ;;  %v1393_v52 = vld [vmem:[#allocation2 + $0x20] sm:$0xe]  ;;  %v1778_v53 = vor.u32 %v1777_v34, %v1774_v33  ;;  %v1712_v34 = vld [vmem:[#allocation2 + $0x44] sm:$0x1] }
  0x82   : > { %v1770_v29 = vsel %vm3130_vm12, %v1765_v60, %v1769_v62  ;;  %v1792_v55 = vor.u32 %v1791_v10, %v1788_v35  ;;  %335 = vst [vmem:[#allocation2 + $0x4c] sm:$0x1] %v334_v50  ;;  %v2546_v41 = vrot.slane %v1392_v48, 9  ;;  %v1424_v27 = vrot.slane %v3331_v44, 5  ;;  %v2830_v62 = vld [vmem:[#allocation2 + $0x34] sm:$0xf0] }
  0x83   : > { %v1847_v25 = vunpack.c.l.b16 %v1770_v29  ;;  %v1300_v22 = vpack.c.b16 %v1296_v20, %v1295_v19  ;;  %v1976_v47 = vsel %vm3109_vm11, %v2713_v46, %v1975_v39  ;;  %v2547_v58 = vrot.slane %v1393_v52, 9  ;;  %v1394_v42 = vld [vmem:[#allocation2 + $0x28] sm:$0xe] }
  0x84   : > { %v1428_v60 = vrot.slane %v3344_v51, 5  ;;  %v1779_v63 = vrot.slane %v1778_v53, 4  ;;  %v1783_v0 = vrot.slane %v1781_v54, 5  ;;  %v1793_v36 = vrot.slane %v1792_v55, 4 }
  0x85   : > { %v1797_v49 = vrot.slane %v1795_v57, 5  ;;  %v2019_v4 = vunpack.c.l.b16 %v1976_v47  ;;  %v2627_v5 = vor.u32 %v2830_v62, %v2626_v16  ;;  %v1425_v29 = vsel %vm3109_vm11, %v2546_v41, %v1424_v27 }
  0x86   : > { %1670 = vmatmul.bf16.vlgmr.msrb.gmra.mxu2 %v2619_v9  ;;  %v301_v9 = vld [vmem:[#allocation2 + $0x48] sm:$0x1]  ;;  %v1429_v44 = vsel %vm3109_vm11, %v2547_v58, %v1428_v60  ;;  %v1784_v51 = vsel %vm3130_vm12, %v1779_v63, %v1783_v0  ;;  %v1800_v11 = vshrl.u32 %v1711_v45, 16  ;;  %v1803_v12 = vshll.u32 %v1711_v45, 16  ;;  %v1952_v45 = vld [vmem:[#allocation2 + $0x48] sm:$0xe] }
  0x87   : > { %v302_v6 = vsel %vm2980_vm2, 0, %v301_v9  ;;  %v1798_v9 = vsel %vm3130_vm12, %v1793_v36, %v1797_v49  ;;  %v1465_v20 = vunpack.c.l.b16 %v1425_v29  ;;  %v1983_v39 = vrot.slane %v3432_v30, 5  ;;  %v1951_v49 = vld [vmem:[#allocation2 + $0x40] sm:$0xe] }
  0x88   : > { %303 = vst [vmem:[#allocation2 + $0x48] sm:$0x1] %v302_v6  ;;  %v1848_v6 = vunpack.c.l.b16 %v1784_v51  ;;  %v1809_v48 = vshll.u32 %v1712_v34, 16  ;;  %v2548_v55 = vrot.slane %v1394_v42, 9  ;;  %v1432_v30 = vrot.slane %v3393_v1, 5 }
  0x89   : > { %v1714_v35 = vld [vmem:[#allocation2 + $0x4c] sm:$0x1]  ;;  %v1995_v51 = vrot.slane %v1712_v34, 5 }
  0x8a   : > { %v1823_v52 = vshll.u32 %v1714_v35, 16  ;;  %v1811_v41 = vrot.slane %v1809_v48, 5  ;;  %v1433_v0 = vsel %vm3109_vm11, %v2548_v55, %v1432_v30 }
  0x8b   : > { %1371 = vmatmul.bf16.gmra.mxu0 %v1299_v31  ;;  %v1945_v31 = vld [vmem:[#allocation2 + $0x10] sm:$0xe] }
  0x8c   : > { %v2712_v59 = vrot.slane %v1945_v31, 9  ;;  %v1805_v31 = vrot.slane %v1803_v12, 5  ;;  %v1825_v58 = vrot.slane %v1823_v52, 5  ;;  %v2718_v12 = vrot.slane %v1951_v49, 9 }
  0x8d   : > { %827 = vmatmul.bf16.gmra.mxu1 %v2343_v43  ;;  %v1471_v43 = vpack.c.b16 %v1464_v23, %v1463_v14  ;;  %v1849_v14 = vunpack.c.l.b16 %v1798_v9  ;;  %v1947_v23 = vld [vmem:[#allocation2 + $0x20] sm:$0xe]  ;;  %v1999_v9 = vrot.slane %v1714_v35, 5  ;;  %v1440_v35 = vrot.slane %v3426_v17, 5 }
  0x8e   : > { %1916 = vmatmul.bf16.vlgmr.msrb.gmra.mxu3 %v1852_v40  ;;  %v1853_v40 = vpack.c.b16 %v1847_v25, %v1846_v24  ;;  %v1972_v28 = vsel %vm3109_vm11, %v2712_v59, %v1971_v8  ;;  %v1948_v24 = vld [vmem:[#allocation2 + $0x28] sm:$0xe]  ;;  %v1802_v25 = vrot.slane %v1800_v11, 4  ;;  %v2714_v10 = vrot.slane %v1947_v23, 9  ;;  %v1949_v11 = vld [vmem:[#allocation2 + $0x30] sm:$0xe] }
  0x8f   : > { %v1713_v2 = vld [vmem:[#allocation2 + $0x48] sm:$0xf]  ;;  %v2018_v3 = vunpack.c.l.b16 %v1972_v28  ;;  %v2715_v8 = vrot.slane %v1948_v24, 9  ;;  %v1854_v46 = vpack.c.b16 %v1849_v14, %v1848_v6  ;;  %v1436_v28 = vrot.slane %v3395_v7, 5 }
  0x90   : > { %v1814_v13 = vshrl.u32 %v1713_v2, 16  ;;  %v1817_v15 = vshll.u32 %v1713_v2, 16  ;;  %v2831_v47 = vld [vmem:[#allocation2 + $0x44] sm:$0xf0]  ;;  %v2716_v18 = vrot.slane %v1949_v11, 9  ;;  %v1996_v6 = vsel %vm3109_vm11, %v2718_v12, %v1995_v51 }
  0x91   : > { %v2026_v19 = vpack.c.b16 %v2019_v4, %v2018_v3  ;;  %v1984_v54 = vsel %vm3109_vm11, %v2715_v8, %v1983_v39  ;;  %v1467_v3 = vunpack.c.l.b16 %v1433_v0  ;;  %v1991_v24 = vrot.slane %v3456_v38, 5 }
  0x92   : > { %v1816_v32 = vrot.slane %v1814_v13, 4  ;;  %v1819_v33 = vrot.slane %v1817_v15, 5  ;;  %v2021_v62 = vunpack.c.l.b16 %v1984_v54  ;;  %v2719_v13 = vrot.slane %v1952_v45, 9  ;;  %v1950_v15 = vld [vmem:[#allocation2 + $0x38] sm:$0xe] }
  0x93   : > { %v2717_v23 = vrot.slane %v1950_v15, 9 }
  0x94   : > { %v1820_v50 = vor.u32 %v1819_v33, %v1816_v32  ;;  %v2000_v14 = vsel %vm3109_vm11, %v2719_v13, %v1999_v9  ;;  %v2024_v33 = vunpack.c.l.b16 %v1996_v6 }
  0x95   : > { %v2025_v34 = vunpack.c.l.b16 %v2000_v14  ;;  %v1992_v8 = vsel %vm3109_vm11, %v2717_v23, %v1991_v24 }
  0x96   : > { %1675 = vmatmul.bf16.gmra.mxu2 %v2623_v56  ;;  %v1466_v56 = vunpack.c.l.b16 %v1429_v44  ;;  %v1821_v27 = vrot.slane %v1820_v50, 4 }
  0x98   : > { %v1472_v59 = vpack.c.b16 %v1466_v56, %v1465_v20  ;;  %v1826_v7 = vsel %vm3130_vm12, %v1821_v27, %v1825_v58  ;;  %v1987_v56 = vrot.slane %v3454_v37, 5 }
  0x99   : > { %v1851_v29 = vunpack.c.l.b16 %v1826_v7 }
  0x9a   : > { %v1988_v32 = vsel %vm3109_vm11, %v2716_v18, %v1987_v56 }
  0x9b   : > { %1376 = vmatmul.bf16.gmra.mxu0 %v1300_v22  ;;  %v1979_v22 = vrot.slane %v3430_v26, 5  ;;  %v2630_v26 = vld [vmem:[#allocation2 + $0x40] sm:$0xf]  ;;  %v2022_v38 = vunpack.c.l.b16 %v1988_v32 }
  0x9c   : > { %v2631_v63 = vor.u32 %v2831_v47, %v2630_v26 }
  0x9d   : > { %1535 = vmatmul.bf16.vlgmr.msra.gmra.mxu1 %v1471_v43  ;;  %v1395_v43 = vld [vmem:[#allocation2 + $0x30] sm:$0xe]  ;;  %v1980_v53 = vsel %vm3109_vm11, %v2714_v10, %v1979_v22  ;;  %v1444_v22 = vrot.slane %v3428_v21, 5 }
  0x9e   : > { %1921 = vmatmul.bf16.gmra.mxu3 %v1853_v40  ;;  %v1806_v40 = vor.u32 %v1805_v31, %v1802_v25  ;;  %v2549_v57 = vrot.slane %v1395_v43, 9  ;;  %v2020_v60 = vunpack.c.l.b16 %v1980_v53  ;;  %v1396_v25 = vld [vmem:[#allocation2 + $0x38] sm:$0xe]  ;;  %v1397_v31 = vld [vmem:[#allocation2 + $0x40] sm:$0xe] }
  0x9f   : > { %v2550_v37 = vrot.slane %v1396_v25, 9  ;;  %v2551_v10 = vrot.slane %v1397_v31, 9 }
  0xa0   : > { %v1807_v16 = vrot.slane %v1806_v40, 4  ;;  %v1437_v36 = vsel %vm3109_vm11, %v2549_v57, %v1436_v28  ;;  %v2027_v2 = vpack.c.b16 %v2021_v62, %v2020_v60 }
  0xa1   : > { %v1468_v4 = vunpack.c.l.b16 %v1437_v36  ;;  %v1441_v42 = vsel %vm3109_vm11, %v2550_v37, %v1440_v35  ;;  %v1445_v43 = vsel %vm3109_vm11, %v2551_v10, %v1444_v22 }
  0xa2   : > { %v1812_v1 = vsel %vm3130_vm12, %v1807_v16, %v1811_v41  ;;  %v1469_v50 = vunpack.c.l.b16 %v1441_v42  ;;  %v1470_v17 = vunpack.c.l.b16 %v1445_v43 }
  0xa4   : > { %v1474_v21 = vpack.c.b16 %v1470_v17, %v1469_v50 }
  0xa6   : > { %1680 = vmatmul.bf16.gmra.mxu2 %v2627_v5  ;;  %v1850_v5 = vunpack.c.l.b16 %v1812_v1 }
  0xa8   : > { %v1855_v20 = vpack.c.b16 %v1851_v29, %v1850_v5 }
  0xab   : > { %2090 = vmatmul.bf16.vlgmr.msra.gmra.mxu0 %v2026_v19  ;;  %v1473_v19 = vpack.c.b16 %v1468_v4, %v1467_v3 }
  0xad   : > { %1540 = vmatmul.bf16.gmra.mxu1 %v1472_v59  ;;  %v2023_v59 = vunpack.c.l.b16 %v1992_v8 }
  0xae   : > { %1926 = vmatmul.bf16.gmra.mxu3 %v1854_v46  ;;  %v2029_v46 = vpack.c.b16 %v2025_v34, %v2024_v33 }
  0xaf   : > { %v2028_v52 = vpack.c.b16 %v2023_v59, %v2022_v38 }
  0xb2   : > { %v3494_v44 = vpop.f32.mrf.mxu1 }
  0xb6   : > { %1685 = vmatmul.bf16.gmra.mxu2 %v2631_v63 }
  0xba   : > { %v724_v39 = vpop.f32.mrf.mxu1  ;;  %v712_v40 = vpop.f32.mrf.mxu0 }
  0xbb   : > { %2095 = vmatmul.bf16.gmra.mxu0 %v2027_v2 }
  0xbd   : > { %1545 = vmatmul.bf16.gmra.mxu1 %v1473_v19  ;;  %v982_v48 = vpop.f32.mrf.mxu2 }
  0xbe   : > { %1931 = vmatmul.bf16.gmra.mxu3 %v1855_v20 }
  0xc2   : > { %v714_v54 = vpop.f32.mrf.mxu0 }
  0xc5   : > { %v984_v26 = vpop.f32.mrf.mxu2 }
  0xc6   : > { %2105 = vmatmul.bf16.vlgmr.msra.gmra.mxu2 %v2029_v46 }
  0xca   : > { %v727_v53 = vpop.f32.mrf.mxu1 }
  0xcb   : > { %2100 = vmatmul.bf16.gmra.mxu0 %v2028_v52 }
  0xcd   : > { %1550 = vmatmul.bf16.gmra.mxu1 %v1474_v21 }
  0xd1   : > { %v1116_v55 = vpop.f32.mrf.mxu3 }
  0xd2   : > { %v729_v30 = vpop.f32.mrf.mxu1 }
  0xd8   : > { %v717_v57 = vpop.f32.mrf.mxu0 }
  0xd9   : > { %v1118_v28 = vpop.f32.mrf.mxu3  ;;  %v987_v47 = vpop.f32.mrf.mxu2 }
  0xda   : > { %v813_v16 = vpop.f32.mrf.mxu1 }
  0xdb   : > { %v814_v61 = vadd.f32 %v813_v16, %v712_v40 }
  0xdd   : > { %v1002_v41 = vadd.f32 %v982_v48, %v814_v61 }
  0xdf   : > { %v1136_v58 = vadd.f32 %v1116_v55, %v1002_v41 }
  0xe0   : > { %v719_v27 = vpop.f32.mrf.mxu0 }
  0xe1   : > { %v1121_v60 = vpop.f32.mrf.mxu3  ;;  %v989_v62 = vpop.f32.mrf.mxu2 }
  0xe2   : > { %v815_v63 = vpop.f32.mrf.mxu1 }
  0xe3   : > { %v816_v0 = vadd.f32 %v815_v63, %v714_v54 }
  0xe5   : > { %v1003_v36 = vadd.f32 %v984_v26, %v816_v0 }
  0xe7   : > { %v1137_v21 = vadd.f32 %v1118_v28, %v1003_v36  ;;  %v3536_v28 = vld [vmem:[%s3576_s2] ss:$0 sm:$0xff] }
  0xe8   : > { %v1362_v1 = vpop.f32.mrf.mxu0 }
  0xe9   : > { %v1382_v7 = vadd.f32 %v1362_v1, %v1136_v58  ;;  %v1123_v49 = vpop.f32.mrf.mxu3  ;;  %v992_v45 = vpop.f32.mrf.mxu2 }
  0xea   : > { %v818_v2 = vpop.f32.mrf.mxu1 }
  0xeb   : > { %v819_v3 = vadd.f32 %v818_v2, %v717_v57 }
  0xed   : > { %v1004_v4 = vadd.f32 %v987_v47, %v819_v3 }
  0xef   : > { %v1138_v29 = vadd.f32 %v1121_v60, %v1004_v4 }
  0xf0   : > { %v1364_v5 = vpop.f32.mrf.mxu0 }
  0xf1   : > { %v1126_v51 = vpop.f32.mrf.mxu3  ;;  %v994_v9 = vpop.f32.mrf.mxu2  ;;  %v1383_v55 = vadd.f32 %v1364_v5, %v1137_v21 }
  0xf2   : > { %v820_v11 = vpop.f32.mrf.mxu1 }
  0xf3   : > { %v821_v12 = vadd.f32 %v820_v11, %v719_v27 }
  0xf5   : > { %v1005_v13 = vadd.f32 %v989_v62, %v821_v12 }
  0xf7   : > { %v1139_v0 = vadd.f32 %v1123_v49, %v1005_v13 }
  0xf8   : > { %v1367_v15 = vpop.f32.mrf.mxu0 }
  0xf9   : > { %v1384_v19 = vadd.f32 %v1367_v15, %v1138_v29  ;;  %v3512_v20 = vpop.f32.mrf.mxu3  ;;  %v997_v18 = vpop.f32.mrf.mxu2 }
  0xfa   : > { %v823_v56 = vpop.f32.mrf.mxu1 }
  0xfb   : > { %v824_v6 = vadd.f32 %v823_v56, %v3494_v44 }
  0xfd   : > { %v1006_v14 = vadd.f32 %v992_v45, %v824_v6 }
  0xff   : > { %v1140_v24 = vadd.f32 %v1126_v51, %v1006_v14 }
 0x100   : > { %v1369_v23 = vpop.f32.mrf.mxu0 }
 0x101   : > { %v3515_v25 = vpop.f32.mrf.mxu3  ;;  %v999_v31 = vpop.f32.mrf.mxu2  ;;  %v1385_v3 = vadd.f32 %v1369_v23, %v1139_v0 }
 0x102   : > { %v825_v32 = vpop.f32.mrf.mxu1 }
 0x103   : > { %v826_v33 = vadd.f32 %v825_v32, %v724_v39 }
 0x105   : > { %v3517_v34 = vadd.f32 %v994_v9, %v826_v33 }
 0x108   : > { %v1372_v37 = vpop.f32.mrf.mxu0 }
 0x109   : > { %v3519_v35 = vadd.f32 %v1372_v37, %v1140_v24  ;;  %v3521_v10 = vpop.f32.mrf.mxu3  ;;  %v1671_v22 = vpop.f32.mrf.mxu2 }
 0x10a   : > { %v828_v8 = vpop.f32.mrf.mxu1 }
 0x10b   : > { %v829_v38 = vadd.f32 %v828_v8, %v727_v53  ;;  %v1141_v8 = vadd.f32 %v3512_v20, %v3517_v34 }
 0x10d   : > { %v3523_v59 = vadd.f32 %v997_v18, %v829_v38 }
 0x10f   : > { %v1142_v20 = vadd.f32 %v3515_v25, %v3523_v59 }
 0x110   : > { %v3525_v44 = vpop.f32.mrf.mxu0 }
 0x111   : > { %v1917_v46 = vpop.f32.mrf.mxu3  ;;  %v1673_v42 = vpop.f32.mrf.mxu2 }
 0x112   : > { %v830_v43 = vpop.f32.mrf.mxu1 }
 0x113   : > { %v831_v40 = vadd.f32 %v830_v43, %v729_v30  ;;  %v1387_v43 = vadd.f32 %v3525_v44, %v1141_v8 }
 0x115   : > { %v3527_v48 = vadd.f32 %v999_v31, %v831_v40 }
 0x117   : > { %v1143_v0 = vadd.f32 %v3521_v10, %v3527_v48 }
 0x118   : > { %v3529_v39 = vpop.f32.mrf.mxu0 }
 0x119   : > { %v1676_v50 = vpop.f32.mrf.mxu2  ;;  %v1919_v52 = vpop.f32.mrf.mxu3 }
 0x11a   : > { %v1536_v17 = vpop.f32.mrf.mxu1 }
 0x11b   : > { %v1556_v26 = vadd.f32 %v1536_v17, %v1382_v7 }
 0x11d   : > { %v1691_v61 = vadd.f32 %v1671_v22, %v1556_v26 }
 0x11f   : > { %v1937_v27 = vadd.f32 %v1917_v46, %v1691_v61  ;;  %v1388_v61 = vadd.f32 %v3529_v39, %v1142_v20 }
 0x120   : > { %v3531_v54 = vpop.f32.mrf.mxu0 }
 0x121   : > { %v1678_v53 = vpop.f32.mrf.mxu2  ;;  %v1922_v16 = vpop.f32.mrf.mxu3 }
 0x122   : > { %v1538_v57 = vpop.f32.mrf.mxu1 }
 0x123   : > { %v1557_v47 = vadd.f32 %v1538_v57, %v1383_v55 }
 0x125   : > { %v1692_v30 = vadd.f32 %v1673_v42, %v1557_v47 }
 0x127   : > { %v1938_v62 = vadd.f32 %v1919_v52, %v1692_v30 }
 0x128   : > { %v2091_v41 = vpop.f32.mrf.mxu0 }
 0x129   : > { %v1681_v58 = vpop.f32.mrf.mxu2  ;;  %v2111_v1 = vadd.f32 %v2091_v41, %v1937_v27  ;;  %v1924_v36 = vpop.f32.mrf.mxu3 }
 0x12a   : > { %v1541_v60 = vpop.f32.mrf.mxu1 }
 0x12b   : > { %v1558_v63 = vadd.f32 %v1541_v60, %v1384_v19  ;;  %v2132_v4 = vmul.f32 %v2111_v1, %v2111_v1  ;;  %v2160_v29 = vadd.f32 %v3536_v28, %v2111_v1 }
 0x12d   : > { %v1693_v2 = vadd.f32 %v1676_v50, %v1558_v63 }
 0x12f   : > { %v1939_v15 = vadd.f32 %v1922_v16, %v1693_v2 }
 0x130   : > { %v2093_v7 = vpop.f32.mrf.mxu0 }
 0x131   : > { %v2112_v45 = vadd.f32 %v2093_v7, %v1938_v62  ;;  %v1683_v5 = vpop.f32.mrf.mxu2  ;;  %v1927_v14 = vpop.f32.mrf.mxu3 }
 0x132   : > { %v1543_v11 = vpop.f32.mrf.mxu1 }
 0x133   : > { %v2119_v51 = vadd.f32 %v2112_v45, %v2111_v1  ;;  %v2133_v9 = vmul.f32 %v2112_v45, %v2112_v45  ;;  %v2161_v49 = vadd.f32 %v3536_v28, %v2112_v45  ;;  %v1559_v19 = vadd.f32 %v1543_v11, %v1385_v3 }
 0x134   : > { %v1389_v45 = vadd.f32 %v3531_v54, %v1143_v0 }
 0x135   : > { %v2140_v12 = vadd.f32 %v2133_v9, %v2132_v4  ;;  %v2859_v13 = vpack.c.bf16 %v2161_v49, %v2160_v29  ;;  %v1694_v6 = vadd.f32 %v1678_v53, %v1559_v19 }
 0x137   : > { %2860 = vst [vmem:[%s3544_s29] sm:$0xff] %v2859_v13   ;;  %v1940_v37 = vadd.f32 %v1924_v36, %v1694_v6 }
 0x138   : > { %v2096_v18 = vpop.f32.mrf.mxu0 }
 0x139   : > { %v2113_v56 = vadd.f32 %v2096_v18, %v1939_v15  ;;  %v1686_v31 = vpop.f32.mrf.mxu2  ;;  %v1929_v21 = vpop.f32.mrf.mxu3 }
 0x13a   : > { %v1546_v32 = vpop.f32.mrf.mxu1 }
 0x13b   : > { %v2120_v23 = vadd.f32 %v2119_v51, %v2113_v56  ;;  %v2134_v24 = vmul.f32 %v2113_v56, %v2113_v56  ;;  %v1560_v22 = vadd.f32 %v1546_v32, %v3519_v35  ;;  %v2162_v40 = vadd.f32 %v3536_v28, %v2113_v56 }
 0x13d   : > { %v2141_v33 = vadd.f32 %v2140_v12, %v2134_v24  ;;  %v1695_v42 = vadd.f32 %v1681_v58, %v1560_v22 }
 0x13f   : > { %v1941_v57 = vadd.f32 %v1927_v14, %v1695_v42 }
 0x140   : > { %v2098_v38 = vpop.f32.mrf.mxu0 }
 0x141   : > { %v2114_v46 = vadd.f32 %v2098_v38, %v1940_v37  ;;  %v1688_v35 = vpop.f32.mrf.mxu2  ;;  %v1932_v62 = vpop.f32.mrf.mxu3 }
 0x142   : > { %v1548_v26 = vpop.f32.mrf.mxu1 }
 0x143   : > { %v2121_v50 = vadd.f32 %v2120_v23, %v2114_v46  ;;  %v2135_v17 = vmul.f32 %v2114_v46, %v2114_v46  ;;  %v2163_v52 = vadd.f32 %v3536_v28, %v2114_v46  ;;  %v1561_v47 = vadd.f32 %v1548_v26, %v1387_v43 }
 0x145   : > { %v2142_v53 = vadd.f32 %v2141_v33, %v2135_v17  ;;  %v2864_v55 = vpack.c.bf16 %v2163_v52, %v2162_v40  ;;  %v1696_v44 = vadd.f32 %v1683_v5, %v1561_v47 }
 0x147   : > { %2876 = vst [vmem:[%s3544_s29 + $0x8] sm:$0xff] %v2864_v55   ;;  %v1942_v63 = vadd.f32 %v1929_v21, %v1696_v44 }
 0x148   : > { %v2101_v34 = vpop.f32.mrf.mxu0 }
 0x149   : > { %v2115_v16 = vadd.f32 %v2101_v34, %v1941_v57  ;;  %v2106_v36 = vpop.f32.mrf.mxu2  ;;  %v1934_v13 = vpop.f32.mrf.mxu3 }
 0x14a   : > { %v1551_v27 = vpop.f32.mrf.mxu1 }
 0x14b   : > { %v2122_v41 = vadd.f32 %v2121_v50, %v2115_v16  ;;  %v2136_v30 = vmul.f32 %v2115_v16, %v2115_v16  ;;  %v1562_v58 = vadd.f32 %v1551_v27, %v1388_v61  ;;  %v2164_v39 = vadd.f32 %v3536_v28, %v2115_v16 }
 0x14d   : > { %v2143_v60 = vadd.f32 %v2142_v53, %v2136_v30  ;;  %v1697_v1 = vadd.f32 %v1686_v31, %v1562_v58 }
 0x14f   : > { %v1943_v25 = vadd.f32 %v1932_v62, %v1697_v1 }
 0x150   : > { %v2103_v7 = vpop.f32.mrf.mxu0 }
 0x151   : > { %v2116_v59 = vadd.f32 %v2103_v7, %v1942_v63  ;;  %v2117_v2 = vadd.f32 %v2106_v36, %v1943_v25  ;;  %v2108_v54 = vpop.f32.mrf.mxu2 }
 0x152   : > { %v1553_v29 = vpop.f32.mrf.mxu1 }
 0x153   : > { %v2123_v3 = vadd.f32 %v2122_v41, %v2116_v59  ;;  %v2137_v4 = vmul.f32 %v2116_v59, %v2116_v59  ;;  %v2165_v5 = vadd.f32 %v3536_v28, %v2116_v59  ;;  %v2138_v51 = vmul.f32 %v2117_v2, %v2117_v2 }
 0x154   : > { %v1563_v9 = vadd.f32 %v1553_v29, %v1389_v45  ;;  %v2166_v18 = vadd.f32 %v3536_v28, %v2117_v2 }
 0x155   : > { %v2144_v49 = vadd.f32 %v2143_v60, %v2137_v4  ;;  %v2869_v10 = vpack.c.bf16 %v2165_v5, %v2164_v39  ;;  %v2124_v48 = vadd.f32 %v2123_v3, %v2117_v2 }
 0x156   : > { %v1698_v11 = vadd.f32 %v1688_v35, %v1563_v9 }
 0x157   : > { %2877 = vst [vmem:[%s3544_s29 + $0x10] sm:$0xff] %v2869_v10   ;;  %v2145_v12 = vadd.f32 %v2144_v49, %v2138_v51 }
 0x158   : > { %v1944_v15 = vadd.f32 %v1934_v13, %v1698_v11 }
 0x15a   : > { %v2118_v19 = vadd.f32 %v2108_v54, %v1944_v15 }
 0x15c   : > { %v2125_v56 = vadd.f32 %v2124_v48, %v2118_v19  ;;  %v2139_v6 = vmul.f32 %v2118_v19, %v2118_v19  ;;  %v2167_v14 = vadd.f32 %v3536_v28, %v2118_v19 }
 0x15e   : > { %v2126_v23 = vrot.slane %v2125_v56, 4  ;;  %v2146_v24 = vadd.f32 %v2145_v12, %v2139_v6  ;;  %v2874_v31 = vpack.c.bf16 %v2167_v14, %v2166_v18 }
 0x160   : > { %v2127_v32 = vadd.f32 %v2126_v23, %v2125_v56  ;;  %v2147_v33 = vrot.slane %v2146_v24, 4  ;;  %2878 = vst [vmem:[%s3544_s29 + $0x18] sm:$0xff] %v2874_v31  }
 0x162   : > { %v2128_v37 = vrot.slane %v2127_v32, 2  ;;  %v2148_v22 = vadd.f32 %v2147_v33, %v2146_v24 }
 0x164   : > { %v2129_v8 = vadd.f32 %v2128_v37, %v2127_v32  ;;  %v2149_v38 = vrot.slane %v2148_v22, 2 }
 0x166   : > { %v2130_v46 = vrot.slane %v2129_v8, 1  ;;  %v2150_v42 = vadd.f32 %v2149_v38, %v2148_v22 }
 0x168   : > { %v2151_v43 = vrot.slane %v2150_v42, 1  ;;  %v2131_v40 = vadd.f32 %v2130_v46, %v2129_v8 }
 0x16a   : > { %v2152_v28 = vadd.f32 %v2151_v43, %v2150_v42 }
 0x16c   : > { %v2154_v50 = vsel %vm271_vm0, %v2131_v40, %v2152_v28 }
 0x16d   : > { %2155 = vst [vmem:[%s208_s7] sm:$0x3] %v2154_v50 }
 0x16e PF: > { %s15_s15 = sadd.s32 1, %s2911_s15  }
 0x16f   : > { %p12_p4 = scmp.ge.s32.totalorder %s15_s15, 4  }
 0x171   :  { %14 = sbr.rel (!%p12_p4) target bundleno = 1 (0x1), region = 85 }

</bundles_post_ra>
